<compile_context>
chip_gen: v6e
topology: v6e:2x2x1
jax: 0.10.0
libtpu: 0.0.40
codegen_flags: <defaults>
</compile_context>

<pallas_src>
import jax
import jax.numpy as jnp
from jax.experimental import pallas as pl
from jax.experimental.pallas import tpu as pltpu


# ------------------------------ helpers ------------------------------

def _round_up(n, m):
    return ((n + m - 1) // m) * m


def _pad_axis(a, axis, size):
    if a.shape[axis] == size:
        return a
    widths = [(0, 0)] * a.ndim
    widths[axis] = (0, size - a.shape[axis])
    return jnp.pad(a, widths)


# ---------------------------- fused Pallas kernel ----------------------------

def lenet_kernel(x_ref, w1t_ref, b1_ref, w2t_ref, b2_ref,
                 fw1_ref, fb1_ref, fw2_ref, fb2_ref,
                 out_ref, l1_ref, y1_ref, l2_ref, y2_ref, xf_ref):
    """Whole LeNet forward for one batch tile; everything stays in VMEM.

    x_ref  : (bt, 32*32*cin) f32   flattened zero-padded image, row-major (h, w, ci)
    w1t_ref: (5*32*cin, 168) bf16  conv1 Toeplitz weights, cols ordered (j%2, j//2, co6)
    w2t_ref: (5*14*6, 160)   bf16  conv2 Toeplitz weights, cols ordered (j2%2, j2//2, co16)
    fw1/fw2: (400,128)/(128,128) bf16 ; biases are (1, N) f32 rows
    out_ref: (bt, 128) f32 lane-dense logits (real classes in the first num_classes lanes)
    """
    bt = x_ref.shape[0]
    rowlen = x_ref.shape[1] // 32          # 32 * cin  (padded image row, flattened)
    win1 = w1t_ref.shape[0]                # 5 * 32 * cin
    n1c = w1t_ref.shape[1]                 # 168 = 28 * 6
    h1 = l1_ref.shape[0] // bt             # 28 conv1 output rows
    hp1 = h1 // 2                          # 14 pooled rows
    half1c = n1c // 2                      # 84 = 14 * 6 pooled cols
    n2c = w2t_ref.shape[1]                 # 160 = 10 * 16
    h2 = l2_ref.shape[0] // bt             # 10 conv2 output rows
    hp2 = h2 // 2                          # 5 pooled rows
    half2c = n2c // 2                      # 80 = 5 * 16 pooled cols
    kh2 = l2_ref.shape[1] // half1c        # 5 conv2 kernel rows

    # ---- conv1 + bias + relu + 2x2 maxpool ----
    xv = x_ref[...].astype(jnp.bfloat16)                               # (bt, 1024*cin)
    for i in range(h1):                                                # im2row, rows (i%2, i//2, b)
        r = ((i % 2) * hp1 + (i // 2)) * bt
        l1_ref[r:r + bt, :] = xv[:, i * rowlen: i * rowlen + win1]
    y1_ref[...] = jnp.maximum(
        jnp.dot(l1_ref[...], w1t_ref[...], preferred_element_type=jnp.float32) + b1_ref[...],
        0.0)
    p1 = jnp.maximum(y1_ref[0:hp1 * bt, :], y1_ref[hp1 * bt:h1 * bt, :])     # pool over H
    p1 = jnp.maximum(p1[:, 0:half1c], p1[:, half1c:n1c]).astype(jnp.bfloat16)  # pool over W
    # p1: (14*bt, 84), rows = (p, b), cols = (q, ci6)

    # ---- conv2 + bias + relu + 2x2 maxpool ----
    for i2 in range(h2):                                               # rows (i2%2, i2//2, b)
        r = ((i2 % 2) * hp2 + (i2 // 2)) * bt
        for dp in range(kh2):                                          # 5 input rows per window
            l2_ref[r:r + bt, dp * half1c:(dp + 1) * half1c] = \
                p1[(i2 + dp) * bt:(i2 + dp + 1) * bt, :]
    y2_ref[...] = jnp.maximum(
        jnp.dot(l2_ref[...], w2t_ref[...], preferred_element_type=jnp.float32) + b2_ref[...],
        0.0)
    p2 = jnp.maximum(y2_ref[0:hp2 * bt, :], y2_ref[hp2 * bt:h2 * bt, :])
    p2 = jnp.maximum(p2[:, 0:half2c], p2[:, half2c:n2c]).astype(jnp.bfloat16)
    # p2: (5*bt, 80), rows = (p2, b), cols = (q2, co16)

    # ---- flatten to (bt, 400) in (p2, q2, co) order (folded into fw1 at prep time) ----
    for pr in range(hp2):
        xf_ref[:, pr * half2c:(pr + 1) * half2c] = p2[pr * bt:(pr + 1) * bt, :]

    # ---- fc1 + relu + fc2 ----
    h = jnp.dot(xf_ref[...], fw1_ref[...], preferred_element_type=jnp.float32) + fb1_ref[...]
    h = jnp.maximum(h, 0.0).astype(jnp.bfloat16)
    out_ref[...] = jnp.dot(h, fw2_ref[...], preferred_element_type=jnp.float32) + fb2_ref[...]


def lenet_fused(xflat, p, bt):
    """xflat: (b_pad, 32*32*cin) f32 -> (b_pad, 128) f32 logits (lane-dense)."""
    b_pad, k_in = xflat.shape
    grid = (b_pad // bt,)
    return pl.pallas_call(
        lenet_kernel,
        out_shape=jax.ShapeDtypeStruct((b_pad, 128), jnp.float32),
        grid_spec=pltpu.PrefetchScalarGridSpec(
            num_scalar_prefetch=0,
            grid=grid,
            in_specs=[
                pl.BlockSpec((bt, k_in), lambda i: (i, 0)),
                pl.BlockSpec(p["w1t"].shape, lambda i: (0, 0)),
                pl.BlockSpec(p["b1"].shape, lambda i: (0, 0)),
                pl.BlockSpec(p["w2t"].shape, lambda i: (0, 0)),
                pl.BlockSpec(p["b2"].shape, lambda i: (0, 0)),
                pl.BlockSpec(p["fw1"].shape, lambda i: (0, 0)),
                pl.BlockSpec(p["fb1"].shape, lambda i: (0, 0)),
                pl.BlockSpec(p["fw2"].shape, lambda i: (0, 0)),
                pl.BlockSpec(p["fb2"].shape, lambda i: (0, 0)),
            ],
            out_specs=pl.BlockSpec((bt, 128), lambda i: (i, 0)),
            scratch_shapes=[
                pltpu.VMEM((28 * bt, p["w1t"].shape[0]), jnp.bfloat16),   # conv1 im2row slab
                pltpu.VMEM((28 * bt, p["w1t"].shape[1]), jnp.float32),    # conv1 relu output
                pltpu.VMEM((10 * bt, p["w2t"].shape[0]), jnp.bfloat16),   # conv2 im2row slab
                pltpu.VMEM((10 * bt, p["w2t"].shape[1]), jnp.float32),    # conv2 relu output
                pltpu.VMEM((bt, p["fw1"].shape[0]), jnp.bfloat16),        # flattened fc input
            ],
        ),
        compiler_params=pltpu.CompilerParams(
            dimension_semantics=("parallel",),
            vmem_limit_bytes=32 * 1024 * 1024,
        ),
    )(xflat, p["w1t"], p["b1"], p["w2t"], p["b2"],
      p["fw1"], p["fb1"], p["fw2"], p["fb2"])


# ------------------------ thin JAX glue (input layout only) -------------------------

def net_forward(x_nchw, params, num_classes=10):
    B, cin, H, W = x_nchw.shape
    assert (H, W) == (28, 28), "LeNet geometry (fc1 expects 16*5*5) requires 28x28 input"
    x = jnp.transpose(x_nchw, (0, 2, 3, 1)).astype(jnp.float32)        # NHWC
    xp = jnp.pad(x, ((0, 0), (2, 2), (2, 2), (0, 0)))                  # conv1 padding=2 -> 32x32
    xflat = xp.reshape(B, 32 * 32 * cin)

    # Batch tiling: blocks multiple of 8 (sublane-aligned), capped for VMEM/value pressure,
    # and >= 2 grid steps so v7x can shard batch tiles across both TensorCores.
    bt = min(32, _round_up(max((B + 7) // 8, 1), 8))
    b_pad = max(_round_up(B, bt), 2 * bt)
    xflat = _pad_axis(xflat, 0, b_pad)

    logits = lenet_fused(xflat, params, bt)                            # (b_pad, 128) f32
    return logits[:B, :num_classes]


# ------------------------ weight prep (PyTorch layouts in) -------------------------

def init_torch_params(key, in_channels=1, num_classes=10):
    """Random weights in native PyTorch layouts (OIHW convs, (out,in) linears)."""
    ks = jax.random.split(key, 8)

    def u(k, shape, fan_in):
        bound = 1.0 / (fan_in ** 0.5)
        return jax.random.uniform(k, shape, jnp.float32, -bound, bound)

    return {
        "conv1_w": u(ks[0], (6, in_channels, 5, 5), 25 * in_channels),
        "conv1_b": u(ks[1], (6,), 25 * in_channels),
        "conv2_w": u(ks[2], (16, 6, 5, 5), 25 * 6),
        "conv2_b": u(ks[3], (16,), 25 * 6),
        "fc1_w": u(ks[4], (120, 16 * 5 * 5), 16 * 5 * 5),
        "fc1_b": u(ks[5], (120,), 16 * 5 * 5),
        "fc2_w": u(ks[6], (num_classes, 120), 120),
        "fc2_b": u(ks[7], (num_classes,), 120),
    }


def prepare_params(pt):
    """One-time conversion of PyTorch-layout weights into Toeplitz / matmul kernel layouts."""
    cin = pt["conv1_w"].shape[1]
    num_classes = pt["fc2_w"].shape[0]
    assert num_classes <= 128

    # ---- conv1 Toeplitz: rows (dh, w<32, ci), cols ((j%2)*14 + j//2, co) ----
    w1 = jnp.transpose(pt["conv1_w"], (2, 3, 1, 0))                    # (kh, kw, ci, co)
    j = jnp.arange(28)
    w = jnp.arange(32)
    rel = w[:, None] - j[None, :]                                      # (32, 28) = kw
    valid = ((rel >= 0) & (rel <= 4)).astype(w1.dtype)
    relc = jnp.clip(rel, 0, 4)
    t1 = w1[:, relc, :, :] * valid[None, :, :, None, None]             # (5, 32, 28, cin, 6)
    t1 = jnp.transpose(t1, (0, 1, 3, 2, 4))                            # (5, 32, cin, 28, 6)
    jperm = jnp.concatenate([jnp.arange(0, 28, 2), jnp.arange(1, 28, 2)])
    w1t = t1[:, :, :, jperm, :].reshape(5 * 32 * cin, 28 * 6).astype(jnp.bfloat16)
    b1 = jnp.tile(pt["conv1_b"], 28).reshape(1, 168).astype(jnp.float32)

    # ---- conv2 Toeplitz: rows (dp, q<14, ci6), cols ((j2%2)*5 + j2//2, co) ----
    w2 = jnp.transpose(pt["conv2_w"], (2, 3, 1, 0))                    # (5, 5, 6, 16)
    j2 = jnp.arange(10)
    q = jnp.arange(14)
    rel2 = q[:, None] - j2[None, :]                                    # (14, 10)
    valid2 = ((rel2 >= 0) & (rel2 <= 4)).astype(w2.dtype)
    rel2c = jnp.clip(rel2, 0, 4)
    t2 = w2[:, rel2c, :, :] * valid2[None, :, :, None, None]           # (5, 14, 10, 6, 16)
    t2 = jnp.transpose(t2, (0, 1, 3, 2, 4))                            # (5, 14, 6, 10, 16)
    j2perm = jnp.concatenate([jnp.arange(0, 10, 2), jnp.arange(1, 10, 2)])
    w2t = t2[:, :, :, j2perm, :].reshape(5 * 14 * 6, 10 * 16).astype(jnp.bfloat16)
    b2 = jnp.tile(pt["conv2_b"], 10).reshape(1, 160).astype(jnp.float32)

    # ---- fc1: fold PyTorch channel-major flatten (co,p2,q2) into our (p2,q2,co) rows; pad 120->128
    fw1 = pt["fc1_w"].reshape(120, 16, 5, 5).transpose(2, 3, 1, 0).reshape(400, 120)
    fw1 = jnp.pad(fw1, ((0, 0), (0, 8))).astype(jnp.bfloat16)
    fb1 = jnp.pad(pt["fc1_b"].reshape(1, 120), ((0, 0), (0, 8))).astype(jnp.float32)

    # ---- fc2: pad 120->128 rows, classes->128 cols (lane-dense logits, sliced in glue) ----
    fw2 = jnp.pad(pt["fc2_w"].T, ((0, 8), (0, 128 - num_classes))).astype(jnp.bfloat16)
    fb2 = jnp.pad(pt["fc2_b"].reshape(1, num_classes),
                  ((0, 0), (0, 128 - num_classes))).astype(jnp.float32)

    return dict(w1t=w1t, b1=b1, w2t=w2t, b2=b2, fw1=fw1, fb1=fb1, fw2=fw2, fb2=fb2)


# ------------------------ pure-JAX reference (for verification) -------------------------

def net_reference(x, pt):
    dn = ("NCHW", "OIHW", "NCHW")
    y = jax.lax.conv_general_dilated(x, pt["conv1_w"], (1, 1), ((2, 2), (2, 2)),
                                     dimension_numbers=dn)
    y = jax.nn.relu(y + pt["conv1_b"][None, :, None, None])
    y = jax.lax.reduce_window(y, -jnp.inf, jax.lax.max, (1, 1, 2, 2), (1, 1, 2, 2), "VALID")
    y = jax.lax.conv_general_dilated(y, pt["conv2_w"], (1, 1), "VALID", dimension_numbers=dn)
    y = jax.nn.relu(y + pt["conv2_b"][None, :, None, None])
    y = jax.lax.reduce_window(y, -jnp.inf, jax.lax.max, (1, 1, 2, 2), (1, 1, 2, 2), "VALID")
    y = y.reshape(y.shape[0], -1)
    y = jax.nn.relu(y @ pt["fc1_w"].T + pt["fc1_b"])
    return y @ pt["fc2_w"].T + pt["fc2_b"]


if __name__ == "__main__":
    key = jax.random.PRNGKey(0)
    kx, kp = jax.random.split(key)
    x = jax.random.normal(kx, (2, 1, 28, 28), jnp.float32)   # PyTorch NCHW input
    pt = init_torch_params(kp)
    params = prepare_params(pt)

    out = jax.jit(net_forward)(x, params)
    out = jax.block_until_ready(out)

    assert out.shape == (2, 10), out.shape
    assert bool(jnp.all(jnp.isfinite(out)))

    ref = net_reference(x, pt)
    err = float(jnp.max(jnp.abs(out - ref)))
    assert err < 5e-2, f"max abs err vs reference = {err}"
    print("KERNEL_OK")
</pallas_src>

<mosaic_0001>
module attributes {stable_mosaic.version = 11 : i64} {
  func.func @lenet_kernel(%arg0: i32, %arg1: memref<8x1024xf32, #tpu.memory_space<vmem>>, %arg2: memref<160x168xbf16, #tpu.memory_space<vmem>>, %arg3: memref<1x168xf32, #tpu.memory_space<vmem>>, %arg4: memref<420x160xbf16, #tpu.memory_space<vmem>>, %arg5: memref<1x160xf32, #tpu.memory_space<vmem>>, %arg6: memref<400x128xbf16, #tpu.memory_space<vmem>>, %arg7: memref<1x128xf32, #tpu.memory_space<vmem>>, %arg8: memref<128x128xbf16, #tpu.memory_space<vmem>>, %arg9: memref<1x128xf32, #tpu.memory_space<vmem>>, %arg10: memref<8x128xf32, #tpu.memory_space<vmem>>, %arg11: memref<224x160xbf16, #tpu.memory_space<vmem>>, %arg12: memref<224x168xf32, #tpu.memory_space<vmem>>, %arg13: memref<80x420xbf16, #tpu.memory_space<vmem>>, %arg14: memref<80x160xf32, #tpu.memory_space<vmem>>, %arg15: memref<8x400xbf16, #tpu.memory_space<vmem>>) attributes {dimension_semantics = [#tpu.dimension_semantics<parallel>], iteration_bounds = array<i64: 2>, scalar_prefetch = 0 : i64, scratch_operands = 5 : i64, tpu.core_type = #tpu.core_type<tc>, window_params = [{transform_indices = @transform_0, window_bounds = array<i64: 8, 1024>}, {pipeline_mode = #tpu.pipeline_mode<synchronous>, transform_indices = @transform_1, window_bounds = array<i64: 160, 168>}, {pipeline_mode = #tpu.pipeline_mode<synchronous>, transform_indices = @transform_2, window_bounds = array<i64: 1, 168>}, {pipeline_mode = #tpu.pipeline_mode<synchronous>, transform_indices = @transform_3, window_bounds = array<i64: 420, 160>}, {pipeline_mode = #tpu.pipeline_mode<synchronous>, transform_indices = @transform_4, window_bounds = array<i64: 1, 160>}, {pipeline_mode = #tpu.pipeline_mode<synchronous>, transform_indices = @transform_5, window_bounds = array<i64: 400, 128>}, {pipeline_mode = #tpu.pipeline_mode<synchronous>, transform_indices = @transform_6, window_bounds = array<i64: 1, 128>}, {pipeline_mode = #tpu.pipeline_mode<synchronous>, transform_indices = @transform_7, window_bounds = array<i64: 128, 128>}, {pipeline_mode = #tpu.pipeline_mode<synchronous>, transform_indices = @transform_8, window_bounds = array<i64: 1, 128>}, {transform_indices = @transform_9, window_bounds = array<i64: 8, 128>}]} {
    %c0 = arith.constant 0 : index
    %c0_0 = arith.constant 0 : index
    %0 = vector.load %arg1[%c0, %c0_0] : memref<8x1024xf32, #tpu.memory_space<vmem>>, vector<8x1024xf32>
    %1 = arith.truncf %0 : vector<8x1024xf32> to vector<8x1024xbf16>
    %2 = vector.extract_strided_slice %1 {offsets = [0, 0], sizes = [8, 160], strides = [1, 1]} : vector<8x1024xbf16> to vector<8x160xbf16>
    %c0_1 = arith.constant 0 : index
    %c0_2 = arith.constant 0 : index
    %3 = vector.load %arg11[%c0_1, %c0_2] : memref<224x160xbf16, #tpu.memory_space<vmem>>, vector<8x160xbf16>
    tpu.vector_store %arg11[%c0_1, %c0_2], %2 {strides = array<i32>} : memref<224x160xbf16, #tpu.memory_space<vmem>>, vector<8x160xbf16>,
    %4 = vector.extract_strided_slice %1 {offsets = [0, 32], sizes = [8, 160], strides = [1, 1]} : vector<8x1024xbf16> to vector<8x160xbf16>
    %c112 = arith.constant 112 : index
    %c0_3 = arith.constant 0 : index
    %5 = vector.load %arg11[%c112, %c0_3] : memref<224x160xbf16, #tpu.memory_space<vmem>>, vector<8x160xbf16>
    tpu.vector_store %arg11[%c112, %c0_3], %4 {strides = array<i32>} : memref<224x160xbf16, #tpu.memory_space<vmem>>, vector<8x160xbf16>,
    %6 = vector.extract_strided_slice %1 {offsets = [0, 64], sizes = [8, 160], strides = [1, 1]} : vector<8x1024xbf16> to vector<8x160xbf16>
    %c8 = arith.constant 8 : index
    %c0_4 = arith.constant 0 : index
    %7 = vector.load %arg11[%c8, %c0_4] : memref<224x160xbf16, #tpu.memory_space<vmem>>, vector<8x160xbf16>
    tpu.vector_store %arg11[%c8, %c0_4], %6 {strides = array<i32>} : memref<224x160xbf16, #tpu.memory_space<vmem>>, vector<8x160xbf16>,
    %8 = vector.extract_strided_slice %1 {offsets = [0, 96], sizes = [8, 160], strides = [1, 1]} : vector<8x1024xbf16> to vector<8x160xbf16>
    %c120 = arith.constant 120 : index
    %c0_5 = arith.constant 0 : index
    %9 = vector.load %arg11[%c120, %c0_5] : memref<224x160xbf16, #tpu.memory_space<vmem>>, vector<8x160xbf16>
    tpu.vector_store %arg11[%c120, %c0_5], %8 {strides = array<i32>} : memref<224x160xbf16, #tpu.memory_space<vmem>>, vector<8x160xbf16>,
    %10 = vector.extract_strided_slice %1 {offsets = [0, 128], sizes = [8, 160], strides = [1, 1]} : vector<8x1024xbf16> to vector<8x160xbf16>
    %c16 = arith.constant 16 : index
    %c0_6 = arith.constant 0 : index
    %11 = vector.load %arg11[%c16, %c0_6] : memref<224x160xbf16, #tpu.memory_space<vmem>>, vector<8x160xbf16>
    tpu.vector_store %arg11[%c16, %c0_6], %10 {strides = array<i32>} : memref<224x160xbf16, #tpu.memory_space<vmem>>, vector<8x160xbf16>,
    %12 = vector.extract_strided_slice %1 {offsets = [0, 160], sizes = [8, 160], strides = [1, 1]} : vector<8x1024xbf16> to vector<8x160xbf16>
    %c128 = arith.constant 128 : index
    %c0_7 = arith.constant 0 : index
    %13 = vector.load %arg11[%c128, %c0_7] : memref<224x160xbf16, #tpu.memory_space<vmem>>, vector<8x160xbf16>
    tpu.vector_store %arg11[%c128, %c0_7], %12 {strides = array<i32>} : memref<224x160xbf16, #tpu.memory_space<vmem>>, vector<8x160xbf16>,
    %14 = vector.extract_strided_slice %1 {offsets = [0, 192], sizes = [8, 160], strides = [1, 1]} : vector<8x1024xbf16> to vector<8x160xbf16>
    %c24 = arith.constant 24 : index
    %c0_8 = arith.constant 0 : index
    %15 = vector.load %arg11[%c24, %c0_8] : memref<224x160xbf16, #tpu.memory_space<vmem>>, vector<8x160xbf16>
    tpu.vector_store %arg11[%c24, %c0_8], %14 {strides = array<i32>} : memref<224x160xbf16, #tpu.memory_space<vmem>>, vector<8x160xbf16>,
    %16 = vector.extract_strided_slice %1 {offsets = [0, 224], sizes = [8, 160], strides = [1, 1]} : vector<8x1024xbf16> to vector<8x160xbf16>
    %c136 = arith.constant 136 : index
    %c0_9 = arith.constant 0 : index
    %17 = vector.load %arg11[%c136, %c0_9] : memref<224x160xbf16, #tpu.memory_space<vmem>>, vector<8x160xbf16>
    tpu.vector_store %arg11[%c136, %c0_9], %16 {strides = array<i32>} : memref<224x160xbf16, #tpu.memory_space<vmem>>, vector<8x160xbf16>,
    %18 = vector.extract_strided_slice %1 {offsets = [0, 256], sizes = [8, 160], strides = [1, 1]} : vector<8x1024xbf16> to vector<8x160xbf16>
    %c32 = arith.constant 32 : index
    %c0_10 = arith.constant 0 : index
    %19 = vector.load %arg11[%c32, %c0_10] : memref<224x160xbf16, #tpu.memory_space<vmem>>, vector<8x160xbf16>
    tpu.vector_store %arg11[%c32, %c0_10], %18 {strides = array<i32>} : memref<224x160xbf16, #tpu.memory_space<vmem>>, vector<8x160xbf16>,
    %20 = vector.extract_strided_slice %1 {offsets = [0, 288], sizes = [8, 160], strides = [1, 1]} : vector<8x1024xbf16> to vector<8x160xbf16>
    %c144 = arith.constant 144 : index
    %c0_11 = arith.constant 0 : index
    %21 = vector.load %arg11[%c144, %c0_11] : memref<224x160xbf16, #tpu.memory_space<vmem>>, vector<8x160xbf16>
    tpu.vector_store %arg11[%c144, %c0_11], %20 {strides = array<i32>} : memref<224x160xbf16, #tpu.memory_space<vmem>>, vector<8x160xbf16>,
    %22 = vector.extract_strided_slice %1 {offsets = [0, 320], sizes = [8, 160], strides = [1, 1]} : vector<8x1024xbf16> to vector<8x160xbf16>
    %c40 = arith.constant 40 : index
    %c0_12 = arith.constant 0 : index
    %23 = vector.load %arg11[%c40, %c0_12] : memref<224x160xbf16, #tpu.memory_space<vmem>>, vector<8x160xbf16>
    tpu.vector_store %arg11[%c40, %c0_12], %22 {strides = array<i32>} : memref<224x160xbf16, #tpu.memory_space<vmem>>, vector<8x160xbf16>,
    %24 = vector.extract_strided_slice %1 {offsets = [0, 352], sizes = [8, 160], strides = [1, 1]} : vector<8x1024xbf16> to vector<8x160xbf16>
    %c152 = arith.constant 152 : index
    %c0_13 = arith.constant 0 : index
    %25 = vector.load %arg11[%c152, %c0_13] : memref<224x160xbf16, #tpu.memory_space<vmem>>, vector<8x160xbf16>
    tpu.vector_store %arg11[%c152, %c0_13], %24 {strides = array<i32>} : memref<224x160xbf16, #tpu.memory_space<vmem>>, vector<8x160xbf16>,
    %26 = vector.extract_strided_slice %1 {offsets = [0, 384], sizes = [8, 160], strides = [1, 1]} : vector<8x1024xbf16> to vector<8x160xbf16>
    %c48 = arith.constant 48 : index
    %c0_14 = arith.constant 0 : index
    %27 = vector.load %arg11[%c48, %c0_14] : memref<224x160xbf16, #tpu.memory_space<vmem>>, vector<8x160xbf16>
    tpu.vector_store %arg11[%c48, %c0_14], %26 {strides = array<i32>} : memref<224x160xbf16, #tpu.memory_space<vmem>>, vector<8x160xbf16>,
    %28 = vector.extract_strided_slice %1 {offsets = [0, 416], sizes = [8, 160], strides = [1, 1]} : vector<8x1024xbf16> to vector<8x160xbf16>
    %c160 = arith.constant 160 : index
    %c0_15 = arith.constant 0 : index
    %29 = vector.load %arg11[%c160, %c0_15] : memref<224x160xbf16, #tpu.memory_space<vmem>>, vector<8x160xbf16>
    tpu.vector_store %arg11[%c160, %c0_15], %28 {strides = array<i32>} : memref<224x160xbf16, #tpu.memory_space<vmem>>, vector<8x160xbf16>,
    %30 = vector.extract_strided_slice %1 {offsets = [0, 448], sizes = [8, 160], strides = [1, 1]} : vector<8x1024xbf16> to vector<8x160xbf16>
    %c56 = arith.constant 56 : index
    %c0_16 = arith.constant 0 : index
    %31 = vector.load %arg11[%c56, %c0_16] : memref<224x160xbf16, #tpu.memory_space<vmem>>, vector<8x160xbf16>
    tpu.vector_store %arg11[%c56, %c0_16], %30 {strides = array<i32>} : memref<224x160xbf16, #tpu.memory_space<vmem>>, vector<8x160xbf16>,
    %32 = vector.extract_strided_slice %1 {offsets = [0, 480], sizes = [8, 160], strides = [1, 1]} : vector<8x1024xbf16> to vector<8x160xbf16>
    %c168 = arith.constant 168 : index
    %c0_17 = arith.constant 0 : index
    %33 = vector.load %arg11[%c168, %c0_17] : memref<224x160xbf16, #tpu.memory_space<vmem>>, vector<8x160xbf16>
    tpu.vector_store %arg11[%c168, %c0_17], %32 {strides = array<i32>} : memref<224x160xbf16, #tpu.memory_space<vmem>>, vector<8x160xbf16>,
    %34 = vector.extract_strided_slice %1 {offsets = [0, 512], sizes = [8, 160], strides = [1, 1]} : vector<8x1024xbf16> to vector<8x160xbf16>
    %c64 = arith.constant 64 : index
    %c0_18 = arith.constant 0 : index
    %35 = vector.load %arg11[%c64, %c0_18] : memref<224x160xbf16, #tpu.memory_space<vmem>>, vector<8x160xbf16>
    tpu.vector_store %arg11[%c64, %c0_18], %34 {strides = array<i32>} : memref<224x160xbf16, #tpu.memory_space<vmem>>, vector<8x160xbf16>,
    %36 = vector.extract_strided_slice %1 {offsets = [0, 544], sizes = [8, 160], strides = [1, 1]} : vector<8x1024xbf16> to vector<8x160xbf16>
    %c176 = arith.constant 176 : index
    %c0_19 = arith.constant 0 : index
    %37 = vector.load %arg11[%c176, %c0_19] : memref<224x160xbf16, #tpu.memory_space<vmem>>, vector<8x160xbf16>
    tpu.vector_store %arg11[%c176, %c0_19], %36 {strides = array<i32>} : memref<224x160xbf16, #tpu.memory_space<vmem>>, vector<8x160xbf16>,
    %38 = vector.extract_strided_slice %1 {offsets = [0, 576], sizes = [8, 160], strides = [1, 1]} : vector<8x1024xbf16> to vector<8x160xbf16>
    %c72 = arith.constant 72 : index
    %c0_20 = arith.constant 0 : index
    %39 = vector.load %arg11[%c72, %c0_20] : memref<224x160xbf16, #tpu.memory_space<vmem>>, vector<8x160xbf16>
    tpu.vector_store %arg11[%c72, %c0_20], %38 {strides = array<i32>} : memref<224x160xbf16, #tpu.memory_space<vmem>>, vector<8x160xbf16>,
    %40 = vector.extract_strided_slice %1 {offsets = [0, 608], sizes = [8, 160], strides = [1, 1]} : vector<8x1024xbf16> to vector<8x160xbf16>
    %c184 = arith.constant 184 : index
    %c0_21 = arith.constant 0 : index
    %41 = vector.load %arg11[%c184, %c0_21] : memref<224x160xbf16, #tpu.memory_space<vmem>>, vector<8x160xbf16>
    tpu.vector_store %arg11[%c184, %c0_21], %40 {strides = array<i32>} : memref<224x160xbf16, #tpu.memory_space<vmem>>, vector<8x160xbf16>,
    %42 = vector.extract_strided_slice %1 {offsets = [0, 640], sizes = [8, 160], strides = [1, 1]} : vector<8x1024xbf16> to vector<8x160xbf16>
    %c80 = arith.constant 80 : index
    %c0_22 = arith.constant 0 : index
    %43 = vector.load %arg11[%c80, %c0_22] : memref<224x160xbf16, #tpu.memory_space<vmem>>, vector<8x160xbf16>
    tpu.vector_store %arg11[%c80, %c0_22], %42 {strides = array<i32>} : memref<224x160xbf16, #tpu.memory_space<vmem>>, vector<8x160xbf16>,
    %44 = vector.extract_strided_slice %1 {offsets = [0, 672], sizes = [8, 160], strides = [1, 1]} : vector<8x1024xbf16> to vector<8x160xbf16>
    %c192 = arith.constant 192 : index
    %c0_23 = arith.constant 0 : index
    %45 = vector.load %arg11[%c192, %c0_23] : memref<224x160xbf16, #tpu.memory_space<vmem>>, vector<8x160xbf16>
    tpu.vector_store %arg11[%c192, %c0_23], %44 {strides = array<i32>} : memref<224x160xbf16, #tpu.memory_space<vmem>>, vector<8x160xbf16>,
    %46 = vector.extract_strided_slice %1 {offsets = [0, 704], sizes = [8, 160], strides = [1, 1]} : vector<8x1024xbf16> to vector<8x160xbf16>
    %c88 = arith.constant 88 : index
    %c0_24 = arith.constant 0 : index
    %47 = vector.load %arg11[%c88, %c0_24] : memref<224x160xbf16, #tpu.memory_space<vmem>>, vector<8x160xbf16>
    tpu.vector_store %arg11[%c88, %c0_24], %46 {strides = array<i32>} : memref<224x160xbf16, #tpu.memory_space<vmem>>, vector<8x160xbf16>,
    %48 = vector.extract_strided_slice %1 {offsets = [0, 736], sizes = [8, 160], strides = [1, 1]} : vector<8x1024xbf16> to vector<8x160xbf16>
    %c200 = arith.constant 200 : index
    %c0_25 = arith.constant 0 : index
    %49 = vector.load %arg11[%c200, %c0_25] : memref<224x160xbf16, #tpu.memory_space<vmem>>, vector<8x160xbf16>
    tpu.vector_store %arg11[%c200, %c0_25], %48 {strides = array<i32>} : memref<224x160xbf16, #tpu.memory_space<vmem>>, vector<8x160xbf16>,
    %50 = vector.extract_strided_slice %1 {offsets = [0, 768], sizes = [8, 160], strides = [1, 1]} : vector<8x1024xbf16> to vector<8x160xbf16>
    %c96 = arith.constant 96 : index
    %c0_26 = arith.constant 0 : index
    %51 = vector.load %arg11[%c96, %c0_26] : memref<224x160xbf16, #tpu.memory_space<vmem>>, vector<8x160xbf16>
    tpu.vector_store %arg11[%c96, %c0_26], %50 {strides = array<i32>} : memref<224x160xbf16, #tpu.memory_space<vmem>>, vector<8x160xbf16>,
    %52 = vector.extract_strided_slice %1 {offsets = [0, 800], sizes = [8, 160], strides = [1, 1]} : vector<8x1024xbf16> to vector<8x160xbf16>
    %c208 = arith.constant 208 : index
    %c0_27 = arith.constant 0 : index
    %53 = vector.load %arg11[%c208, %c0_27] : memref<224x160xbf16, #tpu.memory_space<vmem>>, vector<8x160xbf16>
    tpu.vector_store %arg11[%c208, %c0_27], %52 {strides = array<i32>} : memref<224x160xbf16, #tpu.memory_space<vmem>>, vector<8x160xbf16>,
    %54 = vector.extract_strided_slice %1 {offsets = [0, 832], sizes = [8, 160], strides = [1, 1]} : vector<8x1024xbf16> to vector<8x160xbf16>
    %c104 = arith.constant 104 : index
    %c0_28 = arith.constant 0 : index
    %55 = vector.load %arg11[%c104, %c0_28] : memref<224x160xbf16, #tpu.memory_space<vmem>>, vector<8x160xbf16>
    tpu.vector_store %arg11[%c104, %c0_28], %54 {strides = array<i32>} : memref<224x160xbf16, #tpu.memory_space<vmem>>, vector<8x160xbf16>,
    %56 = vector.extract_strided_slice %1 {offsets = [0, 864], sizes = [8, 160], strides = [1, 1]} : vector<8x1024xbf16> to vector<8x160xbf16>
    %c216 = arith.constant 216 : index
    %c0_29 = arith.constant 0 : index
    %57 = vector.load %arg11[%c216, %c0_29] : memref<224x160xbf16, #tpu.memory_space<vmem>>, vector<8x160xbf16>
    tpu.vector_store %arg11[%c216, %c0_29], %56 {strides = array<i32>} : memref<224x160xbf16, #tpu.memory_space<vmem>>, vector<8x160xbf16>,
    %c0_30 = arith.constant 0 : index
    %c0_31 = arith.constant 0 : index
    %58 = vector.load %arg11[%c0_30, %c0_31] : memref<224x160xbf16, #tpu.memory_space<vmem>>, vector<224x160xbf16>
    %c0_32 = arith.constant 0 : index
    %c0_33 = arith.constant 0 : index
    %59 = vector.load %arg2[%c0_32, %c0_33] : memref<160x168xbf16, #tpu.memory_space<vmem>>, vector<160x168xbf16>
    %cst = arith.constant dense<0.000000e+00> : vector<224x168xf32>
    %60 = tpu.matmul %58, %59, %cst {dimension_numbers = #tpu.dot_dimension_numbers<[1], [0], [0], [1], [0, 0, 1, 1], [], []>} : vector<224x160xbf16>, vector<160x168xbf16>, vector<224x168xf32> -> vector<224x168xf32>
    %c0_34 = arith.constant 0 : index
    %c0_35 = arith.constant 0 : index
    %61 = vector.load %arg3[%c0_34, %c0_35] : memref<1x168xf32, #tpu.memory_space<vmem>>, vector<1x168xf32>
    %62 = vector.broadcast %61 : vector<1x168xf32> to vector<224x168xf32>
    %63 = arith.addf %60, %62 : vector<224x168xf32>
    %cst_36 = arith.constant 0.000000e+00 : f32
    %64 = vector.broadcast %cst_36 : f32 to vector<224x168xf32>
    %65 = arith.maximumf %63, %64 : vector<224x168xf32>
    %c0_37 = arith.constant 0 : index
    %c0_38 = arith.constant 0 : index
    %66 = vector.load %arg12[%c0_37, %c0_38] : memref<224x168xf32, #tpu.memory_space<vmem>>, vector<224x168xf32>
    tpu.vector_store %arg12[%c0_37, %c0_38], %65 {strides = array<i32>} : memref<224x168xf32, #tpu.memory_space<vmem>>, vector<224x168xf32>,
    %c0_39 = arith.constant 0 : index
    %c0_40 = arith.constant 0 : index
    %67 = vector.load %arg12[%c0_39, %c0_40] : memref<224x168xf32, #tpu.memory_space<vmem>>, vector<112x168xf32>
    %c112_41 = arith.constant 112 : index
    %c0_42 = arith.constant 0 : index
    %68 = vector.load %arg12[%c112_41, %c0_42] : memref<224x168xf32, #tpu.memory_space<vmem>>, vector<112x168xf32>
    %69 = arith.maximumf %67, %68 : vector<112x168xf32>
    %70 = vector.extract_strided_slice %69 {offsets = [0, 0], sizes = [112, 84], strides = [1, 1]} : vector<112x168xf32> to vector<112x84xf32>
    %71 = vector.extract_strided_slice %69 {offsets = [0, 84], sizes = [112, 84], strides = [1, 1]} : vector<112x168xf32> to vector<112x84xf32>
    %72 = arith.maximumf %70, %71 : vector<112x84xf32>
    %73 = arith.truncf %72 : vector<112x84xf32> to vector<112x84xbf16>
    %74 = vector.extract_strided_slice %73 {offsets = [0, 0], sizes = [8, 84], strides = [1, 1]} : vector<112x84xbf16> to vector<8x84xbf16>
    %c0_43 = arith.constant 0 : index
    %c0_44 = arith.constant 0 : index
    %75 = vector.load %arg13[%c0_43, %c0_44] : memref<80x420xbf16, #tpu.memory_space<vmem>>, vector<8x84xbf16>
    tpu.vector_store %arg13[%c0_43, %c0_44], %74 {strides = array<i32>} : memref<80x420xbf16, #tpu.memory_space<vmem>>, vector<8x84xbf16>,
    %76 = vector.extract_strided_slice %73 {offsets = [8, 0], sizes = [8, 84], strides = [1, 1]} : vector<112x84xbf16> to vector<8x84xbf16>
    %c0_45 = arith.constant 0 : index
    %c84 = arith.constant 84 : index
    %77 = vector.load %arg13[%c0_45, %c84] : memref<80x420xbf16, #tpu.memory_space<vmem>>, vector<8x84xbf16>
    tpu.vector_store %arg13[%c0_45, %c84], %76 {strides = array<i32>} : memref<80x420xbf16, #tpu.memory_space<vmem>>, vector<8x84xbf16>,
    %78 = vector.extract_strided_slice %73 {offsets = [16, 0], sizes = [8, 84], strides = [1, 1]} : vector<112x84xbf16> to vector<8x84xbf16>
    %c0_46 = arith.constant 0 : index
    %c168_47 = arith.constant 168 : index
    %79 = vector.load %arg13[%c0_46, %c168_47] : memref<80x420xbf16, #tpu.memory_space<vmem>>, vector<8x84xbf16>
    tpu.vector_store %arg13[%c0_46, %c168_47], %78 {strides = array<i32>} : memref<80x420xbf16, #tpu.memory_space<vmem>>, vector<8x84xbf16>,
    %80 = vector.extract_strided_slice %73 {offsets = [24, 0], sizes = [8, 84], strides = [1, 1]} : vector<112x84xbf16> to vector<8x84xbf16>
    %c0_48 = arith.constant 0 : index
    %c252 = arith.constant 252 : index
    %81 = vector.load %arg13[%c0_48, %c252] : memref<80x420xbf16, #tpu.memory_space<vmem>>, vector<8x84xbf16>
    tpu.vector_store %arg13[%c0_48, %c252], %80 {strides = array<i32>} : memref<80x420xbf16, #tpu.memory_space<vmem>>, vector<8x84xbf16>,
    %82 = vector.extract_strided_slice %73 {offsets = [32, 0], sizes = [8, 84], strides = [1, 1]} : vector<112x84xbf16> to vector<8x84xbf16>
    %c0_49 = arith.constant 0 : index
    %c336 = arith.constant 336 : index
    %83 = vector.load %arg13[%c0_49, %c336] : memref<80x420xbf16, #tpu.memory_space<vmem>>, vector<8x84xbf16>
    tpu.vector_store %arg13[%c0_49, %c336], %82 {strides = array<i32>} : memref<80x420xbf16, #tpu.memory_space<vmem>>, vector<8x84xbf16>,
    %84 = vector.extract_strided_slice %73 {offsets = [8, 0], sizes = [8, 84], strides = [1, 1]} : vector<112x84xbf16> to vector<8x84xbf16>
    %c40_50 = arith.constant 40 : index
    %c0_51 = arith.constant 0 : index
    %85 = vector.load %arg13[%c40_50, %c0_51] : memref<80x420xbf16, #tpu.memory_space<vmem>>, vector<8x84xbf16>
    tpu.vector_store %arg13[%c40_50, %c0_51], %84 {strides = array<i32>} : memref<80x420xbf16, #tpu.memory_space<vmem>>, vector<8x84xbf16>,
    %86 = vector.extract_strided_slice %73 {offsets = [16, 0], sizes = [8, 84], strides = [1, 1]} : vector<112x84xbf16> to vector<8x84xbf16>
    %c40_52 = arith.constant 40 : index
    %c84_53 = arith.constant 84 : index
    %87 = vector.load %arg13[%c40_52, %c84_53] : memref<80x420xbf16, #tpu.memory_space<vmem>>, vector<8x84xbf16>
    tpu.vector_store %arg13[%c40_52, %c84_53], %86 {strides = array<i32>} : memref<80x420xbf16, #tpu.memory_space<vmem>>, vector<8x84xbf16>,
    %88 = vector.extract_strided_slice %73 {offsets = [24, 0], sizes = [8, 84], strides = [1, 1]} : vector<112x84xbf16> to vector<8x84xbf16>
    %c40_54 = arith.constant 40 : index
    %c168_55 = arith.constant 168 : index
    %89 = vector.load %arg13[%c40_54, %c168_55] : memref<80x420xbf16, #tpu.memory_space<vmem>>, vector<8x84xbf16>
    tpu.vector_store %arg13[%c40_54, %c168_55], %88 {strides = array<i32>} : memref<80x420xbf16, #tpu.memory_space<vmem>>, vector<8x84xbf16>,
    %90 = vector.extract_strided_slice %73 {offsets = [32, 0], sizes = [8, 84], strides = [1, 1]} : vector<112x84xbf16> to vector<8x84xbf16>
    %c40_56 = arith.constant 40 : index
    %c252_57 = arith.constant 252 : index
    %91 = vector.load %arg13[%c40_56, %c252_57] : memref<80x420xbf16, #tpu.memory_space<vmem>>, vector<8x84xbf16>
    tpu.vector_store %arg13[%c40_56, %c252_57], %90 {strides = array<i32>} : memref<80x420xbf16, #tpu.memory_space<vmem>>, vector<8x84xbf16>,
    %92 = vector.extract_strided_slice %73 {offsets = [40, 0], sizes = [8, 84], strides = [1, 1]} : vector<112x84xbf16> to vector<8x84xbf16>
    %c40_58 = arith.constant 40 : index
    %c336_59 = arith.constant 336 : index
    %93 = vector.load %arg13[%c40_58, %c336_59] : memref<80x420xbf16, #tpu.memory_space<vmem>>, vector<8x84xbf16>
    tpu.vector_store %arg13[%c40_58, %c336_59], %92 {strides = array<i32>} : memref<80x420xbf16, #tpu.memory_space<vmem>>, vector<8x84xbf16>,
    %94 = vector.extract_strided_slice %73 {offsets = [16, 0], sizes = [8, 84], strides = [1, 1]} : vector<112x84xbf16> to vector<8x84xbf16>
    %c8_60 = arith.constant 8 : index
    %c0_61 = arith.constant 0 : index
    %95 = vector.load %arg13[%c8_60, %c0_61] : memref<80x420xbf16, #tpu.memory_space<vmem>>, vector<8x84xbf16>
    tpu.vector_store %arg13[%c8_60, %c0_61], %94 {strides = array<i32>} : memref<80x420xbf16, #tpu.memory_space<vmem>>, vector<8x84xbf16>,
    %96 = vector.extract_strided_slice %73 {offsets = [24, 0], sizes = [8, 84], strides = [1, 1]} : vector<112x84xbf16> to vector<8x84xbf16>
    %c8_62 = arith.constant 8 : index
    %c84_63 = arith.constant 84 : index
    %97 = vector.load %arg13[%c8_62, %c84_63] : memref<80x420xbf16, #tpu.memory_space<vmem>>, vector<8x84xbf16>
    tpu.vector_store %arg13[%c8_62, %c84_63], %96 {strides = array<i32>} : memref<80x420xbf16, #tpu.memory_space<vmem>>, vector<8x84xbf16>,
    %98 = vector.extract_strided_slice %73 {offsets = [32, 0], sizes = [8, 84], strides = [1, 1]} : vector<112x84xbf16> to vector<8x84xbf16>
    %c8_64 = arith.constant 8 : index
    %c168_65 = arith.constant 168 : index
    %99 = vector.load %arg13[%c8_64, %c168_65] : memref<80x420xbf16, #tpu.memory_space<vmem>>, vector<8x84xbf16>
    tpu.vector_store %arg13[%c8_64, %c168_65], %98 {strides = array<i32>} : memref<80x420xbf16, #tpu.memory_space<vmem>>, vector<8x84xbf16>,
    %100 = vector.extract_strided_slice %73 {offsets = [40, 0], sizes = [8, 84], strides = [1, 1]} : vector<112x84xbf16> to vector<8x84xbf16>
    %c8_66 = arith.constant 8 : index
    %c252_67 = arith.constant 252 : index
    %101 = vector.load %arg13[%c8_66, %c252_67] : memref<80x420xbf16, #tpu.memory_space<vmem>>, vector<8x84xbf16>
    tpu.vector_store %arg13[%c8_66, %c252_67], %100 {strides = array<i32>} : memref<80x420xbf16, #tpu.memory_space<vmem>>, vector<8x84xbf16>,
    %102 = vector.extract_strided_slice %73 {offsets = [48, 0], sizes = [8, 84], strides = [1, 1]} : vector<112x84xbf16> to vector<8x84xbf16>
    %c8_68 = arith.constant 8 : index
    %c336_69 = arith.constant 336 : index
    %103 = vector.load %arg13[%c8_68, %c336_69] : memref<80x420xbf16, #tpu.memory_space<vmem>>, vector<8x84xbf16>
    tpu.vector_store %arg13[%c8_68, %c336_69], %102 {strides = array<i32>} : memref<80x420xbf16, #tpu.memory_space<vmem>>, vector<8x84xbf16>,
    %104 = vector.extract_strided_slice %73 {offsets = [24, 0], sizes = [8, 84], strides = [1, 1]} : vector<112x84xbf16> to vector<8x84xbf16>
    %c48_70 = arith.constant 48 : index
    %c0_71 = arith.constant 0 : index
    %105 = vector.load %arg13[%c48_70, %c0_71] : memref<80x420xbf16, #tpu.memory_space<vmem>>, vector<8x84xbf16>
    tpu.vector_store %arg13[%c48_70, %c0_71], %104 {strides = array<i32>} : memref<80x420xbf16, #tpu.memory_space<vmem>>, vector<8x84xbf16>,
    %106 = vector.extract_strided_slice %73 {offsets = [32, 0], sizes = [8, 84], strides = [1, 1]} : vector<112x84xbf16> to vector<8x84xbf16>
    %c48_72 = arith.constant 48 : index
    %c84_73 = arith.constant 84 : index
    %107 = vector.load %arg13[%c48_72, %c84_73] : memref<80x420xbf16, #tpu.memory_space<vmem>>, vector<8x84xbf16>
    tpu.vector_store %arg13[%c48_72, %c84_73], %106 {strides = array<i32>} : memref<80x420xbf16, #tpu.memory_space<vmem>>, vector<8x84xbf16>,
    %108 = vector.extract_strided_slice %73 {offsets = [40, 0], sizes = [8, 84], strides = [1, 1]} : vector<112x84xbf16> to vector<8x84xbf16>
    %c48_74 = arith.constant 48 : index
    %c168_75 = arith.constant 168 : index
    %109 = vector.load %arg13[%c48_74, %c168_75] : memref<80x420xbf16, #tpu.memory_space<vmem>>, vector<8x84xbf16>
    tpu.vector_store %arg13[%c48_74, %c168_75], %108 {strides = array<i32>} : memref<80x420xbf16, #tpu.memory_space<vmem>>, vector<8x84xbf16>,
    %110 = vector.extract_strided_slice %73 {offsets = [48, 0], sizes = [8, 84], strides = [1, 1]} : vector<112x84xbf16> to vector<8x84xbf16>
    %c48_76 = arith.constant 48 : index
    %c252_77 = arith.constant 252 : index
    %111 = vector.load %arg13[%c48_76, %c252_77] : memref<80x420xbf16, #tpu.memory_space<vmem>>, vector<8x84xbf16>
    tpu.vector_store %arg13[%c48_76, %c252_77], %110 {strides = array<i32>} : memref<80x420xbf16, #tpu.memory_space<vmem>>, vector<8x84xbf16>,
    %112 = vector.extract_strided_slice %73 {offsets = [56, 0], sizes = [8, 84], strides = [1, 1]} : vector<112x84xbf16> to vector<8x84xbf16>
    %c48_78 = arith.constant 48 : index
    %c336_79 = arith.constant 336 : index
    %113 = vector.load %arg13[%c48_78, %c336_79] : memref<80x420xbf16, #tpu.memory_space<vmem>>, vector<8x84xbf16>
    tpu.vector_store %arg13[%c48_78, %c336_79], %112 {strides = array<i32>} : memref<80x420xbf16, #tpu.memory_space<vmem>>, vector<8x84xbf16>,
    %114 = vector.extract_strided_slice %73 {offsets = [32, 0], sizes = [8, 84], strides = [1, 1]} : vector<112x84xbf16> to vector<8x84xbf16>
    %c16_80 = arith.constant 16 : index
    %c0_81 = arith.constant 0 : index
    %115 = vector.load %arg13[%c16_80, %c0_81] : memref<80x420xbf16, #tpu.memory_space<vmem>>, vector<8x84xbf16>
    tpu.vector_store %arg13[%c16_80, %c0_81], %114 {strides = array<i32>} : memref<80x420xbf16, #tpu.memory_space<vmem>>, vector<8x84xbf16>,
    %116 = vector.extract_strided_slice %73 {offsets = [40, 0], sizes = [8, 84], strides = [1, 1]} : vector<112x84xbf16> to vector<8x84xbf16>
    %c16_82 = arith.constant 16 : index
    %c84_83 = arith.constant 84 : index
    %117 = vector.load %arg13[%c16_82, %c84_83] : memref<80x420xbf16, #tpu.memory_space<vmem>>, vector<8x84xbf16>
    tpu.vector_store %arg13[%c16_82, %c84_83], %116 {strides = array<i32>} : memref<80x420xbf16, #tpu.memory_space<vmem>>, vector<8x84xbf16>,
    %118 = vector.extract_strided_slice %73 {offsets = [48, 0], sizes = [8, 84], strides = [1, 1]} : vector<112x84xbf16> to vector<8x84xbf16>
    %c16_84 = arith.constant 16 : index
    %c168_85 = arith.constant 168 : index
    %119 = vector.load %arg13[%c16_84, %c168_85] : memref<80x420xbf16, #tpu.memory_space<vmem>>, vector<8x84xbf16>
    tpu.vector_store %arg13[%c16_84, %c168_85], %118 {strides = array<i32>} : memref<80x420xbf16, #tpu.memory_space<vmem>>, vector<8x84xbf16>,
    %120 = vector.extract_strided_slice %73 {offsets = [56, 0], sizes = [8, 84], strides = [1, 1]} : vector<112x84xbf16> to vector<8x84xbf16>
    %c16_86 = arith.constant 16 : index
    %c252_87 = arith.constant 252 : index
    %121 = vector.load %arg13[%c16_86, %c252_87] : memref<80x420xbf16, #tpu.memory_space<vmem>>, vector<8x84xbf16>
    tpu.vector_store %arg13[%c16_86, %c252_87], %120 {strides = array<i32>} : memref<80x420xbf16, #tpu.memory_space<vmem>>, vector<8x84xbf16>,
    %122 = vector.extract_strided_slice %73 {offsets = [64, 0], sizes = [8, 84], strides = [1, 1]} : vector<112x84xbf16> to vector<8x84xbf16>
    %c16_88 = arith.constant 16 : index
    %c336_89 = arith.constant 336 : index
    %123 = vector.load %arg13[%c16_88, %c336_89] : memref<80x420xbf16, #tpu.memory_space<vmem>>, vector<8x84xbf16>
    tpu.vector_store %arg13[%c16_88, %c336_89], %122 {strides = array<i32>} : memref<80x420xbf16, #tpu.memory_space<vmem>>, vector<8x84xbf16>,
    %124 = vector.extract_strided_slice %73 {offsets = [40, 0], sizes = [8, 84], strides = [1, 1]} : vector<112x84xbf16> to vector<8x84xbf16>
    %c56_90 = arith.constant 56 : index
    %c0_91 = arith.constant 0 : index
    %125 = vector.load %arg13[%c56_90, %c0_91] : memref<80x420xbf16, #tpu.memory_space<vmem>>, vector<8x84xbf16>
    tpu.vector_store %arg13[%c56_90, %c0_91], %124 {strides = array<i32>} : memref<80x420xbf16, #tpu.memory_space<vmem>>, vector<8x84xbf16>,
    %126 = vector.extract_strided_slice %73 {offsets = [48, 0], sizes = [8, 84], strides = [1, 1]} : vector<112x84xbf16> to vector<8x84xbf16>
    %c56_92 = arith.constant 56 : index
    %c84_93 = arith.constant 84 : index
    %127 = vector.load %arg13[%c56_92, %c84_93] : memref<80x420xbf16, #tpu.memory_space<vmem>>, vector<8x84xbf16>
    tpu.vector_store %arg13[%c56_92, %c84_93], %126 {strides = array<i32>} : memref<80x420xbf16, #tpu.memory_space<vmem>>, vector<8x84xbf16>,
    %128 = vector.extract_strided_slice %73 {offsets = [56, 0], sizes = [8, 84], strides = [1, 1]} : vector<112x84xbf16> to vector<8x84xbf16>
    %c56_94 = arith.constant 56 : index
    %c168_95 = arith.constant 168 : index
    %129 = vector.load %arg13[%c56_94, %c168_95] : memref<80x420xbf16, #tpu.memory_space<vmem>>, vector<8x84xbf16>
    tpu.vector_store %arg13[%c56_94, %c168_95], %128 {strides = array<i32>} : memref<80x420xbf16, #tpu.memory_space<vmem>>, vector<8x84xbf16>,
    %130 = vector.extract_strided_slice %73 {offsets = [64, 0], sizes = [8, 84], strides = [1, 1]} : vector<112x84xbf16> to vector<8x84xbf16>
    %c56_96 = arith.constant 56 : index
    %c252_97 = arith.constant 252 : index
    %131 = vector.load %arg13[%c56_96, %c252_97] : memref<80x420xbf16, #tpu.memory_space<vmem>>, vector<8x84xbf16>
    tpu.vector_store %arg13[%c56_96, %c252_97], %130 {strides = array<i32>} : memref<80x420xbf16, #tpu.memory_space<vmem>>, vector<8x84xbf16>,
    %132 = vector.extract_strided_slice %73 {offsets = [72, 0], sizes = [8, 84], strides = [1, 1]} : vector<112x84xbf16> to vector<8x84xbf16>
    %c56_98 = arith.constant 56 : index
    %c336_99 = arith.constant 336 : index
    %133 = vector.load %arg13[%c56_98, %c336_99] : memref<80x420xbf16, #tpu.memory_space<vmem>>, vector<8x84xbf16>
    tpu.vector_store %arg13[%c56_98, %c336_99], %132 {strides = array<i32>} : memref<80x420xbf16, #tpu.memory_space<vmem>>, vector<8x84xbf16>,
    %134 = vector.extract_strided_slice %73 {offsets = [48, 0], sizes = [8, 84], strides = [1, 1]} : vector<112x84xbf16> to vector<8x84xbf16>
    %c24_100 = arith.constant 24 : index
    %c0_101 = arith.constant 0 : index
    %135 = vector.load %arg13[%c24_100, %c0_101] : memref<80x420xbf16, #tpu.memory_space<vmem>>, vector<8x84xbf16>
    tpu.vector_store %arg13[%c24_100, %c0_101], %134 {strides = array<i32>} : memref<80x420xbf16, #tpu.memory_space<vmem>>, vector<8x84xbf16>,
    %136 = vector.extract_strided_slice %73 {offsets = [56, 0], sizes = [8, 84], strides = [1, 1]} : vector<112x84xbf16> to vector<8x84xbf16>
    %c24_102 = arith.constant 24 : index
    %c84_103 = arith.constant 84 : index
    %137 = vector.load %arg13[%c24_102, %c84_103] : memref<80x420xbf16, #tpu.memory_space<vmem>>, vector<8x84xbf16>
    tpu.vector_store %arg13[%c24_102, %c84_103], %136 {strides = array<i32>} : memref<80x420xbf16, #tpu.memory_space<vmem>>, vector<8x84xbf16>,
    %138 = vector.extract_strided_slice %73 {offsets = [64, 0], sizes = [8, 84], strides = [1, 1]} : vector<112x84xbf16> to vector<8x84xbf16>
    %c24_104 = arith.constant 24 : index
    %c168_105 = arith.constant 168 : index
    %139 = vector.load %arg13[%c24_104, %c168_105] : memref<80x420xbf16, #tpu.memory_space<vmem>>, vector<8x84xbf16>
    tpu.vector_store %arg13[%c24_104, %c168_105], %138 {strides = array<i32>} : memref<80x420xbf16, #tpu.memory_space<vmem>>, vector<8x84xbf16>,
    %140 = vector.extract_strided_slice %73 {offsets = [72, 0], sizes = [8, 84], strides = [1, 1]} : vector<112x84xbf16> to vector<8x84xbf16>
    %c24_106 = arith.constant 24 : index
    %c252_107 = arith.constant 252 : index
    %141 = vector.load %arg13[%c24_106, %c252_107] : memref<80x420xbf16, #tpu.memory_space<vmem>>, vector<8x84xbf16>
    tpu.vector_store %arg13[%c24_106, %c252_107], %140 {strides = array<i32>} : memref<80x420xbf16, #tpu.memory_space<vmem>>, vector<8x84xbf16>,
    %142 = vector.extract_strided_slice %73 {offsets = [80, 0], sizes = [8, 84], strides = [1, 1]} : vector<112x84xbf16> to vector<8x84xbf16>
    %c24_108 = arith.constant 24 : index
    %c336_109 = arith.constant 336 : index
    %143 = vector.load %arg13[%c24_108, %c336_109] : memref<80x420xbf16, #tpu.memory_space<vmem>>, vector<8x84xbf16>
    tpu.vector_store %arg13[%c24_108, %c336_109], %142 {strides = array<i32>} : memref<80x420xbf16, #tpu.memory_space<vmem>>, vector<8x84xbf16>,
    %144 = vector.extract_strided_slice %73 {offsets = [56, 0], sizes = [8, 84], strides = [1, 1]} : vector<112x84xbf16> to vector<8x84xbf16>
    %c64_110 = arith.constant 64 : index
    %c0_111 = arith.constant 0 : index
    %145 = vector.load %arg13[%c64_110, %c0_111] : memref<80x420xbf16, #tpu.memory_space<vmem>>, vector<8x84xbf16>
    tpu.vector_store %arg13[%c64_110, %c0_111], %144 {strides = array<i32>} : memref<80x420xbf16, #tpu.memory_space<vmem>>, vector<8x84xbf16>,
    %146 = vector.extract_strided_slice %73 {offsets = [64, 0], sizes = [8, 84], strides = [1, 1]} : vector<112x84xbf16> to vector<8x84xbf16>
    %c64_112 = arith.constant 64 : index
    %c84_113 = arith.constant 84 : index
    %147 = vector.load %arg13[%c64_112, %c84_113] : memref<80x420xbf16, #tpu.memory_space<vmem>>, vector<8x84xbf16>
    tpu.vector_store %arg13[%c64_112, %c84_113], %146 {strides = array<i32>} : memref<80x420xbf16, #tpu.memory_space<vmem>>, vector<8x84xbf16>,
    %148 = vector.extract_strided_slice %73 {offsets = [72, 0], sizes = [8, 84], strides = [1, 1]} : vector<112x84xbf16> to vector<8x84xbf16>
    %c64_114 = arith.constant 64 : index
    %c168_115 = arith.constant 168 : index
    %149 = vector.load %arg13[%c64_114, %c168_115] : memref<80x420xbf16, #tpu.memory_space<vmem>>, vector<8x84xbf16>
    tpu.vector_store %arg13[%c64_114, %c168_115], %148 {strides = array<i32>} : memref<80x420xbf16, #tpu.memory_space<vmem>>, vector<8x84xbf16>,
    %150 = vector.extract_strided_slice %73 {offsets = [80, 0], sizes = [8, 84], strides = [1, 1]} : vector<112x84xbf16> to vector<8x84xbf16>
    %c64_116 = arith.constant 64 : index
    %c252_117 = arith.constant 252 : index
    %151 = vector.load %arg13[%c64_116, %c252_117] : memref<80x420xbf16, #tpu.memory_space<vmem>>, vector<8x84xbf16>
    tpu.vector_store %arg13[%c64_116, %c252_117], %150 {strides = array<i32>} : memref<80x420xbf16, #tpu.memory_space<vmem>>, vector<8x84xbf16>,
    %152 = vector.extract_strided_slice %73 {offsets = [88, 0], sizes = [8, 84], strides = [1, 1]} : vector<112x84xbf16> to vector<8x84xbf16>
    %c64_118 = arith.constant 64 : index
    %c336_119 = arith.constant 336 : index
    %153 = vector.load %arg13[%c64_118, %c336_119] : memref<80x420xbf16, #tpu.memory_space<vmem>>, vector<8x84xbf16>
    tpu.vector_store %arg13[%c64_118, %c336_119], %152 {strides = array<i32>} : memref<80x420xbf16, #tpu.memory_space<vmem>>, vector<8x84xbf16>,
    %154 = vector.extract_strided_slice %73 {offsets = [64, 0], sizes = [8, 84], strides = [1, 1]} : vector<112x84xbf16> to vector<8x84xbf16>
    %c32_120 = arith.constant 32 : index
    %c0_121 = arith.constant 0 : index
    %155 = vector.load %arg13[%c32_120, %c0_121] : memref<80x420xbf16, #tpu.memory_space<vmem>>, vector<8x84xbf16>
    tpu.vector_store %arg13[%c32_120, %c0_121], %154 {strides = array<i32>} : memref<80x420xbf16, #tpu.memory_space<vmem>>, vector<8x84xbf16>,
    %156 = vector.extract_strided_slice %73 {offsets = [72, 0], sizes = [8, 84], strides = [1, 1]} : vector<112x84xbf16> to vector<8x84xbf16>
    %c32_122 = arith.constant 32 : index
    %c84_123 = arith.constant 84 : index
    %157 = vector.load %arg13[%c32_122, %c84_123] : memref<80x420xbf16, #tpu.memory_space<vmem>>, vector<8x84xbf16>
    tpu.vector_store %arg13[%c32_122, %c84_123], %156 {strides = array<i32>} : memref<80x420xbf16, #tpu.memory_space<vmem>>, vector<8x84xbf16>,
    %158 = vector.extract_strided_slice %73 {offsets = [80, 0], sizes = [8, 84], strides = [1, 1]} : vector<112x84xbf16> to vector<8x84xbf16>
    %c32_124 = arith.constant 32 : index
    %c168_125 = arith.constant 168 : index
    %159 = vector.load %arg13[%c32_124, %c168_125] : memref<80x420xbf16, #tpu.memory_space<vmem>>, vector<8x84xbf16>
    tpu.vector_store %arg13[%c32_124, %c168_125], %158 {strides = array<i32>} : memref<80x420xbf16, #tpu.memory_space<vmem>>, vector<8x84xbf16>,
    %160 = vector.extract_strided_slice %73 {offsets = [88, 0], sizes = [8, 84], strides = [1, 1]} : vector<112x84xbf16> to vector<8x84xbf16>
    %c32_126 = arith.constant 32 : index
    %c252_127 = arith.constant 252 : index
    %161 = vector.load %arg13[%c32_126, %c252_127] : memref<80x420xbf16, #tpu.memory_space<vmem>>, vector<8x84xbf16>
    tpu.vector_store %arg13[%c32_126, %c252_127], %160 {strides = array<i32>} : memref<80x420xbf16, #tpu.memory_space<vmem>>, vector<8x84xbf16>,
    %162 = vector.extract_strided_slice %73 {offsets = [96, 0], sizes = [8, 84], strides = [1, 1]} : vector<112x84xbf16> to vector<8x84xbf16>
    %c32_128 = arith.constant 32 : index
    %c336_129 = arith.constant 336 : index
    %163 = vector.load %arg13[%c32_128, %c336_129] : memref<80x420xbf16, #tpu.memory_space<vmem>>, vector<8x84xbf16>
    tpu.vector_store %arg13[%c32_128, %c336_129], %162 {strides = array<i32>} : memref<80x420xbf16, #tpu.memory_space<vmem>>, vector<8x84xbf16>,
    %164 = vector.extract_strided_slice %73 {offsets = [72, 0], sizes = [8, 84], strides = [1, 1]} : vector<112x84xbf16> to vector<8x84xbf16>
    %c72_130 = arith.constant 72 : index
    %c0_131 = arith.constant 0 : index
    %165 = vector.load %arg13[%c72_130, %c0_131] : memref<80x420xbf16, #tpu.memory_space<vmem>>, vector<8x84xbf16>
    tpu.vector_store %arg13[%c72_130, %c0_131], %164 {strides = array<i32>} : memref<80x420xbf16, #tpu.memory_space<vmem>>, vector<8x84xbf16>,
    %166 = vector.extract_strided_slice %73 {offsets = [80, 0], sizes = [8, 84], strides = [1, 1]} : vector<112x84xbf16> to vector<8x84xbf16>
    %c72_132 = arith.constant 72 : index
    %c84_133 = arith.constant 84 : index
    %167 = vector.load %arg13[%c72_132, %c84_133] : memref<80x420xbf16, #tpu.memory_space<vmem>>, vector<8x84xbf16>
    tpu.vector_store %arg13[%c72_132, %c84_133], %166 {strides = array<i32>} : memref<80x420xbf16, #tpu.memory_space<vmem>>, vector<8x84xbf16>,
    %168 = vector.extract_strided_slice %73 {offsets = [88, 0], sizes = [8, 84], strides = [1, 1]} : vector<112x84xbf16> to vector<8x84xbf16>
    %c72_134 = arith.constant 72 : index
    %c168_135 = arith.constant 168 : index
    %169 = vector.load %arg13[%c72_134, %c168_135] : memref<80x420xbf16, #tpu.memory_space<vmem>>, vector<8x84xbf16>
    tpu.vector_store %arg13[%c72_134, %c168_135], %168 {strides = array<i32>} : memref<80x420xbf16, #tpu.memory_space<vmem>>, vector<8x84xbf16>,
    %170 = vector.extract_strided_slice %73 {offsets = [96, 0], sizes = [8, 84], strides = [1, 1]} : vector<112x84xbf16> to vector<8x84xbf16>
    %c72_136 = arith.constant 72 : index
    %c252_137 = arith.constant 252 : index
    %171 = vector.load %arg13[%c72_136, %c252_137] : memref<80x420xbf16, #tpu.memory_space<vmem>>, vector<8x84xbf16>
    tpu.vector_store %arg13[%c72_136, %c252_137], %170 {strides = array<i32>} : memref<80x420xbf16, #tpu.memory_space<vmem>>, vector<8x84xbf16>,
    %172 = vector.extract_strided_slice %73 {offsets = [104, 0], sizes = [8, 84], strides = [1, 1]} : vector<112x84xbf16> to vector<8x84xbf16>
    %c72_138 = arith.constant 72 : index
    %c336_139 = arith.constant 336 : index
    %173 = vector.load %arg13[%c72_138, %c336_139] : memref<80x420xbf16, #tpu.memory_space<vmem>>, vector<8x84xbf16>
    tpu.vector_store %arg13[%c72_138, %c336_139], %172 {strides = array<i32>} : memref<80x420xbf16, #tpu.memory_space<vmem>>, vector<8x84xbf16>,
    %c0_140 = arith.constant 0 : index
    %c0_141 = arith.constant 0 : index
    %174 = vector.load %arg13[%c0_140, %c0_141] : memref<80x420xbf16, #tpu.memory_space<vmem>>, vector<80x420xbf16>
    %c0_142 = arith.constant 0 : index
    %c0_143 = arith.constant 0 : index
    %175 = vector.load %arg4[%c0_142, %c0_143] : memref<420x160xbf16, #tpu.memory_space<vmem>>, vector<420x160xbf16>
    %cst_144 = arith.constant dense<0.000000e+00> : vector<80x160xf32>
    %176 = tpu.matmul %174, %175, %cst_144 {dimension_numbers = #tpu.dot_dimension_numbers<[1], [0], [0], [1], [0, 0, 1, 1], [], []>} : vector<80x420xbf16>, vector<420x160xbf16>, vector<80x160xf32> -> vector<80x160xf32>
    %c0_145 = arith.constant 0 : index
    %c0_146 = arith.constant 0 : index
    %177 = vector.load %arg5[%c0_145, %c0_146] : memref<1x160xf32, #tpu.memory_space<vmem>>, vector<1x160xf32>
    %178 = vector.broadcast %177 : vector<1x160xf32> to vector<80x160xf32>
    %179 = arith.addf %176, %178 : vector<80x160xf32>
    %cst_147 = arith.constant 0.000000e+00 : f32
    %180 = vector.broadcast %cst_147 : f32 to vector<80x160xf32>
    %181 = arith.maximumf %179, %180 : vector<80x160xf32>
    %c0_148 = arith.constant 0 : index
    %c0_149 = arith.constant 0 : index
    %182 = vector.load %arg14[%c0_148, %c0_149] : memref<80x160xf32, #tpu.memory_space<vmem>>, vector<80x160xf32>
    tpu.vector_store %arg14[%c0_148, %c0_149], %181 {strides = array<i32>} : memref<80x160xf32, #tpu.memory_space<vmem>>, vector<80x160xf32>,
    %c0_150 = arith.constant 0 : index
    %c0_151 = arith.constant 0 : index
    %183 = vector.load %arg14[%c0_150, %c0_151] : memref<80x160xf32, #tpu.memory_space<vmem>>, vector<40x160xf32>
    %c40_152 = arith.constant 40 : index
    %c0_153 = arith.constant 0 : index
    %184 = vector.load %arg14[%c40_152, %c0_153] : memref<80x160xf32, #tpu.memory_space<vmem>>, vector<40x160xf32>
    %185 = arith.maximumf %183, %184 : vector<40x160xf32>
    %186 = vector.extract_strided_slice %185 {offsets = [0, 0], sizes = [40, 80], strides = [1, 1]} : vector<40x160xf32> to vector<40x80xf32>
    %187 = vector.extract_strided_slice %185 {offsets = [0, 80], sizes = [40, 80], strides = [1, 1]} : vector<40x160xf32> to vector<40x80xf32>
    %188 = arith.maximumf %186, %187 : vector<40x80xf32>
    %189 = arith.truncf %188 : vector<40x80xf32> to vector<40x80xbf16>
    %190 = vector.extract_strided_slice %189 {offsets = [0, 0], sizes = [8, 80], strides = [1, 1]} : vector<40x80xbf16> to vector<8x80xbf16>
    %c0_154 = arith.constant 0 : index
    %c0_155 = arith.constant 0 : index
    %191 = vector.load %arg15[%c0_154, %c0_155] : memref<8x400xbf16, #tpu.memory_space<vmem>>, vector<8x80xbf16>
    tpu.vector_store %arg15[%c0_154, %c0_155], %190 {strides = array<i32>} : memref<8x400xbf16, #tpu.memory_space<vmem>>, vector<8x80xbf16>,
    %192 = vector.extract_strided_slice %189 {offsets = [8, 0], sizes = [8, 80], strides = [1, 1]} : vector<40x80xbf16> to vector<8x80xbf16>
    %c0_156 = arith.constant 0 : index
    %c80_157 = arith.constant 80 : index
    %193 = vector.load %arg15[%c0_156, %c80_157] : memref<8x400xbf16, #tpu.memory_space<vmem>>, vector<8x80xbf16>
    tpu.vector_store %arg15[%c0_156, %c80_157], %192 {strides = array<i32>} : memref<8x400xbf16, #tpu.memory_space<vmem>>, vector<8x80xbf16>,
    %194 = vector.extract_strided_slice %189 {offsets = [16, 0], sizes = [8, 80], strides = [1, 1]} : vector<40x80xbf16> to vector<8x80xbf16>
    %c0_158 = arith.constant 0 : index
    %c160_159 = arith.constant 160 : index
    %195 = vector.load %arg15[%c0_158, %c160_159] : memref<8x400xbf16, #tpu.memory_space<vmem>>, vector<8x80xbf16>
    tpu.vector_store %arg15[%c0_158, %c160_159], %194 {strides = array<i32>} : memref<8x400xbf16, #tpu.memory_space<vmem>>, vector<8x80xbf16>,
    %196 = vector.extract_strided_slice %189 {offsets = [24, 0], sizes = [8, 80], strides = [1, 1]} : vector<40x80xbf16> to vector<8x80xbf16>
    %c0_160 = arith.constant 0 : index
    %c240 = arith.constant 240 : index
    %197 = vector.load %arg15[%c0_160, %c240] : memref<8x400xbf16, #tpu.memory_space<vmem>>, vector<8x80xbf16>
    tpu.vector_store %arg15[%c0_160, %c240], %196 {strides = array<i32>} : memref<8x400xbf16, #tpu.memory_space<vmem>>, vector<8x80xbf16>,
    %198 = vector.extract_strided_slice %189 {offsets = [32, 0], sizes = [8, 80], strides = [1, 1]} : vector<40x80xbf16> to vector<8x80xbf16>
    %c0_161 = arith.constant 0 : index
    %c320 = arith.constant 320 : index
    %199 = vector.load %arg15[%c0_161, %c320] : memref<8x400xbf16, #tpu.memory_space<vmem>>, vector<8x80xbf16>
    tpu.vector_store %arg15[%c0_161, %c320], %198 {strides = array<i32>} : memref<8x400xbf16, #tpu.memory_space<vmem>>, vector<8x80xbf16>,
    %c0_162 = arith.constant 0 : index
    %c0_163 = arith.constant 0 : index
    %200 = vector.load %arg15[%c0_162, %c0_163] : memref<8x400xbf16, #tpu.memory_space<vmem>>, vector<8x400xbf16>
    %c0_164 = arith.constant 0 : index
    %c0_165 = arith.constant 0 : index
    %201 = vector.load %arg6[%c0_164, %c0_165] : memref<400x128xbf16, #tpu.memory_space<vmem>>, vector<400x128xbf16>
    %cst_166 = arith.constant dense<0.000000e+00> : vector<8x128xf32>
    %202 = tpu.matmul %200, %201, %cst_166 {dimension_numbers = #tpu.dot_dimension_numbers<[1], [0], [0], [1], [0, 0, 1, 1], [], []>} : vector<8x400xbf16>, vector<400x128xbf16>, vector<8x128xf32> -> vector<8x128xf32>
    %c0_167 = arith.constant 0 : index
    %c0_168 = arith.constant 0 : index
    %203 = vector.load %arg7[%c0_167, %c0_168] : memref<1x128xf32, #tpu.memory_space<vmem>>, vector<1x128xf32>
    %204 = vector.broadcast %203 : vector<1x128xf32> to vector<8x128xf32>
    %205 = arith.addf %202, %204 : vector<8x128xf32>
    %cst_169 = arith.constant 0.000000e+00 : f32
    %206 = vector.broadcast %cst_169 : f32 to vector<8x128xf32>
    %207 = arith.maximumf %205, %206 : vector<8x128xf32>
    %208 = arith.truncf %207 : vector<8x128xf32> to vector<8x128xbf16>
    %c0_170 = arith.constant 0 : index
    %c0_171 = arith.constant 0 : index
    %209 = vector.load %arg8[%c0_170, %c0_171] : memref<128x128xbf16, #tpu.memory_space<vmem>>, vector<128x128xbf16>
    %cst_172 = arith.constant dense<0.000000e+00> : vector<8x128xf32>
    %210 = tpu.matmul %208, %209, %cst_172 {dimension_numbers = #tpu.dot_dimension_numbers<[1], [0], [0], [1], [0, 0, 1, 1], [], []>} : vector<8x128xbf16>, vector<128x128xbf16>, vector<8x128xf32> -> vector<8x128xf32>
    %c0_173 = arith.constant 0 : index
    %c0_174 = arith.constant 0 : index
    %211 = vector.load %arg9[%c0_173, %c0_174] : memref<1x128xf32, #tpu.memory_space<vmem>>, vector<1x128xf32>
    %212 = vector.broadcast %211 : vector<1x128xf32> to vector<8x128xf32>
    %213 = arith.addf %210, %212 : vector<8x128xf32>
    %c0_175 = arith.constant 0 : index
    %c0_176 = arith.constant 0 : index
    %214 = vector.load %arg10[%c0_175, %c0_176] : memref<8x128xf32, #tpu.memory_space<vmem>>, vector<8x128xf32>
    tpu.vector_store %arg10[%c0_175, %c0_176], %213 {strides = array<i32>} : memref<8x128xf32, #tpu.memory_space<vmem>>, vector<8x128xf32>,
    return
  }
  func.func @transform_0(%arg0: i32) -> (i32, i32) {
    %c0_i32 = arith.constant 0 : i32
    %c0_i32_0 = arith.constant 0 : i32
    return %arg0, %c0_i32 : i32, i32
  }
  func.func @transform_1(%arg0: i32) -> (i32, i32) {
    %c0_i32 = arith.constant 0 : i32
    %c0_i32_0 = arith.constant 0 : i32
    %c0_i32_1 = arith.constant 0 : i32
    return %c0_i32, %c0_i32_0 : i32, i32
  }
  func.func @transform_2(%arg0: i32) -> (i32, i32) {
    %c0_i32 = arith.constant 0 : i32
    %c0_i32_0 = arith.constant 0 : i32
    %c0_i32_1 = arith.constant 0 : i32
    return %c0_i32, %c0_i32_0 : i32, i32
  }
  func.func @transform_3(%arg0: i32) -> (i32, i32) {
    %c0_i32 = arith.constant 0 : i32
    %c0_i32_0 = arith.constant 0 : i32
    %c0_i32_1 = arith.constant 0 : i32
    return %c0_i32, %c0_i32_0 : i32, i32
  }
  func.func @transform_4(%arg0: i32) -> (i32, i32) {
    %c0_i32 = arith.constant 0 : i32
    %c0_i32_0 = arith.constant 0 : i32
    %c0_i32_1 = arith.constant 0 : i32
    return %c0_i32, %c0_i32_0 : i32, i32
  }
  func.func @transform_5(%arg0: i32) -> (i32, i32) {
    %c0_i32 = arith.constant 0 : i32
    %c0_i32_0 = arith.constant 0 : i32
    %c0_i32_1 = arith.constant 0 : i32
    return %c0_i32, %c0_i32_0 : i32, i32
  }
  func.func @transform_6(%arg0: i32) -> (i32, i32) {
    %c0_i32 = arith.constant 0 : i32
    %c0_i32_0 = arith.constant 0 : i32
    %c0_i32_1 = arith.constant 0 : i32
    return %c0_i32, %c0_i32_0 : i32, i32
  }
  func.func @transform_7(%arg0: i32) -> (i32, i32) {
    %c0_i32 = arith.constant 0 : i32
    %c0_i32_0 = arith.constant 0 : i32
    %c0_i32_1 = arith.constant 0 : i32
    return %c0_i32, %c0_i32_0 : i32, i32
  }
  func.func @transform_8(%arg0: i32) -> (i32, i32) {
    %c0_i32 = arith.constant 0 : i32
    %c0_i32_0 = arith.constant 0 : i32
    %c0_i32_1 = arith.constant 0 : i32
    return %c0_i32, %c0_i32_0 : i32, i32
  }
  func.func @transform_9(%arg0: i32) -> (i32, i32) {
    %c0_i32 = arith.constant 0 : i32
    %c0_i32_0 = arith.constant 0 : i32
    return %arg0, %c0_i32 : i32, i32
  }
}

</mosaic_0001>

<bundles_post_ra>
// kernel: net_forward.1
= control target key start
LH: loop header
LB: loop body
LE: loop exit
PB: predicated region body
PF: predicated region fallthrough
CT: control target
= control target key end

     0   :  { %s3591_s30 = smov 0   ;;  %s4662_s0 = inlined_call_operand.vmem [shape: f32[16,1024], index: 0, kind: input, shape index: {}]   ;;  %s4663_s1 = inlined_call_operand.vmem [shape: bf16[160,168], index: 1, kind: input, shape index: {}]   ;;  %s4664_s2 = inlined_call_operand.vmem [shape: f32[1,168], index: 2, kind: input, shape index: {}]   ;;  %s4665_s3 = inlined_call_operand.vmem [shape: bf16[420,160], index: 3, kind: input, shape index: {}]   ;;  %s4666_s4 = inlined_call_operand.vmem [shape: f32[1,160], index: 4, kind: input, shape index: {}]   ;;  %s4667_s5 = inlined_call_operand.vmem [shape: bf16[400,128], index: 5, kind: input, shape index: {}]   ;;  %s4668_s6 = inlined_call_operand.vmem [shape: f32[1,128], index: 6, kind: input, shape index: {}]   ;;  %s4669_s7 = inlined_call_operand.vmem [shape: bf16[128,128], index: 7, kind: input, shape index: {}]   ;;  %s4670_s8 = inlined_call_operand.vmem [shape: f32[1,128], index: 8, kind: input, shape index: {}]   ;;  %s4671_s9 = inlined_call_operand.vmem [shape: f32[16,128], index: 9, kind: output, shape index: {}]  }
   0x1 LB: > { %s2902_s10 = sadd.s32 4294967295, %s3526_s30   ;;  %p2906_p0 = scmp.ge.s32.totalorder %s3526_s30, 1  ;;  %s3526_s30 = sphi %s3591_s30, %s19_s30  }
   0x2   : > { %p287_p1 = scmp.lt.s32.totalorder %s3526_s30, 3 }
   0x4   : > { %p288_p2 = pnand %p2906_p0, %p287_p1 }
   0x5   : > { %p322_p3 = scmp.lt.s32.totalorder (!%p288_p2), %s2902_s10, 1  ;;  %s3528_s27 = smov (!%p288_p2), 64  }
   0x6   : > { %291 = sbr.rel (%p288_p2) target bundleno = 1641 (0x669), region = 56  ;;  %s3529_s23 = smov (!%p288_p2), 96  }
   0x7   : > { %s3530_s26 = smov (!%p288_p2), 32   ;;  %s3532_s13 = smov (!%p288_p2), 84  }
   0x8   : > { %s3533_s28 = smov (!%p288_p2), 40   ;;  %s3534_s15 = smov (!%p288_p2), 124  }
   0x9   : > { %s3535_s29 = smov (!%p288_p2), 80   ;;  %s3536_s20 = smov (!%p288_p2), 48  }
   0xb   : > { %vm354_vm0 = vcmask 1043456   ;;  %v3310_v0 = vld [vmem:[%s4663_s1 + $0x74] ss:$8 sps:$4 sm:$0xff]   ;;  %v3312_v1 = vld [vmem:[%s4663_s1 + $0x70] ss:$8 sps:$4 sm:$0xff]   ;;  %s4681_s10 = smov (!%p322_p3, %s2902_s10), 1 }
   0xc   : > { %vm355_vm1 = vcmask 261124   ;;  %v3313_v2 = vld [vmem:[%s4663_s1 + $0x64] ss:$8 sps:$4 sm:$0xff]   ;;  %846 = vmatprep.subr.bf16.mxu0 %v3310_v0  ;;  %s3118_s17 = sshll.u32 %s4681_s10, 6  ;;  %v3315_v3 = vld [vmem:[%s4663_s1 + $0x60] ss:$8 sps:$4 sm:$0xff]  }
   0xd   : > { %847 = vmatpush1.bf16.msra.mxu0 %v3312_v1  ;;  %s326_s22 = scalar_lea.vmem %s4662_s0, %s3118_s17  ;;  %vm3618_vm2 = vmor %vm355_vm1, %vm354_vm0  ;;  %v3316_v5 = vld [vmem:[%s4663_s1 + $0x54] ss:$8 sps:$4 sm:$0xff]   ;;  %v3318_v9 = vld [vmem:[%s4663_s1 + $0x50] ss:$8 sps:$4 sm:$0xff]   ;;  %vm368_vm3 = vcmask 523264   ;;  %vm375_vm4 = vcmask 261120  }
   0xe   : > { %848 = vmatprep.subr.bf16.mxu0 %v3313_v2  ;;  %v332_v6 = vld [vmem:[%s326_s22] sm:$0xff]  ;;  %v333_v7 = vld [vmem:[%s326_s22 + $0x8] sm:$0xff]  ;;  %v334_v8 = vld [vmem:[%s326_s22 + $0x10] sm:$0xff]  ;;  %vm361_vm5 = vcmask 785408   ;;  %vm1076_vm6 = vcmask 326656   ;;  %vm1300_vm7 = vcmask 359424  }
   0xf   : > { %v3119_v10 = vpack.c.bf16 %v333_v7, %v332_v6  ;;  %v3120_v11 = vpack.c.bf16 %v334_v8, %v333_v7  ;;  %v335_v12 = vld [vmem:[%s326_s22 + $0x18] sm:$0xff]  ;;  %v336_v13 = vld [vmem:[%s326_s22 + $0x20] sm:$0xff]  ;;  %v337_v14 = vld [vmem:[%s326_s22 + $0x28] sm:$0xff]  ;;  %vm1350_vm8 = vcmask 683008   ;;  %vm1361_vm9 = vcmask 1044128  }
  0x10   : > { %v3121_v15 = vpack.c.bf16 %v335_v12, %v334_v8  ;;  %v3122_v16 = vpack.c.bf16 %v336_v13, %v335_v12  ;;  %v3123_v17 = vpack.c.bf16 %v337_v14, %v336_v13  ;;  %v338_v18 = vld [vmem:[%s326_s22 + $0x30] sm:$0xff]  ;;  %v339_v19 = vld [vmem:[%s326_s22 + $0x38] sm:$0xff]  ;;  %v3319_v22 = vld [vmem:[%s4663_s1 + $0x44] ss:$8 sps:$4 sm:$0xff]   ;;  %vm1362_vm10 = vcmask 326660  }
  0x11   : > { %849 = vmatpush1.bf16.msra.mxu0 %v3315_v3  ;;  %365 = vrot.lane.b32.xlu0 %v3119_v10, %s3528_s27  ;;  %357 = vst.msk [vmem:[#allocation2] sm:$0xff] %vm3618_vm2, %v3119_v10  ;;  %383 = vst.msk [vmem:[#allocation2 + $0x10] sm:$0xff] %vm3618_vm2, %v3120_v11  ;;  %v3124_v20 = vpack.c.bf16 %v338_v18, %v337_v14  ;;  %v3125_v21 = vpack.c.bf16 %v339_v19, %v338_v18  ;;  %v3321_v23 = vld [vmem:[%s4663_s1 + $0x40] ss:$8 sps:$4 sm:$0xff]   ;;  %v3322_v24 = vld [vmem:[%s4663_s1 + $0x34] ss:$8 sps:$4 sm:$0xff]  }
  0x12   : > { %850 = vmatprep.subr.bf16.mxu0 %v3316_v5  ;;  %413 = vrot.lane.b32.xlu1 %v3121_v15, %s3528_s27  ;;  %406 = vst.msk [vmem:[#allocation2 + $0x20] sm:$0xff] %vm3618_vm2, %v3121_v15  ;;  %429 = vst.msk [vmem:[#allocation2 + $0x30] sm:$0xff] %vm3618_vm2, %v3122_v16  ;;  %v3324_v25 = vld [vmem:[%s4663_s1 + $0x30] ss:$8 sps:$4 sm:$0xff]   ;;  %v3325_v26 = vld [vmem:[%s4663_s1 + $0x24] ss:$8 sps:$4 sm:$0xff]  }
  0x13   : > { %452 = vst.msk [vmem:[#allocation2 + $0x40] sm:$0xff] %vm3618_vm2, %v3123_v17  ;;  %475 = vst.msk [vmem:[#allocation2 + $0x50] sm:$0xff] %vm3618_vm2, %v3124_v20  ;;  %v3327_v27 = vld [vmem:[%s4663_s1 + $0x20] ss:$8 sps:$4 sm:$0xff]   ;;  %v3328_v28 = vld [vmem:[%s4663_s1 + $0x14] ss:$8 sps:$4 sm:$0xff]  }
  0x14   : > { %498 = vst.msk [vmem:[#allocation2 + $0x60] sm:$0xff] %vm3618_vm2, %v3125_v21  ;;  %v3330_v29 = vld [vmem:[%s4663_s1 + $0x10] ss:$8 sps:$4 sm:$0xff]   ;;  %v3331_v30 = vld [vmem:[%s4663_s1 + $0x4] ss:$8 sps:$4 sm:$0xff]   ;;  %vm1358_vm11 = vcmask 687104   ;;  %vm4245_vm12 = vmor %vm1362_vm10, %vm1361_vm9 }
  0x15   : > { %851 = vmatpush1.bf16.msra.mxu0 %v3318_v9  ;;  %390 = vrot.lane.b32.xlu0 %v3120_v11, %s3528_s27  ;;  %v3333_v31 = vld [vmem:[%s4663_s1] ss:$8 sps:$4 sm:$0xff]   ;;  %v3334_v32 = vld [vmem:[%s4663_s1 + $0x94] ss:$8 sps:$4 sm:$0xff]   ;;  %v3336_v33 = vld [vmem:[%s4663_s1 + $0x90] ss:$8 sps:$4 sm:$0xff]  }
  0x16   : > { %852 = vmatprep.subr.bf16.mxu0 %v3319_v22  ;;  %436 = vrot.lane.b32.xlu1 %v3122_v16, %s3528_s27  ;;  %v3337_v34 = vld [vmem:[%s4663_s1 + $0x84] ss:$8 sps:$4 sm:$0xff]   ;;  %v3339_v35 = vld [vmem:[%s4663_s1 + $0x80] ss:$8 sps:$4 sm:$0xff]   ;;  %vm1371_vm13 = vcmask 1011008   ;;  %vm1381_vm14 = vcmask 1044448  }
  0x17   : > { %vm1382_vm15 = vcmask 654340   ;;  %vm1378_vm0 = vcmask 1014784   ;;  %vm2077_vm10 = vcmask 293888  }
  0x18   : > { %v519_v0 = vld [vmem:[#allocation2 + $0x10] sm:$0xff] }
  0x19   : > { %853 = vmatpush1.bf16.msra.mxu0 %v3321_v23  ;;  %459 = vrot.lane.b32.xlu0 %v3123_v17, %s3528_s27 }
  0x1a   : > { %854 = vmatprep.subr.bf16.mxu0 %v3322_v24  ;;  %482 = vrot.lane.b32.xlu1 %v3124_v20, %s3528_s27 }
  0x1d   : > { %855 = vmatpush1.bf16.msra.mxu0 %v3324_v25  ;;  %505 = vrot.lane.b32.xlu0 %v3125_v21, %s3528_s27 }
  0x1e   : > { %856 = vmatprep.subr.bf16.mxu0 %v3325_v26  ;;  %358 = vrot.lane.b32.xlu1 %v3119_v10, %s3529_s23 }
  0x21   : > { %857 = vmatpush1.bf16.msra.mxu0 %v3327_v27  ;;  %372 = vrot.lane.b32.xlu0 %v3119_v10, %s3530_s26 }
  0x22   : > { %858 = vmatprep.subr.bf16.mxu0 %v3328_v28  ;;  %384 = vrot.lane.b32.xlu1 %v3120_v11, %s3529_s23 }
  0x25   : > { %859 = vmatpush1.bf16.msra.mxu0 %v3330_v29  ;;  %396 = vrot.lane.b32.xlu0 %v3120_v11, %s3530_s26 }
  0x26   : > { %860 = vmatprep.subr.bf16.mxu0 %v3331_v30  ;;  %407 = vrot.lane.b32.xlu1 %v3121_v15, %s3529_s23 }
  0x29   : > { %861 = vmatpush1.bf16.msra.mxu0 %v3333_v31  ;;  %419 = vrot.lane.b32.xlu0 %v3121_v15, %s3530_s26 }
  0x2a   : > { %874 = vmatprep.subr.bf16.mxu0 %v3334_v32  ;;  %430 = vrot.lane.b32.xlu1 %v3122_v16, %s3529_s23 }
  0x2d   : > { %875 = vmatpush2.bf16.msra.mxu0 %v3336_v33  ;;  %442 = vrot.lane.b32.xlu0 %v3122_v16, %s3530_s26  ;;  %v523_v33 = vld [vmem:[#allocation2 + $0x30] sm:$0xff] }
  0x2e   : > { %876 = vmatprep.subr.bf16.mxu0 %v3337_v34  ;;  %453 = vrot.lane.b32.xlu1 %v3123_v17, %s3529_s23 }
  0x31   : > { %877 = vmatpush2.bf16.msra.mxu0 %v3339_v35  ;;  %465 = vrot.lane.b32.xlu0 %v3123_v17, %s3530_s26  ;;  %v521_v17 = vld [vmem:[#allocation2 + $0x20] sm:$0xff] }
  0x32   : > { %476 = vrot.lane.b32.xlu1 %v3124_v20, %s3529_s23 }
  0x35   : > { %488 = vrot.lane.b32.xlu0 %v3124_v20, %s3530_s26 }
  0x36   : > { %499 = vrot.lane.b32.xlu1 %v3125_v21, %s3529_s23  ;;  %s3531_s23 = smov 44  }
  0x39   : > { %511 = vrot.lane.b32.xlu0 %v3125_v21, %s3530_s26 }
  0x83   : > { %v366_v36 = vpop.permute.xlu0 %365 }
  0x84   : > { %v367_v37 = vrot.slane %v366_v36, 4  ;;  %v414_v38 = vpop.permute.xlu1 %413 }
  0x85   : > { %v415_v39 = vrot.slane %v414_v38, 4 }
  0x86   : > { %v369_v40 = vsel %vm368_vm3, %v366_v36, %v367_v37 }
  0x87   : > { %371 = vst.msk [vmem:[#allocation2 + $0x8] sm:$0xff] %vm3618_vm2, %v369_v40  ;;  %v391_v41 = vpop.permute.xlu0 %390  ;;  %v416_v42 = vsel %vm368_vm3, %v414_v38, %v415_v39 }
  0x88   : > { %v392_v43 = vrot.slane %v391_v41, 4  ;;  %418 = vst.msk [vmem:[#allocation2 + $0x28] sm:$0xff] %vm3618_vm2, %v416_v42  ;;  %v437_v44 = vpop.permute.xlu1 %436 }
  0x89   : > { %v438_v45 = vrot.slane %v437_v44, 4 }
  0x8a   : > { %v393_v46 = vsel %vm368_vm3, %v391_v41, %v392_v43 }
  0x8b   : > { %395 = vst.msk [vmem:[#allocation2 + $0x18] sm:$0xff] %vm3618_vm2, %v393_v46  ;;  %v439_v47 = vsel %vm368_vm3, %v437_v44, %v438_v45  ;;  %v460_v48 = vpop.permute.xlu0 %459 }
  0x8c   : > { %441 = vst.msk [vmem:[#allocation2 + $0x38] sm:$0xff] %vm3618_vm2, %v439_v47  ;;  %v461_v49 = vrot.slane %v460_v48, 4  ;;  %v483_v50 = vpop.permute.xlu1 %482 }
  0x8d   : > { %v484_v51 = vrot.slane %v483_v50, 4 }
  0x8e   : > { %v3340_v52 = vld [vmem:[#allocation2] ss:$8 sps:$4 sm:$0xff]   ;;  %v3342_v53 = vld [vmem:[#allocation2 + $0x4] ss:$8 sps:$4 sm:$0xff]   ;;  %v462_v54 = vsel %vm368_vm3, %v460_v48, %v461_v49 }
  0x8f   : > { %464 = vst.msk [vmem:[#allocation2 + $0x48] sm:$0xff] %vm3618_vm2, %v462_v54  ;;  %v485_v55 = vsel %vm368_vm3, %v483_v50, %v484_v51  ;;  %v506_v56 = vpop.permute.xlu0 %505  ;;  %2965 = vmatprep.mubr.msk.bf16.mxu0 %vm375_vm4, %v3342_v53  ;;  %v3345_v6 = vld [vmem:[#allocation2 + $0x24] ss:$8 sps:$4 sm:$0xff]  }
  0x90   : > { %487 = vst.msk [vmem:[#allocation2 + $0x58] sm:$0xff] %vm3618_vm2, %v485_v55  ;;  %v507_v57 = vrot.slane %v506_v56, 4  ;;  %v359_v58 = vpop.permute.xlu1 %358  ;;  %879 = vmatmul.mubr.bf16.vlgmr.msra.gmra.mxu0 %v3340_v52  ;;  %v522_v18 = vld [vmem:[#allocation2 + $0x28] sm:$0xff]  ;;  %v525_v49 = vld [vmem:[#allocation2 + $0x40] sm:$0xff]  ;;  %v527_v55 = vld [vmem:[#allocation2 + $0x50] sm:$0xff] }
  0x91   : > { %v360_v59 = vrot.slane %v359_v58, 4  ;;  %v2921_v24 = vcombine.low %v521_v17, %v522_v18  ;;  %v567_v18 = vlaneseq }
  0x92   : > { %v3343_v60 = vld [vmem:[#allocation2 + $0x14] ss:$8 sps:$4 sm:$0xff]   ;;  %v508_v61 = vsel %vm368_vm3, %v506_v56, %v507_v57 }
  0x93   : > { %510 = vst.msk [vmem:[#allocation2 + $0x68] sm:$0xff] %vm3618_vm2, %v508_v61  ;;  %v362_v62 = vsel %vm361_vm5, %v359_v58, %v360_v59  ;;  %v373_v63 = vpop.permute.xlu0 %372  ;;  %v520_v1 = vld [vmem:[#allocation2 + $0x18] sm:$0xff]  ;;  %2966 = vmatprep.mubr.msk.bf16.mxu0 %vm375_vm4, %v3343_v60  ;;  %v529_v59 = vld [vmem:[#allocation2 + $0x60] sm:$0xff] }
  0x94   : > { %364 = vst.msk [vmem:[#allocation2 + $0x70] sm:$0xff] %vm3618_vm2, %v362_v62  ;;  %v374_v2 = vrot.slane %v373_v63, 4  ;;  %v385_v3 = vpop.permute.xlu1 %384  ;;  %v2919_v8 = vcombine.low %v519_v0, %v520_v1  ;;  %v3347_v22 = vld [vmem:[#allocation2 + $0x34] ss:$8 sps:$4 sm:$0xff]  }
  0x95   : > { %v386_v5 = vrot.slane %v385_v3, 4  ;;  %v524_v34 = vld [vmem:[#allocation2 + $0x38] sm:$0xff] }
  0x96   : > { %v376_v7 = vsel %vm375_vm4, %v373_v63, %v374_v2  ;;  %v3349_v38 = vld [vmem:[#allocation2 + $0x44] ss:$8 sps:$4 sm:$0xff]   ;;  %v2923_v40 = vcombine.low %v523_v33, %v524_v34 }
  0x97   : > { %378 = vst.msk [vmem:[#allocation2 + $0x78] sm:$0xff] %vm3618_vm2, %v376_v7  ;;  %v387_v9 = vsel %vm361_vm5, %v385_v3, %v386_v5  ;;  %v397_v10 = vpop.permute.xlu0 %396  ;;  %v526_v50 = vld [vmem:[#allocation2 + $0x48] sm:$0xff]  ;;  %v3351_v52 = vld [vmem:[#allocation2 + $0x54] ss:$8 sps:$4 sm:$0xff]  }
  0x98   : > { %389 = vst.msk [vmem:[#allocation2 + $0x80] sm:$0xff] %vm3618_vm2, %v387_v9  ;;  %v398_v11 = vrot.slane %v397_v10, 4  ;;  %v408_v12 = vpop.permute.xlu1 %407  ;;  %889 = vmatmul.mubr.bf16.gmra.mxu0 %v2919_v8  ;;  %v2925_v54 = vcombine.low %v525_v49, %v526_v50  ;;  %v528_v56 = vld [vmem:[#allocation2 + $0x58] sm:$0xff] }
  0x99   : > { %v409_v13 = vrot.slane %v408_v12, 4  ;;  %2967 = vmatprep.mubr.msk.bf16.mxu0 %vm375_vm4, %v3345_v6  ;;  %v2927_v58 = vcombine.low %v527_v55, %v528_v56 }
  0x9a   : > { %v399_v14 = vsel %vm375_vm4, %v397_v10, %v398_v11  ;;  %v3353_v57 = vld [vmem:[#allocation2 + $0x64] ss:$8 sps:$4 sm:$0xff]  }
  0x9b   : > { %401 = vst.msk [vmem:[#allocation2 + $0x88] sm:$0xff] %vm3618_vm2, %v399_v14  ;;  %v410_v15 = vsel %vm361_vm5, %v408_v12, %v409_v13  ;;  %v420_v16 = vpop.permute.xlu0 %419  ;;  %v530_v60 = vld [vmem:[#allocation2 + $0x68] sm:$0xff]  ;;  %v531_v63 = vld [vmem:[#allocation2 + $0x70] sm:$0xff] }
  0x9c   : > { %412 = vst.msk [vmem:[#allocation2 + $0x90] sm:$0xff] %vm3618_vm2, %v410_v15  ;;  %v421_v19 = vrot.slane %v420_v16, 4  ;;  %v431_v20 = vpop.permute.xlu1 %430  ;;  %v2929_v62 = vcombine.low %v529_v59, %v530_v60 }
  0x9d   : > { %v432_v21 = vrot.slane %v431_v20, 4 }
  0x9e   : > { %v422_v23 = vsel %vm375_vm4, %v420_v16, %v421_v19  ;;  %v3355_v61 = vld [vmem:[#allocation2 + $0x74] ss:$8 sps:$4 sm:$0xff]   ;;  %v3782_v19 = vshrl.u32 %v567_v18, 7 }
  0x9f   : > { %424 = vst.msk [vmem:[#allocation2 + $0x98] sm:$0xff] %vm3618_vm2, %v422_v23  ;;  %v433_v25 = vsel %vm361_vm5, %v431_v20, %v432_v21  ;;  %v443_v26 = vpop.permute.xlu0 %442  ;;  %v532_v4 = vld [vmem:[#allocation2 + $0x78] sm:$0xff]  ;;  %v533_v2 = vld [vmem:[#allocation2 + $0x80] sm:$0xff] }
  0xa0   : > { %435 = vst.msk [vmem:[#allocation2 + $0xa0] sm:$0xff] %vm3618_vm2, %v433_v25  ;;  %v444_v27 = vrot.slane %v443_v26, 4  ;;  %v454_v28 = vpop.permute.xlu1 %453  ;;  %899 = vmatmul.mubr.bf16.gmra.mxu0 %v2921_v24  ;;  %v2931_v1 = vcombine.low %v531_v63, %v532_v4  ;;  %v569_v20 = vsub.s32 0, %v3782_v19  ;;  %v565_v21 = vld [vmem:[%s4664_s2] sm:$0x3] }
  0xa1   : > { %v455_v29 = vrot.slane %v454_v28, 4  ;;  %2968 = vmatprep.mubr.msk.bf16.mxu0 %vm375_vm4, %v3347_v22  ;;  %v573_v22 = vsub.s32 1, %v3782_v19 }
  0xa2   : > { %v445_v30 = vsel %vm375_vm4, %v443_v26, %v444_v27  ;;  %v3357_v0 = vld [vmem:[#allocation2 + $0x84] ss:$8 sps:$4 sm:$0xff]   ;;  %v3791_v23 = vrot.slane %v565_v21, %v569_v20 }
  0xa3   : > { %447 = vst.msk [vmem:[#allocation2 + $0xa8] sm:$0xff] %vm3618_vm2, %v445_v30  ;;  %v456_v31 = vsel %vm361_vm5, %v454_v28, %v455_v29  ;;  %v466_v32 = vpop.permute.xlu0 %465  ;;  %v534_v3 = vld [vmem:[#allocation2 + $0x88] sm:$0xff]  ;;  %v535_v7 = vld [vmem:[#allocation2 + $0x90] sm:$0xff]  ;;  %v3795_v24 = vrot.slane %v565_v21, %v573_v22 }
  0xa4   : > { %458 = vst.msk [vmem:[#allocation2 + $0xb0] sm:$0xff] %vm3618_vm2, %v456_v31  ;;  %v467_v35 = vrot.slane %v466_v32, 4  ;;  %v477_v36 = vpop.permute.xlu1 %476  ;;  %v2933_v6 = vcombine.low %v533_v2, %v534_v3 }
  0xa5   : > { %v478_v37 = vrot.slane %v477_v36, 4 }
  0xa6   : > { %v468_v39 = vsel %vm375_vm4, %v466_v32, %v467_v35  ;;  %v3359_v5 = vld [vmem:[#allocation2 + $0x94] ss:$8 sps:$4 sm:$0xff]  }
  0xa7   : > { %470 = vst.msk [vmem:[#allocation2 + $0xb8] sm:$0xff] %vm3618_vm2, %v468_v39  ;;  %v479_v41 = vsel %vm361_vm5, %v477_v36, %v478_v37  ;;  %v489_v42 = vpop.permute.xlu0 %488  ;;  %v536_v8 = vld [vmem:[#allocation2 + $0x98] sm:$0xff] }
  0xa8   : > { %481 = vst.msk [vmem:[#allocation2 + $0xc0] sm:$0xff] %vm3618_vm2, %v479_v41  ;;  %v490_v43 = vrot.slane %v489_v42, 4  ;;  %v500_v44 = vpop.permute.xlu1 %499  ;;  %909 = vmatmul.mubr.bf16.gmra.mxu0 %v2923_v40  ;;  %v2935_v10 = vcombine.low %v535_v7, %v536_v8 }
  0xa9   : > { %v501_v45 = vrot.slane %v500_v44, 4  ;;  %2969 = vmatprep.mubr.msk.bf16.mxu0 %vm375_vm4, %v3349_v38 }
  0xaa   : > { %v491_v46 = vsel %vm375_vm4, %v489_v42, %v490_v43  ;;  %v3361_v9 = vld [vmem:[#allocation2 + $0xa4] ss:$8 sps:$4 sm:$0xff]   ;;  %v3363_v12 = vld [vmem:[#allocation2 + $0xa0] ss:$8 sps:$4 sm:$0xff]  }
  0xab   : > { %493 = vst.msk [vmem:[#allocation2 + $0xc8] sm:$0xff] %vm3618_vm2, %v491_v46  ;;  %v502_v47 = vsel %vm361_vm5, %v500_v44, %v501_v45  ;;  %v512_v48 = vpop.permute.xlu0 %511  ;;  %vm2093_vm5 = vcmask 1041408  }
  0xac   : > { %504 = vst.msk [vmem:[#allocation2 + $0xd0] sm:$0xff] %vm3618_vm2, %v502_v47  ;;  %v513_v51 = vrot.slane %v512_v48, 4 }
  0xae   : > { %v514_v53 = vsel %vm375_vm4, %v512_v48, %v513_v51  ;;  %v3364_v11 = vld [vmem:[#allocation2 + $0xb4] ss:$8 sps:$4 sm:$0xff]   ;;  %v3366_v14 = vld [vmem:[#allocation2 + $0xb0] ss:$8 sps:$4 sm:$0xff]  }
  0xaf   : > { %516 = vst.msk [vmem:[#allocation2 + $0xd8] sm:$0xff] %vm3618_vm2, %v514_v53  ;;  %vm4256_vm2 = vmor %vm1382_vm15, %vm1381_vm14  ;;  %vm2413_vm14 = vcmask 1044352   ;;  %vm2414_vm15 = vcmask 523268  }
  0xb0   : > { %919 = vmatmul.mubr.bf16.gmra.mxu0 %v2925_v54 }
  0xb1   : > { %2970 = vmatprep.mubr.msk.bf16.mxu0 %vm375_vm4, %v3351_v52 }
  0xb2   : > { %v3367_v13 = vld [vmem:[#allocation2 + $0xc4] ss:$8 sps:$4 sm:$0xff]   ;;  %v3369_v15 = vld [vmem:[#allocation2 + $0xc0] ss:$8 sps:$4 sm:$0xff]  }
  0xb6   : > { %v3370_v16 = vld [vmem:[#allocation2 + $0xd4] ss:$8 sps:$4 sm:$0xff]   ;;  %v3372_v17 = vld [vmem:[#allocation2 + $0xd0] ss:$8 sps:$4 sm:$0xff]  }
  0xb8   : > { %929 = vmatmul.mubr.bf16.gmra.mxu0 %v2927_v58 }
  0xb9   : > { %2971 = vmatprep.mubr.msk.bf16.mxu0 %vm375_vm4, %v3353_v57 }
  0xc0   : > { %939 = vmatmul.mubr.bf16.gmra.mxu0 %v2929_v62 }
  0xc1   : > { %2972 = vmatprep.mubr.msk.bf16.mxu0 %vm375_vm4, %v3355_v61 }
  0xc8   : > { %949 = vmatmul.mubr.bf16.gmra.mxu0 %v2931_v1 }
  0xc9   : > { %2973 = vmatprep.mubr.msk.bf16.mxu0 %vm375_vm4, %v3357_v0 }
  0xd0   : > { %959 = vmatmul.mubr.bf16.gmra.mxu0 %v2933_v6 }
  0xd1   : > { %2974 = vmatprep.mubr.msk.bf16.mxu0 %vm375_vm4, %v3359_v5 }
  0xd8   : > { %969 = vmatmul.mubr.bf16.gmra.mxu0 %v2935_v10 }
  0xd9   : > { %2975 = vmatprep.mubr.msk.bf16.mxu0 %vm375_vm4, %v3361_v9 }
  0xe0   : > { %979 = vmatmul.mubr.bf16.gmra.mxu0 %v3363_v12 }
  0xe1   : > { %2976 = vmatprep.mubr.msk.bf16.mxu0 %vm375_vm4, %v3364_v11 }
  0xe8   : > { %989 = vmatmul.mubr.bf16.gmra.mxu0 %v3366_v14 }
  0xe9   : > { %2977 = vmatprep.mubr.msk.bf16.mxu0 %vm375_vm4, %v3367_v13 }
  0xf0   : > { %999 = vmatmul.mubr.bf16.gmra.mxu0 %v3369_v15 }
  0xf1   : > { %2978 = vmatprep.mubr.msk.bf16.mxu0 %vm375_vm4, %v3370_v16 }
  0xf8   : > { %1009 = vmatmul.mubr.bf16.gmra.mxu0 %v3372_v17 }
 0x150   : > { %v880_v25 = vpop.f32.mrf.mxu0 }
 0x151   : > { %v3798_v26 = vadd.f32 %v880_v25, %v3791_v23 }
 0x152   : > { %v882_v27 = vpop.f32.mrf.mxu0 }
 0x153   : > { %v1019_v28 = vmax.f32 %v3798_v26, 0.0  ;;  %v883_v29 = vadd.f32 %v882_v27, %v3795_v24  ;;  %v3373_v26 = vld [vmem:[%s4665_s3 + $0x74] ss:$8 sps:$4 sm:$0xff]  }
 0x154   : > { %v884_v30 = vpop.f32.mrf.mxu0  ;;  %2100 = vmatprep.subr.bf16.mxu1 %v3373_v26 }
 0x155   : > { %v1020_v31 = vmax.f32 %v883_v29, 0.0  ;;  %v3803_v32 = vadd.f32 %v884_v30, %v3791_v23 }
 0x156   : > { %v886_v33 = vpop.f32.mrf.mxu0 }
 0x157   : > { %1077 = vst.msk [vmem:[#allocation3 + $0x8] sm:$0xff] %vm1076_vm6, %v1020_v31  ;;  %v1021_v34 = vmax.f32 %v3803_v32, 0.0  ;;  %v887_v35 = vadd.f32 %v886_v33, %v3795_v24 }
 0x158   : > { %v890_v36 = vpop.f32.mrf.mxu0 }
 0x159   : > { %v1022_v37 = vmax.f32 %v887_v35, 0.0  ;;  %v3809_v38 = vadd.f32 %v890_v36, %v3791_v23 }
 0x15a   : > { %v892_v39 = vpop.f32.mrf.mxu0 }
 0x15b   : > { %1079 = vst.msk [vmem:[#allocation3 + $0x18] sm:$0xff] %vm1076_vm6, %v1022_v37  ;;  %v1023_v40 = vmax.f32 %v3809_v38, 0.0  ;;  %v893_v41 = vadd.f32 %v892_v39, %v3795_v24 }
 0x15c   : > { %v894_v42 = vpop.f32.mrf.mxu0 }
 0x15d   : > { %v1024_v43 = vmax.f32 %v893_v41, 0.0  ;;  %v3815_v44 = vadd.f32 %v894_v42, %v3791_v23 }
 0x15e   : > { %v896_v45 = vpop.f32.mrf.mxu0 }
 0x15f   : > { %1081 = vst.msk [vmem:[#allocation3 + $0x28] sm:$0xff] %vm1076_vm6, %v1024_v43  ;;  %v1025_v46 = vmax.f32 %v3815_v44, 0.0  ;;  %v897_v47 = vadd.f32 %v896_v45, %v3795_v24 }
 0x160   : > { %v900_v48 = vpop.f32.mrf.mxu0 }
 0x161   : > { %v1026_v49 = vmax.f32 %v897_v47, 0.0  ;;  %v3821_v50 = vadd.f32 %v900_v48, %v3791_v23 }
 0x162   : > { %v902_v51 = vpop.f32.mrf.mxu0 }
 0x163   : > { %1083 = vst.msk [vmem:[#allocation3 + $0x38] sm:$0xff] %vm1076_vm6, %v1026_v49  ;;  %v1027_v52 = vmax.f32 %v3821_v50, 0.0  ;;  %v903_v53 = vadd.f32 %v902_v51, %v3795_v24 }
 0x164   : > { %v904_v54 = vpop.f32.mrf.mxu0 }
 0x165   : > { %v1028_v55 = vmax.f32 %v903_v53, 0.0  ;;  %v3827_v56 = vadd.f32 %v904_v54, %v3791_v23 }
 0x166   : > { %v906_v57 = vpop.f32.mrf.mxu0 }
 0x167   : > { %1085 = vst.msk [vmem:[#allocation3 + $0x48] sm:$0xff] %vm1076_vm6, %v1028_v55  ;;  %v1029_v58 = vmax.f32 %v3827_v56, 0.0  ;;  %v907_v59 = vadd.f32 %v906_v57, %v3795_v24 }
 0x168   : > { %v910_v60 = vpop.f32.mrf.mxu0 }
 0x169   : > { %v1030_v61 = vmax.f32 %v907_v59, 0.0  ;;  %v3833_v62 = vadd.f32 %v910_v60, %v3791_v23 }
 0x16a   : > { %v912_v63 = vpop.f32.mrf.mxu0 }
 0x16b   : > { %1087 = vst.msk [vmem:[#allocation3 + $0x58] sm:$0xff] %vm1076_vm6, %v1030_v61  ;;  %v1031_v4 = vmax.f32 %v3833_v62, 0.0  ;;  %v913_v0 = vadd.f32 %v912_v63, %v3795_v24 }
 0x16c   : > { %v914_v1 = vpop.f32.mrf.mxu0 }
 0x16d   : > { %v1032_v2 = vmax.f32 %v913_v0, 0.0  ;;  %v3839_v3 = vadd.f32 %v914_v1, %v3791_v23 }
 0x16e   : > { %v916_v5 = vpop.f32.mrf.mxu0 }
 0x16f   : > { %1089 = vst.msk [vmem:[#allocation3 + $0x68] sm:$0xff] %vm1076_vm6, %v1032_v2  ;;  %v1033_v6 = vmax.f32 %v3839_v3, 0.0  ;;  %v917_v7 = vadd.f32 %v916_v5, %v3795_v24 }
 0x170   : > { %v920_v8 = vpop.f32.mrf.mxu0 }
 0x171   : > { %v1034_v9 = vmax.f32 %v917_v7, 0.0  ;;  %v3845_v10 = vadd.f32 %v920_v8, %v3791_v23 }
 0x172   : > { %v922_v11 = vpop.f32.mrf.mxu0 }
 0x173   : > { %1091 = vst.msk [vmem:[#allocation3 + $0x78] sm:$0xff] %vm1076_vm6, %v1034_v9  ;;  %v1035_v12 = vmax.f32 %v3845_v10, 0.0  ;;  %v923_v13 = vadd.f32 %v922_v11, %v3795_v24 }
 0x174   : > { %v924_v14 = vpop.f32.mrf.mxu0 }
 0x175   : > { %v1036_v15 = vmax.f32 %v923_v13, 0.0  ;;  %v3851_v16 = vadd.f32 %v924_v14, %v3791_v23 }
 0x176   : > { %v926_v17 = vpop.f32.mrf.mxu0 }
 0x177   : > { %1093 = vst.msk [vmem:[#allocation3 + $0x88] sm:$0xff] %vm1076_vm6, %v1036_v15  ;;  %v1037_v18 = vmax.f32 %v3851_v16, 0.0  ;;  %v927_v21 = vadd.f32 %v926_v17, %v3795_v24 }
 0x178   : > { %v930_v25 = vpop.f32.mrf.mxu0 }
 0x179   : > { %v1038_v27 = vmax.f32 %v927_v21, 0.0  ;;  %v3857_v29 = vadd.f32 %v930_v25, %v3791_v23 }
 0x17a   : > { %v932_v30 = vpop.f32.mrf.mxu0 }
 0x17b   : > { %1095 = vst.msk [vmem:[#allocation3 + $0x98] sm:$0xff] %vm1076_vm6, %v1038_v27  ;;  %v1039_v31 = vmax.f32 %v3857_v29, 0.0  ;;  %v933_v33 = vadd.f32 %v932_v30, %v3795_v24 }
 0x17c   : > { %v934_v35 = vpop.f32.mrf.mxu0 }
 0x17d   : > { %v1040_v36 = vmax.f32 %v933_v33, 0.0  ;;  %v3863_v37 = vadd.f32 %v934_v35, %v3791_v23 }
 0x17e   : > { %v936_v39 = vpop.f32.mrf.mxu0 }
 0x17f   : > { %1097 = vst.msk [vmem:[#allocation3 + $0xa8] sm:$0xff] %vm1076_vm6, %v1040_v36  ;;  %v1041_v41 = vmax.f32 %v3863_v37, 0.0  ;;  %v937_v42 = vadd.f32 %v936_v39, %v3795_v24 }
 0x180   : > { %v940_v43 = vpop.f32.mrf.mxu0 }
 0x181   : > { %v1042_v45 = vmax.f32 %v937_v42, 0.0  ;;  %v3869_v47 = vadd.f32 %v940_v43, %v3791_v23 }
 0x182   : > { %v942_v48 = vpop.f32.mrf.mxu0 }
 0x183   : > { %1099 = vst.msk [vmem:[#allocation3 + $0xb8] sm:$0xff] %vm1076_vm6, %v1042_v45  ;;  %v1043_v49 = vmax.f32 %v3869_v47, 0.0  ;;  %v943_v51 = vadd.f32 %v942_v48, %v3795_v24 }
 0x184   : > { %v944_v53 = vpop.f32.mrf.mxu0 }
 0x185   : > { %v1044_v54 = vmax.f32 %v943_v51, 0.0  ;;  %v3875_v55 = vadd.f32 %v944_v53, %v3791_v23 }
 0x186   : > { %v946_v57 = vpop.f32.mrf.mxu0 }
 0x187   : > { %1101 = vst.msk [vmem:[#allocation3 + $0xc8] sm:$0xff] %vm1076_vm6, %v1044_v54  ;;  %v1045_v59 = vmax.f32 %v3875_v55, 0.0  ;;  %v947_v60 = vadd.f32 %v946_v57, %v3795_v24  ;;  %v1135_v54 = vld [vmem:[#allocation3 + $0x18] sm:$0xff]  ;;  %v3376_v55 = vld [vmem:[%s4665_s3 + $0x64] ss:$8 sps:$4 sm:$0xff]  }
 0x188   : > { %v950_v61 = vpop.f32.mrf.mxu0 }
 0x189   : > { %v1046_v63 = vmax.f32 %v947_v60, 0.0  ;;  %v3881_v0 = vadd.f32 %v950_v61, %v3791_v23 }
 0x18a   : > { %v952_v1 = vpop.f32.mrf.mxu0 }
 0x18b   : > { %1103 = vst.msk [vmem:[#allocation3 + $0xd8] sm:$0xff] %vm1076_vm6, %v1046_v63  ;;  %v1047_v2 = vmax.f32 %v3881_v0, 0.0  ;;  %v953_v5 = vadd.f32 %v952_v1, %v3795_v24 }
 0x18c   : > { %v954_v7 = vpop.f32.mrf.mxu0 }
 0x18d   : > { %v1048_v8 = vmax.f32 %v953_v5, 0.0  ;;  %v955_v9 = vadd.f32 %v954_v7, %v3791_v23  ;;  %v4018_v29 = vmax.f32 %v1019_v28, %v1047_v2  ;;  %v3375_v28 = vld [vmem:[%s4665_s3 + $0x70] ss:$8 sps:$4 sm:$0xff]   ;;  %v3379_v2 = vld [vmem:[%s4665_s3 + $0x54] ss:$8 sps:$4 sm:$0xff]  }
 0x18e   : > { %v956_v11 = vpop.f32.mrf.mxu0  ;;  %2101 = vmatpush1.bf16.msra.mxu1 %v3375_v28 }
 0x18f   : > { %1105 = vst.msk [vmem:[#allocation3 + $0xe8] sm:$0xff] %vm1076_vm6, %v1048_v8  ;;  %v1049_v13 = vmax.f32 %v955_v9, 0.0  ;;  %v957_v14 = vadd.f32 %v956_v11, %v3795_v24  ;;  %2102 = vmatprep.subr.bf16.mxu1 %v3376_v55 }
 0x190   : > { %v960_v15 = vpop.f32.mrf.mxu0 }
 0x191   : > { %v1050_v17 = vmax.f32 %v957_v14, 0.0  ;;  %v961_v21 = vadd.f32 %v960_v15, %v3791_v23  ;;  %v3903_v63 = vmax.f32 %v1021_v34, %v1049_v13 }
 0x192   : > { %v962_v25 = vpop.f32.mrf.mxu0 }
 0x193   : > { %1107 = vst.msk [vmem:[#allocation3 + $0xf8] sm:$0xff] %vm1076_vm6, %v1050_v17  ;;  %v1051_v27 = vmax.f32 %v961_v21, 0.0  ;;  %v963_v30 = vadd.f32 %v962_v25, %v3795_v24  ;;  %v1139_v21 = vld [vmem:[#allocation3 + $0x38] sm:$0xff] }
 0x194   : > { %v964_v33 = vpop.f32.mrf.mxu0 }
 0x195   : > { %v1052_v35 = vmax.f32 %v963_v30, 0.0  ;;  %v965_v36 = vadd.f32 %v964_v33, %v3791_v23  ;;  %v3927_v44 = vmax.f32 %v1023_v40, %v1051_v27 }
 0x196   : > { %v966_v39 = vpop.f32.mrf.mxu0 }
 0x197   : > { %1109 = vst.msk [vmem:[#allocation3 + $0x108] sm:$0xff] %vm1076_vm6, %v1052_v35  ;;  %v1053_v42 = vmax.f32 %v965_v36, 0.0  ;;  %v967_v43 = vadd.f32 %v966_v39, %v3795_v24 }
 0x198   : > { %v970_v45 = vpop.f32.mrf.mxu0 }
 0x199   : > { %v1054_v48 = vmax.f32 %v967_v43, 0.0  ;;  %v3896_v51 = vadd.f32 %v970_v45, %v3791_v23  ;;  %v3918_v36 = vmax.f32 %v1025_v46, %v1053_v42  ;;  %v1137_v45 = vld [vmem:[#allocation3 + $0x28] sm:$0xff] }
 0x19a   : > { %v972_v53 = vpop.f32.mrf.mxu0  ;;  %v1163_v57 = vld [vmem:[#allocation3 + $0xf8] sm:$0xff] }
 0x19b   : > { %1111 = vst.msk [vmem:[#allocation3 + $0x118] sm:$0xff] %vm1076_vm6, %v1054_v48  ;;  %v1055_v60 = vmax.f32 %v3896_v51, 0.0  ;;  %v973_v61 = vadd.f32 %v972_v53, %v3795_v24  ;;  %v1191_v1 = vmax.f32 %v1135_v54, %v1163_v57 }
 0x19c   : > { %v974_v5 = vpop.f32.mrf.mxu0 }
 0x19d   : > { %v1056_v7 = vmax.f32 %v973_v61, 0.0  ;;  %v975_v8 = vadd.f32 %v974_v5, %v3791_v23  ;;  %v3215_v9 = vpack.i.bf16 %v1191_v1, %v3903_v63  ;;  %v3950_v56 = vmax.f32 %v1027_v52, %v1055_v60 }
 0x19e   : > { %v976_v11 = vpop.f32.mrf.mxu0  ;;  %v1165_v30 = vld [vmem:[#allocation3 + $0x108] sm:$0xff] }
 0x19f   : > { %1113 = vst.msk [vmem:[#allocation3 + $0x128] sm:$0xff] %vm1076_vm6, %v1056_v7  ;;  %v1057_v14 = vmax.f32 %v975_v8, 0.0  ;;  %v977_v15 = vadd.f32 %v976_v11, %v3795_v24  ;;  %3216 = vrot.lane.b32.xlu1 %v3215_v9, %s3531_s23  ;;  %v1193_v57 = vmax.f32 %v1137_v45, %v1165_v30  ;;  %v1143_v11 = vld [vmem:[#allocation3 + $0x58] sm:$0xff] }
 0x1a0   : > { %v980_v17 = vpop.f32.mrf.mxu0 }
 0x1a1   : > { %v1058_v32 = vmax.f32 %v977_v15, 0.0  ;;  %v3911_v34 = vadd.f32 %v980_v17, %v3791_v23  ;;  %v3225_v8 = vpack.i.bf16 %v1193_v57, %v3927_v44  ;;  %v3939_v38 = vmax.f32 %v1029_v58, %v1057_v14 }
 0x1a2   : > { %v982_v13 = vpop.f32.mrf.mxu0  ;;  %v1167_v25 = vld [vmem:[#allocation3 + $0x118] sm:$0xff] }
 0x1a3   : > { %1115 = vst.msk [vmem:[#allocation3 + $0x138] sm:$0xff] %vm1076_vm6, %v1058_v32  ;;  %v1059_v33 = vmax.f32 %v3911_v34, 0.0  ;;  %v983_v35 = vadd.f32 %v982_v13, %v3795_v24  ;;  %v1195_v39 = vmax.f32 %v1139_v21, %v1167_v25  ;;  %v1141_v21 = vld [vmem:[#allocation3 + $0x48] sm:$0xff] }
 0x1a4   : > { %v984_v43 = vpop.f32.mrf.mxu0 }
 0x1a5   : > { %v1060_v48 = vmax.f32 %v983_v35, 0.0  ;;  %v985_v53 = vadd.f32 %v984_v43, %v3791_v23  ;;  %v3220_v54 = vpack.i.bf16 %v1195_v39, %v3918_v36  ;;  %v3973_v3 = vmax.f32 %v1031_v4, %v1059_v33  ;;  %v1149_v33 = vld [vmem:[#allocation3 + $0x88] sm:$0xff] }
 0x1a6   : > { %v986_v61 = vpop.f32.mrf.mxu0  ;;  %v1169_v17 = vld [vmem:[#allocation3 + $0x128] sm:$0xff] }
 0x1a7   : > { %1117 = vst.msk [vmem:[#allocation3 + $0x148] sm:$0xff] %vm1076_vm6, %v1060_v48  ;;  %v1061_v1 = vmax.f32 %v985_v53, 0.0  ;;  %v987_v5 = vadd.f32 %v986_v61, %v3795_v24  ;;  %3221 = vrot.lane.b32.xlu0 %v3220_v54, %s3531_s23  ;;  %v1197_v39 = vmax.f32 %v1141_v21, %v1169_v17  ;;  %v1147_v61 = vld [vmem:[#allocation3 + $0x78] sm:$0xff] }
 0x1a8   : > { %v990_v46 = vpop.f32.mrf.mxu0 }
 0x1a9   : > { %v1062_v42 = vmax.f32 %v987_v5, 0.0  ;;  %v3930_v7 = vadd.f32 %v990_v46, %v3791_v23  ;;  %v3235_v54 = vpack.i.bf16 %v1197_v39, %v3950_v56  ;;  %v3962_v50 = vmax.f32 %v1033_v6, %v1061_v1 }
 0x1aa   : > { %v992_v9 = vpop.f32.mrf.mxu0  ;;  %v1171_v15 = vld [vmem:[#allocation3 + $0x138] sm:$0xff] }
 0x1ab   : > { %1119 = vst.msk [vmem:[#allocation3 + $0x158] sm:$0xff] %vm1076_vm6, %v1062_v42  ;;  %v1063_v32 = vmax.f32 %v3930_v7, 0.0  ;;  %v993_v13 = vadd.f32 %v992_v9, %v3795_v24  ;;  %3226 = vrot.lane.b32.xlu0 %v3225_v8, %s3531_s23  ;;  %v1199_v40 = vmax.f32 %v1143_v11, %v1171_v15  ;;  %v1145_v8 = vld [vmem:[#allocation3 + $0x68] sm:$0xff] }
 0x1ac   : > { %v994_v27 = vpop.f32.mrf.mxu0 }
 0x1ad   : > { %v1064_v25 = vmax.f32 %v993_v13, 0.0  ;;  %v995_v30 = vadd.f32 %v994_v27, %v3791_v23  ;;  %v3230_v35 = vpack.i.bf16 %v1199_v40, %v3939_v38  ;;  %v3993_v16 = vmax.f32 %v1035_v12, %v1063_v32  ;;  %v1133_v12 = vld [vmem:[#allocation3 + $0x8] sm:$0xff] }
 0x1ae   : > { %v996_v43 = vpop.f32.mrf.mxu0  ;;  %v1173_v46 = vld [vmem:[#allocation3 + $0x148] sm:$0xff] }
 0x1af   : > { %1121 = vst.msk [vmem:[#allocation3 + $0x168] sm:$0xff] %vm1076_vm6, %v1064_v25  ;;  %v1065_v45 = vmax.f32 %v995_v30, 0.0  ;;  %v997_v48 = vadd.f32 %v996_v43, %v3795_v24  ;;  %3231 = vrot.lane.b32.xlu1 %v3230_v35, %s3531_s23  ;;  %v1201_v17 = vmax.f32 %v1145_v8, %v1173_v46  ;;  %v1151_v35 = vld [vmem:[#allocation3 + $0x98] sm:$0xff] }
 0x1b0   : > { %v1000_v58 = vpop.f32.mrf.mxu0 }
 0x1b1   : > { %v1066_v14 = vmax.f32 %v997_v48, 0.0  ;;  %v3953_v53 = vadd.f32 %v1000_v58, %v3791_v23  ;;  %v3245_v25 = vpack.i.bf16 %v1201_v17, %v3973_v3  ;;  %v3982_v62 = vmax.f32 %v1037_v18, %v1065_v45  ;;  %v1153_v18 = vld [vmem:[#allocation3 + $0xa8] sm:$0xff] }
 0x1b2   : > { %v1002_v57 = vpop.f32.mrf.mxu0  ;;  %v1175_v5 = vld [vmem:[#allocation3 + $0x158] sm:$0xff]  ;;  %v1157_v17 = vld [vmem:[#allocation3 + $0xc8] sm:$0xff] }
 0x1b3   : > { %1123 = vst.msk [vmem:[#allocation3 + $0x178] sm:$0xff] %vm1076_vm6, %v1066_v14  ;;  %v1067_v42 = vmax.f32 %v3953_v53, 0.0  ;;  %v1003_v51 = vadd.f32 %v1002_v57, %v3795_v24  ;;  %3236 = vrot.lane.b32.xlu1 %v3235_v54, %s3531_s23  ;;  %v1203_v52 = vmax.f32 %v1147_v61, %v1175_v5 }
 0x1b4   : > { %v1004_v60 = vpop.f32.mrf.mxu0 }
 0x1b5   : > { %v1068_v9 = vmax.f32 %v1003_v51, 0.0  ;;  %v1005_v11 = vadd.f32 %v1004_v60, %v3791_v23  ;;  %v3240_v15 = vpack.i.bf16 %v1203_v52, %v3962_v50  ;;  %v1155_v60 = vld [vmem:[#allocation3 + $0xb8] sm:$0xff]  ;;  %v4004_v10 = vmax.f32 %v1039_v31, %v1067_v42 }
 0x1b6   : > { %v1006_v13 = vpop.f32.mrf.mxu0  ;;  %v1177_v43 = vld [vmem:[#allocation3 + $0x168] sm:$0xff] }
 0x1b7   : > { %1125 = vst.msk [vmem:[#allocation3 + $0x188] sm:$0xff] %vm1076_vm6, %v1068_v9  ;;  %v1069_v40 = vmax.f32 %v1005_v11, 0.0  ;;  %v1007_v27 = vadd.f32 %v1006_v13, %v3795_v24  ;;  %3241 = vrot.lane.b32.xlu0 %v3240_v15, %s3531_s23  ;;  %v1205_v57 = vmax.f32 %v1149_v33, %v1177_v43  ;;  %v1161_v9 = vld [vmem:[#allocation3 + $0xe8] sm:$0xff]  ;;  %v3391_v43 = vld [vmem:[%s4665_s3 + $0x14] ss:$8 sps:$4 sm:$0xff]  }
 0x1b8   : > { %v1010_v6 = vpop.f32.mrf.mxu0  ;;  %v1189_v15 = vmax.f32 %v1133_v12, %v1161_v9 }
 0x1b9   : > { %v1070_v1 = vmax.f32 %v1007_v27, 0.0  ;;  %v1011_v21 = vadd.f32 %v1010_v6, %v3791_v23  ;;  %v3255_v45 = vpack.i.bf16 %v1205_v57, %v3993_v16  ;;  %v3381_v6 = vld [vmem:[%s4665_s3 + $0x50] ss:$8 sps:$4 sm:$0xff]  }
 0x1ba   : > { %v1012_v30 = vpop.f32.mrf.mxu0  ;;  %v1179_v39 = vld [vmem:[#allocation3 + $0x178] sm:$0xff]  ;;  %v3275_v42 = vpack.i.bf16 %v1189_v15, %v4018_v29 }
 0x1bb   : > { %1127 = vst.msk [vmem:[#allocation3 + $0x198] sm:$0xff] %vm1076_vm6, %v1070_v1  ;;  %v1071_v48 = vmax.f32 %v1011_v21, 0.0  ;;  %v1013_v58 = vadd.f32 %v1012_v30, %v3795_v24  ;;  %3246 = vrot.lane.b32.xlu0 %v3245_v25, %s3531_s23  ;;  %v1207_v4 = vmax.f32 %v1151_v35, %v1179_v39  ;;  %v3382_v1 = vld [vmem:[%s4665_s3 + $0x44] ss:$8 sps:$4 sm:$0xff]   ;;  %v3384_v21 = vld [vmem:[%s4665_s3 + $0x40] ss:$8 sps:$4 sm:$0xff]  }
 0x1bc   : > { %v1014_v34 = vpop.f32.mrf.mxu0  ;;  %v3385_v25 = vld [vmem:[%s4665_s3 + $0x34] ss:$8 sps:$4 sm:$0xff]   ;;  %v3387_v30 = vld [vmem:[%s4665_s3 + $0x30] ss:$8 sps:$4 sm:$0xff]   ;;  %v3388_v35 = vld [vmem:[%s4665_s3 + $0x24] ss:$8 sps:$4 sm:$0xff]  }
 0x1bd   : > { %v1072_v14 = vmax.f32 %v1013_v58, 0.0  ;;  %v1015_v53 = vadd.f32 %v1014_v34, %v3791_v23  ;;  %v3250_v54 = vpack.i.bf16 %v1207_v4, %v3982_v62  ;;  %v4012_v37 = vmax.f32 %v1043_v49, %v1071_v48  ;;  %v3390_v39 = vld [vmem:[%s4665_s3 + $0x20] ss:$8 sps:$4 sm:$0xff]   ;;  %v3393_v48 = vld [vmem:[%s4665_s3 + $0x10] ss:$8 sps:$4 sm:$0xff]  }
 0x1be   : > { %v1016_v61 = vpop.f32.mrf.mxu0  ;;  %v1181_v5 = vld [vmem:[#allocation3 + $0x188] sm:$0xff]  ;;  %v3397_v34 = vld [vmem:[%s4665_s3 + $0xf4] ss:$8 sps:$4 sm:$0xff]  }
 0x1bf   : > { %1129 = vst.msk [vmem:[#allocation3 + $0x1a8] sm:$0xff] %vm1076_vm6, %v1072_v14  ;;  %v1073_v46 = vmax.f32 %v1015_v53, 0.0  ;;  %v1017_v51 = vadd.f32 %v1016_v61, %v3795_v24  ;;  %3251 = vrot.lane.b32.xlu1 %v3250_v54, %s3531_s23  ;;  %v1209_v52 = vmax.f32 %v1153_v18, %v1181_v5  ;;  %v4000_v24 = vmax.f32 %v1041_v41, %v1069_v40  ;;  %v1159_v40 = vld [vmem:[#allocation3 + $0xd8] sm:$0xff]  ;;  %v3394_v58 = vld [vmem:[%s4665_s3 + $0x4] ss:$8 sps:$4 sm:$0xff]  }
 0x1c0   : > { %v3396_v4 = vld [vmem:[%s4665_s3] ss:$8 sps:$4 sm:$0xff]   ;;  %v3399_v54 = vld [vmem:[%s4665_s3 + $0xf0] ss:$8 sps:$4 sm:$0xff]  }
 0x1c1   : > { %v1074_v23 = vmax.f32 %v1017_v51, 0.0  ;;  %v3265_v11 = vpack.i.bf16 %v1209_v52, %v4004_v10  ;;  %v4026_v47 = vmax.f32 %v1045_v59, %v1073_v46  ;;  %v3378_v59 = vld [vmem:[%s4665_s3 + $0x60] ss:$8 sps:$4 sm:$0xff]   ;;  %v3400_v46 = vld [vmem:[%s4665_s3 + $0xe4] ss:$8 sps:$4 sm:$0xff]  }
 0x1c2   : > { %v1183_v8 = vld [vmem:[#allocation3 + $0x198] sm:$0xff]  ;;  %2103 = vmatpush1.bf16.msra.mxu1 %v3378_v59  ;;  %v3402_v51 = vld [vmem:[%s4665_s3 + $0xe0] ss:$8 sps:$4 sm:$0xff]  }
 0x1c3   : > { %1131 = vst.msk [vmem:[#allocation3 + $0x1b8] sm:$0xff] %vm1076_vm6, %v1074_v23  ;;  %3256 = vrot.lane.b32.xlu1 %v3255_v45, %s3531_s23  ;;  %v1211_v7 = vmax.f32 %v1155_v60, %v1183_v8  ;;  %2104 = vmatprep.subr.bf16.mxu1 %v3379_v2  ;;  %v3403_v45 = vld [vmem:[%s4665_s3 + $0xd4] ss:$8 sps:$4 sm:$0xff]   ;;  %v3405_v60 = vld [vmem:[%s4665_s3 + $0xd0] ss:$8 sps:$4 sm:$0xff]   ;;  %vm1394_vm6 = vcmask 1044096  }
 0x1c4   : > { %v3412_v2 = vld [vmem:[%s4665_s3 + $0xa4] ss:$8 sps:$4 sm:$0xff]  }
 0x1c5   : > { %v3260_v32 = vpack.i.bf16 %v1211_v7, %v4000_v24 }
 0x1c6   : > { %v1185_v13 = vld [vmem:[#allocation3 + $0x1a8] sm:$0xff]  ;;  %2105 = vmatpush1.bf16.msra.mxu1 %v3381_v6 }
 0x1c7   : > { %3261 = vrot.lane.b32.xlu0 %v3260_v32, %s3531_s23  ;;  %3266 = vrot.lane.b32.xlu1 %v3265_v11, %s3531_s23  ;;  %v1213_v41 = vmax.f32 %v1157_v17, %v1185_v13  ;;  %v3406_v11 = vld [vmem:[%s4665_s3 + $0xc4] ss:$8 sps:$4 sm:$0xff]   ;;  %v3408_v17 = vld [vmem:[%s4665_s3 + $0xc0] ss:$8 sps:$4 sm:$0xff]  }
 0x1c8   : > { %2106 = vmatprep.subr.bf16.mxu1 %v3382_v1  ;;  %v3414_v6 = vld [vmem:[%s4665_s3 + $0xa0] ss:$8 sps:$4 sm:$0xff]  }
 0x1c9   : > { %v3270_v31 = vpack.i.bf16 %v1213_v41, %v4012_v37 }
 0x1ca   : > { %v1187_v27 = vld [vmem:[#allocation3 + $0x1b8] sm:$0xff]  ;;  %2107 = vmatpush1.bf16.msra.mxu1 %v3384_v21 }
 0x1cb   : > { %3271 = vrot.lane.b32.xlu0 %v3270_v31, %s3531_s23  ;;  %3276 = vrot.lane.b32.xlu1 %v3275_v42, %s3531_s23  ;;  %v1215_v49 = vmax.f32 %v1159_v40, %v1187_v27  ;;  %v3409_v27 = vld [vmem:[%s4665_s3 + $0xb4] ss:$8 sps:$4 sm:$0xff]  }
 0x1cc   : > { %2108 = vmatprep.subr.bf16.mxu1 %v3385_v25 }
 0x1cd   : > { %v3280_v0 = vpack.i.bf16 %v1215_v49, %v4026_v47 }
 0x1ce   : > { %2109 = vmatpush1.bf16.msra.mxu1 %v3387_v30 }
 0x1cf   : > { %3281 = vrot.lane.b32.xlu0 %v3280_v0, %s3531_s23  ;;  %2110 = vmatprep.subr.bf16.mxu1 %v3388_v35  ;;  %v3411_v0 = vld [vmem:[%s4665_s3 + $0xb0] ss:$8 sps:$4 sm:$0xff]   ;;  %s3538_s23 = smov 112  }
 0x1d2   : > { %2111 = vmatpush1.bf16.msra.mxu1 %v3390_v39 }
 0x1d3   : > { %2112 = vmatprep.subr.bf16.mxu1 %v3391_v43  ;;  %v3415_v43 = vld [vmem:[%s4665_s3 + $0x94] ss:$8 sps:$4 sm:$0xff]  }
 0x1d6   : > { %2113 = vmatpush1.bf16.msra.mxu1 %v3393_v48  ;;  %v3417_v48 = vld [vmem:[%s4665_s3 + $0x90] ss:$8 sps:$4 sm:$0xff]  }
 0x1d7   : > { %2114 = vmatprep.subr.bf16.mxu1 %v3394_v58 }
 0x1da   : > { %2115 = vmatpush1.bf16.msra.mxu1 %v3396_v4 }
 0x1db   : > { %2116 = vmatprep.subr.bf16.mxu1 %v3397_v34 }
 0x1de   : > { %2117 = vmatpush2.bf16.msra.mxu1 %v3399_v54  ;;  %v3420_v54 = vld [vmem:[%s4665_s3 + $0x80] ss:$8 sps:$4 sm:$0xff]  }
 0x1df   : > { %2118 = vmatprep.subr.bf16.mxu1 %v3400_v46 }
 0x1e2   : > { %2119 = vmatpush2.bf16.msra.mxu1 %v3402_v51 }
 0x1e3   : > { %2120 = vmatprep.subr.bf16.mxu1 %v3403_v45 }
 0x1e6   : > { %2121 = vmatpush2.bf16.msra.mxu1 %v3405_v60 }
 0x1e7   : > { %2122 = vmatprep.subr.bf16.mxu1 %v3406_v11 }
 0x1ea   : > { %2123 = vmatpush2.bf16.msra.mxu1 %v3408_v17 }
 0x1eb   : > { %2124 = vmatprep.subr.bf16.mxu1 %v3409_v27 }
 0x1ee   : > { %2125 = vmatpush2.bf16.msra.mxu1 %v3411_v0 }
 0x1ef   : > { %2126 = vmatprep.subr.bf16.mxu1 %v3412_v2 }
 0x1f2   : > { %2127 = vmatpush2.bf16.msra.mxu1 %v3414_v6 }
 0x1f3   : > { %2128 = vmatprep.subr.bf16.mxu1 %v3415_v43 }
 0x1f6   : > { %2129 = vmatpush2.bf16.msra.mxu1 %v3417_v48 }
 0x211   : > { %v3217_v33 = vpop.permute.xlu1 %3216 }
 0x212   : > { %v3219_v14 = vunpack.i.h.bf16 %v3217_v33  ;;  %v3218_v53 = vunpack.i.l.bf16 %v3217_v33 }
 0x214   : > { %v1302_v57 = vsel %vm1300_vm7, %v3218_v53, %v3219_v14  ;;  %v3418_v53 = vld [vmem:[%s4665_s3 + $0x84] ss:$8 sps:$4 sm:$0xff]  }
 0x215   : > { %v4086_v61 = vmax.f32 %v3903_v63, %v1302_v57  ;;  %2130 = vmatprep.subr.bf16.mxu1 %v3418_v53 }
 0x216   : > { %2131 = vmatpush2.bf16.msra.mxu1 %v3420_v54 }
 0x217   : > { %v3126_v5 = vpack.c.bf16 %v4086_v61, %v4086_v61 }
 0x219   : > { %v3222_v18 = vpop.permute.xlu0 %3221  ;;  %1355 = vrot.lane.b32.xlu0 %v3126_v5, %s3532_s13  ;;  %1399 = vst.msk [vmem:[#allocation4 + $0x50] sm:$0xf] %vm1350_vm8, %v3126_v5 }
 0x21a   : > { %v3224_v63 = vunpack.i.h.bf16 %v3222_v18  ;;  %v3223_v23 = vunpack.i.l.bf16 %v3222_v18 }
 0x21c   : > { %v1304_v52 = vsel %vm1300_vm7, %v3223_v23, %v3224_v63 }
 0x21d   : > { %v1332_v8 = vmax.f32 %v3918_v36, %v1304_v52  ;;  %v3227_v9 = vpop.permute.xlu0 %3226 }
 0x21e   : > { %v3229_v7 = vunpack.i.h.bf16 %v3227_v9  ;;  %v3228_v12 = vunpack.i.l.bf16 %v3227_v9 }
 0x21f   : > { %v4106_v32 = vpack.c.bf16 %v1332_v8, %v1332_v8 }
 0x220   : > { %v1303_v15 = vsel %vm1300_vm7, %v3228_v12, %v3229_v7 }
 0x221   : > { %v3232_v13 = vpop.permute.xlu1 %3231  ;;  %v1331_v36 = vmax.f32 %v3927_v44, %v1303_v15  ;;  %1451 = vst.msk [vmem:[#allocation4 + $0x60] sm:$0xf] %vm1350_vm8, %v4106_v32 }
 0x222   : > { %v3234_v41 = vunpack.i.h.bf16 %v3232_v13  ;;  %v3233_v31 = vunpack.i.l.bf16 %v3232_v13 }
 0x223   : > { %v1344_v42 = vpack.c.bf16 %v1332_v8, %v1331_v36  ;;  %v3127_v40 = vpack.c.bf16 %v1331_v36, %v1331_v36 }
 0x224   : > { %v1306_v49 = vsel %vm1300_vm7, %v3233_v31, %v3234_v41 }
 0x225   : > { %v1334_v44 = vmax.f32 %v3939_v38, %v1306_v49  ;;  %v3237_v26 = vpop.permute.xlu1 %3236  ;;  %1368 = vrot.lane.b32.xlu0 %v3127_v40, %s3533_s28  ;;  %1424 = vst.msk [vmem:[#allocation4 + $0x10] sm:$0xf] %vm1350_vm8, %v1344_v42  ;;  %1400 = vrot.lane.b32.xlu1 %v3127_v40, %s3532_s13 }
 0x226   : > { %v3239_v28 = vunpack.i.h.bf16 %v3237_v26  ;;  %v3238_v55 = vunpack.i.l.bf16 %v3237_v26 }
 0x227   : > { %v4129_v59 = vpack.c.bf16 %v1334_v44, %v1334_v44 }
 0x228   : > { %v1305_v38 = vsel %vm1300_vm7, %v3238_v55, %v3239_v28 }
 0x229   : > { %1503 = vst.msk [vmem:[#allocation4 + $0x70] sm:$0xf] %vm1350_vm8, %v4129_v59  ;;  %v1333_v1 = vmax.f32 %v3950_v56, %v1305_v38  ;;  %v3242_v21 = vpop.permute.xlu0 %3241  ;;  %1375 = vrot.lane.b32.xlu0 %v4106_v32, %s3534_s15  ;;  %1425 = vrot.lane.b32.xlu1 %v4106_v32, %s3532_s13 }
 0x22a   : > { %v3244_v25 = vunpack.i.h.bf16 %v3242_v21  ;;  %v3243_v30 = vunpack.i.l.bf16 %v3242_v21 }
 0x22b   : > { %v4145_v35 = vpack.c.bf16 %v1333_v1, %v1333_v1  ;;  %v1345_v39 = vpack.c.bf16 %v1334_v44, %v1333_v1 }
 0x22c   : > { %v1308_v56 = vsel %vm1300_vm7, %v3243_v30, %v3244_v25 }
 0x22d   : > { %v1336_v58 = vmax.f32 %v3962_v50, %v1308_v56  ;;  %v3247_v4 = vpop.permute.xlu0 %3246  ;;  %1477 = vrot.lane.b32.xlu0 %v4129_v59, %s3532_s13  ;;  %1431 = vrot.lane.b32.xlu1 %v4145_v35, %s3533_s28  ;;  %1476 = vst.msk [vmem:[#allocation4 + $0x20] sm:$0xf] %vm1350_vm8, %v1345_v39 }
 0x22e   : > { %v3249_v34 = vunpack.i.h.bf16 %v3247_v4  ;;  %v3248_v33 = vunpack.i.l.bf16 %v3247_v4 }
 0x22f   : > { %v4160_v14 = vpack.c.bf16 %v1336_v58, %v1336_v58 }
 0x230   : > { %v1307_v50 = vsel %vm1300_vm7, %v3248_v33, %v3249_v34 }
 0x231   : > { %1555 = vst.msk [vmem:[#allocation4 + $0x80] sm:$0xf] %vm1350_vm8, %v4160_v14  ;;  %v1335_v57 = vmax.f32 %v3973_v3, %v1307_v50  ;;  %v3252_v5 = vpop.permute.xlu1 %3251  ;;  %1487 = vrot.lane.b32.xlu0 %v4160_v14, %s3534_s15  ;;  %1410 = vrot.lane.b32.xlu1 %v4145_v35, %s3534_s15 }
 0x232   : > { %v3254_v46 = vunpack.i.h.bf16 %v3252_v5  ;;  %v3253_v51 = vunpack.i.l.bf16 %v3252_v5 }
 0x233   : > { %v1346_v18 = vpack.c.bf16 %v1336_v58, %v1335_v57  ;;  %v3131_v8 = vpack.c.bf16 %v1335_v57, %v1335_v57 }
 0x234   : > { %v1310_v63 = vsel %vm1300_vm7, %v3253_v51, %v3254_v46 }
 0x235   : > { %v1338_v23 = vmax.f32 %v3982_v62, %v1310_v63  ;;  %v3257_v45 = vpop.permute.xlu1 %3256  ;;  %1435 = vrot.lane.b32.xlu1 %v4129_v59, %s3534_s15  ;;  %1528 = vst.msk [vmem:[#allocation4 + $0x30] sm:$0xf] %vm1350_vm8, %v1346_v18  ;;  %v3426_v62 = vld [vmem:[%s4665_s3 + $0x174] ss:$8 sps:$4 sm:$0xff]  }
 0x236   : > { %v3259_v3 = vunpack.i.h.bf16 %v3257_v45  ;;  %v3258_v52 = vunpack.i.l.bf16 %v3257_v45  ;;  %2183 = vmatprep.subr.bf16.mxu1 %v3426_v62 }
 0x237   : > { %v4181_v60 = vpack.c.bf16 %v1338_v23, %v1338_v23 }
 0x238   : > { %v1309_v9 = vsel %vm1300_vm7, %v3258_v52, %v3259_v3 }
 0x239   : > { %1607 = vst.msk [vmem:[#allocation4 + $0x90] sm:$0xf] %vm1350_vm8, %v4181_v60  ;;  %v1337_v7 = vmax.f32 %v3993_v16, %v1309_v9  ;;  %v3267_v12 = vpop.permute.xlu1 %3266  ;;  %1483 = vrot.lane.b32.xlu1 %v3131_v8, %s3533_s28  ;;  %v3262_v36 = vpop.permute.xlu0 %3261 }
 0x23a   : > { %v3269_v17 = vunpack.i.h.bf16 %v3267_v12  ;;  %v3268_v13 = vunpack.i.l.bf16 %v3267_v12  ;;  %v3264_v42 = vunpack.i.h.bf16 %v3262_v36  ;;  %v3263_v40 = vunpack.i.l.bf16 %v3262_v36 }
 0x23b   : > { %v3133_v11 = vpack.c.bf16 %v1337_v7, %v1337_v7  ;;  %v1347_v15 = vpack.c.bf16 %v1338_v23, %v1337_v7 }
 0x23c   : > { %v1311_v27 = vsel %vm1300_vm7, %v3268_v13, %v3269_v17  ;;  %v1312_v28 = vsel %vm1300_vm7, %v3263_v40, %v3264_v42 }
 0x23d   : > { %1535 = vrot.lane.b32.xlu0 %v3133_v11, %s3533_s28  ;;  %1529 = vrot.lane.b32.xlu1 %v4160_v14, %s3532_s13  ;;  %v3277_v41 = vpop.permute.xlu1 %3276  ;;  %1580 = vst.msk [vmem:[#allocation4 + $0x40] sm:$0xf] %vm1350_vm8, %v1347_v15  ;;  %v1339_v44 = vmax.f32 %v4004_v10, %v1311_v27  ;;  %v1340_v55 = vmax.f32 %v4000_v24, %v1312_v28  ;;  %v3435_v28 = vld [vmem:[%s4665_s3 + $0x154] ss:$8 sps:$4 sm:$0xff]  }
 0x23e   : > { %v3279_v16 = vunpack.i.h.bf16 %v3277_v41  ;;  %v3278_v31 = vunpack.i.l.bf16 %v3277_v41 }
 0x23f   : > { %v3136_v10 = vpack.c.bf16 %v1340_v55, %v1340_v55 }
 0x240   : > { %v1301_v49 = vsel %vm1300_vm7, %v3278_v31, %v3279_v16  ;;  %v3429_v16 = vld [vmem:[%s4665_s3 + $0x164] ss:$8 sps:$4 sm:$0xff]  }
 0x241   : > { %v1329_v0 = vmax.f32 %v4018_v29, %v1301_v49  ;;  %1504 = vrot.lane.b32.xlu0 %v3131_v8, %s3532_s13  ;;  %1539 = vrot.lane.b32.xlu1 %v4181_v60, %s3534_s15  ;;  %v3135_v29 = vpack.c.bf16 %v1339_v44, %v1339_v44 }
 0x243   : > { %v1343_v26 = vpack.c.bf16 %v4086_v61, %v1329_v0  ;;  %v3272_v61 = vpop.permute.xlu0 %3271  ;;  %v3427_v0 = vld [vmem:[%s4665_s3 + $0x160] ss:$8 sps:$4 sm:$0xff]  }
 0x244   : > { %v3274_v2 = vunpack.i.h.bf16 %v3272_v61  ;;  %v3273_v38 = vunpack.i.l.bf16 %v3272_v61  ;;  %v3433_v61 = vld [vmem:[%s4665_s3 + $0x150] ss:$8 sps:$4 sm:$0xff]  }
 0x245   : > { %1581 = vrot.lane.b32.xlu0 %v4181_v60, %s3532_s13  ;;  %1406 = vrot.lane.b32.xlu1 %v4106_v32, %s3533_s28  ;;  %1351 = vst.msk [vmem:[#allocation4] sm:$0xf] %vm1350_vm8, %v1343_v26  ;;  %vm1391_vm8 = vcmask 654336  }
 0x246   : > { %v1313_v24 = vsel %vm1300_vm7, %v3273_v38, %v3274_v2 }
 0x247   : > { %v1341_v32 = vmax.f32 %v4012_v37, %v1313_v24  ;;  %v3282_v1 = vpop.permute.xlu0 %3281  ;;  %v3438_v24 = vld [vmem:[%s4665_s3 + $0x144] ss:$8 sps:$4 sm:$0xff]  }
 0x248   : > { %v3284_v37 = vunpack.i.h.bf16 %v3282_v1  ;;  %v3283_v21 = vunpack.i.l.bf16 %v3282_v1 }
 0x249   : > { %1587 = vrot.lane.b32.xlu0 %v3135_v29, %s3533_s28  ;;  %1452 = vrot.lane.b32.xlu1 %v4145_v35, %s3532_s13  ;;  %v3137_v6 = vpack.c.bf16 %v1341_v32, %v1341_v32 }
 0x24a   : > { %v1314_v25 = vsel %vm1300_vm7, %v3283_v21, %v3284_v37  ;;  %vm1395_vm7 = vcmask 293892  }
 0x24b   : > { %v1342_v30 = vmax.f32 %v4026_v47, %v1314_v25  ;;  %vm4373_vm9 = vmor %vm1395_vm7, %vm1394_vm6  ;;  %vm2426_vm7 = vcmask 130052  }
 0x24d   : > { %1591 = vrot.lane.b32.xlu0 %v3136_v10, %s3534_s15  ;;  %1462 = vrot.lane.b32.xlu1 %v3131_v8, %s3534_s15 }
 0x251   : > { %1514 = vrot.lane.b32.xlu0 %v3133_v11, %s3534_s15  ;;  %1458 = vrot.lane.b32.xlu1 %v4129_v59, %s3533_s28 }
 0x255   : > { %1510 = vrot.lane.b32.xlu0 %v4160_v14, %s3533_s28  ;;  %1556 = vrot.lane.b32.xlu1 %v3133_v11, %s3532_s13 }
 0x259   : > { %1608 = vrot.lane.b32.xlu0 %v3135_v29, %s3532_s13  ;;  %1566 = vrot.lane.b32.xlu1 %v3135_v29, %s3534_s15 }
 0x25d   : > { %1618 = vrot.lane.b32.xlu0 %v3137_v6, %s3534_s15  ;;  %1562 = vrot.lane.b32.xlu1 %v4181_v60, %s3533_s28 }
 0x261   : > { %1614 = vrot.lane.b32.xlu0 %v3136_v10, %s3533_s28  ;;  %1388 = vrot.lane.b32.xlu1 %v4145_v35, %s3535_s29  ;;  %v3138_v35 = vpack.c.bf16 %v1342_v30, %v1342_v30 }
 0x265   : > { %1444 = vrot.lane.b32.xlu0 %v3131_v8, %s3535_s29  ;;  %1496 = vrot.lane.b32.xlu1 %v3133_v11, %s3535_s29  ;;  %v3424_v11 = vld [vmem:[%s4665_s3 + $0x170] ss:$8 sps:$4 sm:$0xff]  }
 0x269   : > { %1548 = vrot.lane.b32.xlu0 %v3135_v29, %s3535_s29  ;;  %1418 = vrot.lane.b32.xlu1 %v4129_v59, %s3535_s29 }
 0x26d   : > { %1600 = vrot.lane.b32.xlu0 %v3137_v6, %s3535_s29  ;;  %1470 = vrot.lane.b32.xlu1 %v4160_v14, %s3535_s29  ;;  %v3436_v6 = vld [vmem:[%s4665_s3 + $0x140] ss:$8 sps:$4 sm:$0xff]  }
 0x271   : > { %1522 = vrot.lane.b32.xlu0 %v4181_v60, %s3535_s29  ;;  %1574 = vrot.lane.b32.xlu1 %v3136_v10, %s3535_s29 }
 0x275   : > { %1626 = vrot.lane.b32.xlu0 %v3138_v35, %s3535_s29  ;;  %v3441_v35 = vld [vmem:[%s4665_s3 + $0x134] ss:$8 sps:$4 sm:$0xff]  }
 0x28b   : > { %v1356_v59 = vpop.permute.xlu0 %1355 }
 0x28c   : > { %v1357_v39 = vrot.slane %v1356_v59, 4 }
 0x28e   : > { %v1359_v56 = vsel %vm1358_vm11, %v1357_v39, %v1356_v59 }
 0x28f   : > { %1364 = vst.msk [vmem:[#allocation4] sm:$0xff] %vm4245_vm12, %v1359_v56 }
 0x297   : > { %v1369_v47 = vpop.permute.xlu0 %1368  ;;  %v1401_v48 = vpop.permute.xlu1 %1400 }
 0x298   : > { %1372 = vst.msk [vmem:[#allocation4 + $0x4] sm:$0xf] %vm1371_vm13, %v1369_v47  ;;  %v1402_v58 = vrot.slane %v1401_v48, 4  ;;  %v3439_v47 = vld [vmem:[%s4665_s3 + $0x130] ss:$8 sps:$4 sm:$0xff]  }
 0x29a   : > { %v1403_v4 = vsel %vm1358_vm11, %v1402_v58, %v1401_v48 }
 0x29b   : > { %1405 = vst.msk [vmem:[#allocation4 + $0x50] sm:$0xff] %vm4245_vm12, %v1403_v4  ;;  %v1376_v34 = vpop.permute.xlu0 %1375  ;;  %v1426_v33 = vpop.permute.xlu1 %1425  ;;  %v3447_v4 = vld [vmem:[%s4665_s3 + $0x124] ss:$8 sps:$4 sm:$0xff]  }
 0x29c   : > { %v1377_v53 = vrot.slane %v1376_v34, 4  ;;  %v1427_v50 = vrot.slane %v1426_v33, 4 }
 0x29e   : > { %v1379_v54 = vsel %vm1378_vm0, %v1377_v53, %v1376_v34  ;;  %v1428_v57 = vsel %vm1358_vm11, %v1427_v50, %v1426_v33  ;;  %v3445_v53 = vld [vmem:[%s4665_s3 + $0x120] ss:$8 sps:$4 sm:$0xff]  }
 0x29f   : > { %1384 = vst.msk [vmem:[#allocation4 + $0x4] sm:$0xff] %vm4256_vm2, %v1379_v54  ;;  %v1478_v5 = vpop.permute.xlu0 %1477  ;;  %v1432_v46 = vpop.permute.xlu1 %1431 }
 0x2a0   : > { %1430 = vst.msk [vmem:[#allocation4 + $0x10] sm:$0xff] %vm4245_vm12, %v1428_v57  ;;  %v1479_v51 = vrot.slane %v1478_v5, 4  ;;  %v3452_v57 = vld [vmem:[%s4665_s3 + $0x114] ss:$8 sps:$4 sm:$0xff]  }
 0x2a1   : > { %1434 = vst.msk [vmem:[#allocation4 + $0x14] sm:$0xf] %vm1371_vm13, %v1432_v46 }
 0x2a2   : > { %v1480_v18 = vsel %vm1358_vm11, %v1479_v51, %v1478_v5  ;;  %v3450_v51 = vld [vmem:[%s4665_s3 + $0x110] ss:$8 sps:$4 sm:$0xff]  }
 0x2a3   : > { %v1411_v63 = vpop.permute.xlu1 %1410  ;;  %1482 = vst.msk [vmem:[#allocation4 + $0x20] sm:$0xff] %vm4245_vm12, %v1480_v18  ;;  %v1488_v23 = vpop.permute.xlu0 %1487 }
 0x2a4   : > { %v1489_v3 = vrot.slane %v1488_v23, 4  ;;  %v1412_v31 = vrot.slane %v1411_v63, 4 }
 0x2a6   : > { %v1490_v9 = vsel %vm1378_vm0, %v1489_v3, %v1488_v23  ;;  %v1413_v29 = vsel %vm1378_vm0, %v1412_v31, %v1411_v63 }
 0x2a7   : > { %v1436_v45 = vpop.permute.xlu1 %1435  ;;  %v3421_v17 = vld [vmem:[#allocation4] ss:$16 sps:$4 sm:$0xff]  }
 0x2a8   : > { %v1437_v52 = vrot.slane %v1436_v45, 4 }
 0x2aa   : > { %v1438_v60 = vsel %vm1378_vm0, %v1437_v52, %v1436_v45  ;;  %v3456_v52 = vld [vmem:[%s4665_s3 + $0x104] ss:$8 sps:$4 sm:$0xff]  }
 0x2ab   : > { %1440 = vst.msk [vmem:[#allocation4 + $0x14] sm:$0xff] %vm4256_vm2, %v1438_v60  ;;  %v1484_v8 = vpop.permute.xlu1 %1483 }
 0x2ac   : > { %1486 = vst.msk [vmem:[#allocation4 + $0x24] sm:$0xf] %vm1371_vm13, %v1484_v8 }
 0x2ad   : > { %1492 = vst.msk [vmem:[#allocation4 + $0x24] sm:$0xff] %vm4256_vm2, %v1490_v9  ;;  %v1704_v9 = vld [vmem:[%s4665_s3 + $0x1a0] sm:$0x33] }
 0x2af   : > { %v1536_v7 = vpop.permute.xlu0 %1535  ;;  %v1530_v12 = vpop.permute.xlu1 %1529 }
 0x2b0   : > { %v1531_v62 = vrot.slane %v1530_v12, 4 }
 0x2b2   : > { %v1532_v15 = vsel %vm1358_vm11, %v1531_v62, %v1530_v12  ;;  %v3423_v13 = vld [vmem:[#allocation4 + $0x4] ss:$16 sps:$4 sm:$0xff]   ;;  %v3454_v12 = vld [vmem:[%s4665_s3 + $0x100] ss:$8 sps:$4 sm:$0xff]  }
 0x2b3   : > { %1534 = vst.msk [vmem:[#allocation4 + $0x30] sm:$0xff] %vm4245_vm12, %v1532_v15  ;;  %v1505_v36 = vpop.permute.xlu0 %1504  ;;  %v1540_v41 = vpop.permute.xlu1 %1539  ;;  %2132 = vmatprep.mubr.bf16.mxu1 %v3423_v13  ;;  %v3065_v15 = vcombine.high %v1704_v9, %v1704_v9 }
 0x2b4   : > { %1538 = vst.msk [vmem:[#allocation4 + $0x34] sm:$0xf] %vm1371_vm13, %v1536_v7  ;;  %v1506_v42 = vrot.slane %v1505_v36, 4  ;;  %v1541_v40 = vrot.slane %v1540_v41, 4  ;;  %2133 = vmatmul.mubr.bf16.vlgmr.msra.gmra.mxu1 %v3421_v17  ;;  %v3064_v17 = vcombine.low %v1704_v9, %v1704_v9 }
 0x2b5   : > { %2184 = vmatpush1.bf16.msra.mxu1 %v3424_v11 }
 0x2b6   : > { %v1507_v27 = vsel %vm1358_vm11, %v1506_v42, %v1505_v36  ;;  %v1542_v49 = vsel %vm1378_vm0, %v1541_v40, %v1540_v41  ;;  %2185 = vmatprep.subr.bf16.mxu1 %v3429_v16  ;;  %v2095_v42 = vsel %vm2093_vm5, %v3064_v17, 0  ;;  %v3464_v40 = vld [vmem:[%s4665_s3 + $0x194] ss:$8 sps:$4 sm:$0xff]  }
 0x2b7   : > { %1509 = vst.msk [vmem:[#allocation4 + $0x70] sm:$0xff] %vm4245_vm12, %v1507_v27  ;;  %v1582_v44 = vpop.permute.xlu0 %1581  ;;  %v1407_v26 = vpop.permute.xlu1 %1406 }
 0x2b8   : > { %1544 = vst.msk [vmem:[#allocation4 + $0x34] sm:$0xff] %vm4256_vm2, %v1542_v49  ;;  %v1583_v55 = vrot.slane %v1582_v44, 4  ;;  %v1705_v49 = vld [vmem:[%s4666_s4] sm:$0x3] }
 0x2b9   : > { %1409 = vst.msk [vmem:[#allocation4 + $0x54] sm:$0xf] %vm1371_vm13, %v1407_v26  ;;  %2186 = vmatpush1.bf16.msra.mxu1 %v3427_v0  ;;  %v3462_v26 = vld [vmem:[%s4665_s3 + $0x190] ss:$8 sps:$4 sm:$0xff]  }
 0x2ba   : > { %1415 = vst.msk [vmem:[#allocation4 + $0x54] sm:$0xff] %vm4256_vm2, %v1413_v29  ;;  %v1584_v10 = vsel %vm1358_vm11, %v1583_v55, %v1582_v44  ;;  %2187 = vmatprep.subr.bf16.mxu1 %v3435_v28  ;;  %v3432_v21 = vld [vmem:[#allocation4 + $0x20] ss:$16 sps:$4 sm:$0xff]   ;;  %v3467_v55 = vld [vmem:[%s4665_s3 + $0x184] ss:$8 sps:$4 sm:$0xff]  }
 0x2bb   : > { %1586 = vst.msk [vmem:[#allocation4 + $0x40] sm:$0xff] %vm4245_vm12, %v1584_v10  ;;  %v1588_v2 = vpop.permute.xlu0 %1587  ;;  %v1453_v38 = vpop.permute.xlu1 %1452 }
 0x2bc   : > { %1590 = vst.msk [vmem:[#allocation4 + $0x44] sm:$0xf] %vm1371_vm13, %v1588_v2  ;;  %v1454_v32 = vrot.slane %v1453_v38, 4 }
 0x2bd   : > { %2188 = vmatpush1.bf16.msra.mxu1 %v3433_v61 }
 0x2be   : > { %v1455_v1 = vsel %vm1358_vm11, %v1454_v32, %v1453_v38  ;;  %2189 = vmatprep.subr.bf16.mxu1 %v3438_v24  ;;  %v3465_v38 = vld [vmem:[%s4665_s3 + $0x180] ss:$8 sps:$4 sm:$0xff]  }
 0x2bf   : > { %v3430_v37 = vld [vmem:[#allocation4 + $0x24] ss:$16 sps:$4 sm:$0xff]   ;;  %1457 = vst.msk [vmem:[#allocation4 + $0x60] sm:$0xff] %vm4245_vm12, %v1455_v1  ;;  %v1592_v25 = vpop.permute.xlu0 %1591  ;;  %v1463_v30 = vpop.permute.xlu1 %1462 }
 0x2c0   : > { %v1593_v59 = vrot.slane %v1592_v25, 4  ;;  %v1464_v39 = vrot.slane %v1463_v30, 4  ;;  %2142 = vmatprep.mubr.bf16.mxu1 %v3430_v37 }
 0x2c1   : > { %2143 = vmatmul.mubr.bf16.gmra.mxu1 %v3432_v21 }
 0x2c2   : > { %v1594_v56 = vsel %vm1378_vm0, %v1593_v59, %v1592_v25  ;;  %2190 = vmatpush1.bf16.msra.mxu1 %v3436_v6  ;;  %v1465_v34 = vsel %vm1378_vm0, %v1464_v39, %v1463_v30  ;;  %v3444_v23 = vld [vmem:[#allocation4 + $0x40] ss:$16 sps:$4 sm:$0xff]  }
 0x2c3   : > { %1596 = vst.msk [vmem:[#allocation4 + $0x44] sm:$0xff] %vm4256_vm2, %v1594_v56  ;;  %v1515_v48 = vpop.permute.xlu0 %1514  ;;  %v1459_v58 = vpop.permute.xlu1 %1458  ;;  %2191 = vmatprep.subr.bf16.mxu1 %v3441_v35 }
 0x2c4   : > { %v1516_v33 = vrot.slane %v1515_v48, 4  ;;  %1461 = vst.msk [vmem:[#allocation4 + $0x64] sm:$0xf] %vm1371_vm13, %v1459_v58 }
 0x2c5   : > { %1467 = vst.msk [vmem:[#allocation4 + $0x64] sm:$0xff] %vm4256_vm2, %v1465_v34 }
 0x2c6   : > { %2192 = vmatpush1.bf16.msra.mxu1 %v3439_v47  ;;  %v1517_v5 = vsel %vm1378_vm0, %v1516_v33, %v1515_v48  ;;  %v3453_v31 = vld [vmem:[#allocation4 + $0x60] ss:$16 sps:$4 sm:$0xff]  }
 0x2c7   : > { %v1511_v50 = vpop.permute.xlu0 %1510  ;;  %v1557_v54 = vpop.permute.xlu1 %1556  ;;  %2193 = vmatprep.subr.bf16.mxu1 %v3447_v4 }
 0x2c8   : > { %1513 = vst.msk [vmem:[#allocation4 + $0x74] sm:$0xf] %vm1371_vm13, %v1511_v50  ;;  %v1558_v46 = vrot.slane %v1557_v54, 4 }
 0x2c9   : > { %1519 = vst.msk [vmem:[#allocation4 + $0x74] sm:$0xff] %vm4256_vm2, %v1517_v5 }
 0x2ca   : > { %v1559_v18 = vsel %vm1358_vm11, %v1558_v46, %v1557_v54  ;;  %v3442_v63 = vld [vmem:[#allocation4 + $0x44] ss:$16 sps:$4 sm:$0xff]   ;;  %2194 = vmatpush1.bf16.msra.mxu1 %v3445_v53 }
 0x2cb   : > { %1561 = vst.msk [vmem:[#allocation4 + $0x80] sm:$0xff] %vm4245_vm12, %v1559_v18  ;;  %v1609_v45 = vpop.permute.xlu0 %1608  ;;  %v1567_v3 = vpop.permute.xlu1 %1566  ;;  %2195 = vmatprep.subr.bf16.mxu1 %v3452_v57  ;;  %2152 = vmatprep.mubr.bf16.mxu1 %v3442_v63 }
 0x2cc   : > { %v1610_v60 = vrot.slane %v1609_v45, 4  ;;  %v1568_v8 = vrot.slane %v1567_v3, 4  ;;  %2153 = vmatmul.mubr.bf16.gmra.mxu1 %v3444_v23 }
 0x2ce   : > { %v1611_v7 = vsel %vm1358_vm11, %v1610_v60, %v1609_v45  ;;  %2196 = vmatpush1.bf16.msra.mxu1 %v3450_v51  ;;  %v1569_v13 = vsel %vm1378_vm0, %v1568_v8, %v1567_v3  ;;  %vm2385_vm11 = vcmask 650240  }
 0x2cf   : > { %1613 = vst.msk [vmem:[#allocation4 + $0x90] sm:$0xff] %vm4245_vm12, %v1611_v7  ;;  %v1619_v62 = vpop.permute.xlu0 %1618  ;;  %v1563_v11 = vpop.permute.xlu1 %1562  ;;  %2197 = vmatprep.subr.bf16.mxu1 %v3456_v52  ;;  %vm2395_vm12 = vmor %vm355_vm1, %vm1394_vm6  ;;  %vm2651_vm1 = vcmask 130048  }
 0x2d0   : > { %v1620_v36 = vrot.slane %v1619_v62, 4  ;;  %1565 = vst.msk [vmem:[#allocation4 + $0x84] sm:$0xf] %vm1371_vm13, %v1563_v11  ;;  %v3448_v41 = vld [vmem:[#allocation4 + $0x64] ss:$16 sps:$4 sm:$0xff]  }
 0x2d1   : > { %1571 = vst.msk [vmem:[#allocation4 + $0x84] sm:$0xff] %vm4256_vm2, %v1569_v13  ;;  %2162 = vmatprep.mubr.bf16.mxu1 %v3448_v41 }
 0x2d2   : > { %2198 = vmatpush1.bf16.msra.mxu1 %v3454_v12  ;;  %v1621_v27 = vsel %vm1378_vm0, %v1620_v36, %v1619_v62  ;;  %vm2410_vm0 = vcmask 916480  }
 0x2d3   : > { %v1615_v43 = vpop.permute.xlu0 %1614  ;;  %v1389_v16 = vpop.permute.xlu1 %1388  ;;  %3066 = vmatprep.subr.msk.bf16.mxu1 %vm2093_vm5, %v3065_v15  ;;  %vm2425_vm5 = vcmask 1043968  }
 0x2d4   : > { %1617 = vst.msk [vmem:[#allocation4 + $0x94] sm:$0xf] %vm1371_vm13, %v1615_v43  ;;  %v1390_v0 = vrot.slane %v1389_v16, 4  ;;  %2163 = vmatmul.mubr.bf16.gmra.mxu1 %v3453_v31  ;;  %vm2403_vm13 = vcmask 912640  }
 0x2d5   : > { %1623 = vst.msk [vmem:[#allocation4 + $0x94] sm:$0xff] %vm4256_vm2, %v1621_v27  ;;  %vm2415_vm2 = vmor %vm2414_vm15, %vm2413_vm14 }
 0x2d6   : > { %v1392_v44 = vsel %vm1391_vm8, %v1390_v0, %v1389_v16  ;;  %2210 = vmatpush2.bf16.msra.mxu1 %v2095_v42  ;;  %v3461_v21 = vld [vmem:[#allocation4 + $0x80] ss:$16 sps:$4 sm:$0xff]  }
 0x2d7   : > { %1397 = vst.msk [vmem:[#allocation4 + $0x8] sm:$0xff] %vm4373_vm9, %v1392_v44  ;;  %v1445_v28 = vpop.permute.xlu0 %1444  ;;  %v1497_v29 = vpop.permute.xlu1 %1496  ;;  %2211 = vmatprep.subr.bf16.mxu1 %v3464_v40 }
 0x2d8   : > { %v1446_v14 = vrot.slane %v1445_v28, 4  ;;  %v1498_v10 = vrot.slane %v1497_v29, 4 }
 0x2da   : > { %v1447_v61 = vsel %vm1391_vm8, %v1446_v14, %v1445_v28  ;;  %v1499_v2 = vsel %vm1391_vm8, %v1498_v10, %v1497_v29  ;;  %2212 = vmatpush2.bf16.msra.mxu1 %v3462_v26  ;;  %v4438_v26 = vrot.slane %v1705_v49, %v569_v20  ;;  %v4444_v29 = vrot.slane %v1705_v49, %v573_v22 }
 0x2db   : > { %1449 = vst.msk [vmem:[#allocation4 + $0x18] sm:$0xff] %vm4373_vm9, %v1447_v61  ;;  %1501 = vst.msk [vmem:[#allocation4 + $0x28] sm:$0xff] %vm4373_vm9, %v1499_v2  ;;  %v1549_v24 = vpop.permute.xlu0 %1548  ;;  %v1419_v32 = vpop.permute.xlu1 %1418  ;;  %2213 = vmatprep.subr.bf16.mxu1 %v3467_v55 }
 0x2dc   : > { %v1550_v6 = vrot.slane %v1549_v24, 4  ;;  %v1420_v1 = vrot.slane %v1419_v32, 4  ;;  %v3459_v37 = vld [vmem:[#allocation4 + $0x84] ss:$16 sps:$4 sm:$0xff]  }
 0x2dd   : > { %2172 = vmatprep.mubr.bf16.mxu1 %v3459_v37 }
 0x2de   : > { %v1551_v25 = vsel %vm1391_vm8, %v1550_v6, %v1549_v24  ;;  %v1421_v30 = vsel %vm1391_vm8, %v1420_v1, %v1419_v32  ;;  %2214 = vmatpush2.bf16.msra.mxu1 %v3465_v38 }
 0x2df   : > { %1553 = vst.msk [vmem:[#allocation4 + $0x38] sm:$0xff] %vm4373_vm9, %v1551_v25  ;;  %1423 = vst.msk [vmem:[#allocation4 + $0x58] sm:$0xff] %vm4373_vm9, %v1421_v30  ;;  %v1601_v35 = vpop.permute.xlu0 %1600  ;;  %v1471_v59 = vpop.permute.xlu1 %1470  ;;  %2173 = vmatmul.mubr.bf16.gmra.mxu1 %v3461_v21 }
 0x2e0   : > { %v1602_v39 = vrot.slane %v1601_v35, 4  ;;  %v1472_v56 = vrot.slane %v1471_v59, 4 }
 0x2e2   : > { %v1603_v47 = vsel %vm1391_vm8, %v1602_v39, %v1601_v35  ;;  %v1473_v48 = vsel %vm1391_vm8, %v1472_v56, %v1471_v59  ;;  %v3470_v58 = vld [vmem:[#allocation4 + $0xc] ss:$16 sps:$4 sm:$0xff]   ;;  %v3468_v50 = vld [vmem:[#allocation4 + $0x8] ss:$16 sps:$4 sm:$0xff]  }
 0x2e3   : > { %1605 = vst.msk [vmem:[#allocation4 + $0x48] sm:$0xff] %vm4373_vm9, %v1603_v47  ;;  %1475 = vst.msk [vmem:[#allocation4 + $0x68] sm:$0xff] %vm4373_vm9, %v1473_v48  ;;  %v1523_v4 = vpop.permute.xlu0 %1522  ;;  %v1575_v34 = vpop.permute.xlu1 %1574  ;;  %3067 = vmatprep.mubr.msk.bf16.mxu1 %vm2077_vm10, %v3470_v58 }
 0x2e4   : > { %v1524_v33 = vrot.slane %v1523_v4, 4  ;;  %v1576_v53 = vrot.slane %v1575_v34, 4 }
 0x2e6   : > { %v1525_v54 = vsel %vm1391_vm8, %v1524_v33, %v1523_v4  ;;  %v1577_v57 = vsel %vm1391_vm8, %v1576_v53, %v1575_v34  ;;  %v3471_v5 = vld [vmem:[#allocation4 + $0x2c] ss:$16 sps:$4 sm:$0xff]   ;;  %v3473_v63 = vld [vmem:[#allocation4 + $0x28] ss:$16 sps:$4 sm:$0xff]  }
 0x2e7   : > { %1527 = vst.msk [vmem:[#allocation4 + $0x78] sm:$0xff] %vm4373_vm9, %v1525_v54  ;;  %1579 = vst.msk [vmem:[#allocation4 + $0x88] sm:$0xff] %vm4373_vm9, %v1577_v57  ;;  %v1627_v46 = vpop.permute.xlu0 %1626  ;;  %2216 = vmatmul.mubr.bf16.vlgmr.msra.gmra.mxu1 %v3468_v50 }
 0x2e8   : > { %v1628_v51 = vrot.slane %v1627_v46, 4  ;;  %3068 = vmatprep.mubr.msk.bf16.mxu1 %vm2077_vm10, %v3471_v5 }
 0x2ea   : > { %v1629_v18 = vsel %vm1391_vm8, %v1628_v51, %v1627_v46  ;;  %v3474_v23 = vld [vmem:[#allocation4 + $0x4c] ss:$16 sps:$4 sm:$0xff]   ;;  %v3476_v45 = vld [vmem:[#allocation4 + $0x48] ss:$16 sps:$4 sm:$0xff]  }
 0x2eb   : > { %1631 = vst.msk [vmem:[#allocation4 + $0x98] sm:$0xff] %vm4373_vm9, %v1629_v18  ;;  %vm2427_vm9 = vmor %vm2426_vm7, %vm2425_vm5 }
 0x2ee   : > { %v3477_v3 = vld [vmem:[#allocation4 + $0x6c] ss:$16 sps:$4 sm:$0xff]   ;;  %v3479_v52 = vld [vmem:[#allocation4 + $0x68] ss:$16 sps:$4 sm:$0xff]  }
 0x2ef   : > { %2226 = vmatmul.mubr.bf16.gmra.mxu1 %v3473_v63 }
 0x2f0   : > { %3069 = vmatprep.mubr.msk.bf16.mxu1 %vm2077_vm10, %v3474_v23 }
 0x2f2   : > { %v3480_v60 = vld [vmem:[#allocation4 + $0x8c] ss:$16 sps:$4 sm:$0xff]   ;;  %v3482_v8 = vld [vmem:[#allocation4 + $0x88] ss:$16 sps:$4 sm:$0xff]  }
 0x2f7   : > { %2236 = vmatmul.mubr.bf16.gmra.mxu1 %v3476_v45 }
 0x2f8   : > { %3070 = vmatprep.mubr.msk.bf16.mxu1 %vm2077_vm10, %v3477_v3 }
 0x2ff   : > { %2246 = vmatmul.mubr.bf16.gmra.mxu1 %v3479_v52 }
 0x300   : > { %3071 = vmatprep.mubr.msk.bf16.mxu1 %vm2077_vm10, %v3480_v60 }
 0x307   : > { %2256 = vmatmul.mubr.bf16.gmra.mxu1 %v3482_v8 }
 0x374   : > { %v2134_v9 = vpop.f32.mrf.mxu1 }
 0x375   : > { %v2135_v14 = vadd.f32 %v2134_v9, %v4438_v26 }
 0x376   : > { %v2136_v7 = vpop.f32.mrf.mxu1 }
 0x377   : > { %v2137_v61 = vadd.f32 %v2136_v7, %v4444_v29 }
 0x378   : > { %v2138_v12 = vpop.f32.mrf.mxu1 }
 0x379   : > { %v2139_v24 = vadd.f32 %v2138_v12, %v4438_v26 }
 0x37a   : > { %v2140_v62 = vpop.f32.mrf.mxu1 }
 0x37b   : > { %v2141_v19 = vadd.f32 %v2140_v62, %v4444_v29 }
 0x381   : > { %v2144_v11 = vpop.f32.mrf.mxu1 }
 0x382   : > { %v2145_v21 = vadd.f32 %v2144_v11, %v4438_v26 }
 0x383   : > { %v2146_v15 = vpop.f32.mrf.mxu1 }
 0x384   : > { %v2147_v59 = vadd.f32 %v2146_v15, %v4444_v29 }
 0x385   : > { %v2148_v17 = vpop.f32.mrf.mxu1 }
 0x386   : > { %v2149_v48 = vadd.f32 %v2148_v17, %v4438_v26 }
 0x387   : > { %v2150_v13 = vpop.f32.mrf.mxu1 }
 0x388   : > { %v2151_v33 = vadd.f32 %v2150_v13, %v4444_v29 }
 0x38c   : > { %v2154_v36 = vpop.f32.mrf.mxu1 }
 0x38d   : > { %v2155_v57 = vadd.f32 %v2154_v36, %v4438_v26 }
 0x38e   : > { %v2156_v41 = vpop.f32.mrf.mxu1 }
 0x38f   : > { %v2157_v18 = vadd.f32 %v2156_v41, %v4444_v29 }
 0x390   : > { %v2158_v43 = vpop.f32.mrf.mxu1 }
 0x391   : > { %v2159_v3 = vadd.f32 %v2158_v43, %v4438_v26 }
 0x392   : > { %v2160_v16 = vpop.f32.mrf.mxu1 }
 0x393   : > { %v2161_v9 = vadd.f32 %v2160_v16, %v4444_v29 }
 0x394   : > { %v2164_v31 = vpop.f32.mrf.mxu1 }
 0x395   : > { %v2165_v11 = vadd.f32 %v2164_v31, %v4438_v26 }
 0x396   : > { %v4423_v42 = vpop.f32.mrf.mxu1 }
 0x397   : > { %v2167_v36 = vadd.f32 %v4423_v42, %v4444_v29 }
 0x398   : > { %v4425_v40 = vpop.f32.mrf.mxu1 }
 0x399   : > { %v2169_v16 = vadd.f32 %v4425_v40, %v4438_v26 }
 0x39a   : > { %v4427_v27 = vpop.f32.mrf.mxu1 }
 0x39f   : > { %v4432_v0 = vpop.f32.mrf.mxu1 }
 0x3a0   : > { %v2175_v42 = vadd.f32 %v4432_v0, %v4438_v26 }
 0x3a1   : > { %v4434_v44 = vpop.f32.mrf.mxu1 }
 0x3a2   : > { %v2177_v40 = vadd.f32 %v4434_v44, %v4444_v29 }
 0x3a3   : > { %v4440_v28 = vpop.f32.mrf.mxu1 }
 0x3a5   : > { %v4446_v55 = vpop.f32.mrf.mxu1 }
 0x3a6   : > { %v2181_v0 = vadd.f32 %v4446_v55, %v4444_v29 }
 0x3a7   : > { %v2217_v10 = vpop.f32.mrf.mxu1 }
 0x3a8   : > { %v4450_v2 = vadd.f32 %v2217_v10, %v2135_v14 }
 0x3a9   : > { %v2219_v38 = vpop.f32.mrf.mxu1 }
 0x3aa   : > { %v2266_v20 = vmax.f32 %v4450_v2, 0.0  ;;  %v2220_v32 = vadd.f32 %v2219_v38, %v2137_v61  ;;  %v2171_v61 = vadd.f32 %v4427_v27, %v4444_v29  ;;  %v2179_v27 = vadd.f32 %v4440_v28, %v4438_v26 }
 0x3ab   : > { %v2221_v6 = vpop.f32.mrf.mxu1 }
 0x3ac   : > { %v2267_v22 = vmax.f32 %v2220_v32, 0.0  ;;  %v4455_v1 = vadd.f32 %v2221_v6, %v2139_v24 }
 0x3ad   : > { %v2223_v37 = vpop.f32.mrf.mxu1 }
 0x3ae   : > { %2287 = vst.msk [vmem:[#allocation5 + $0x8] sm:$0xff] %vm375_vm4, %v2267_v22  ;;  %v2268_v25 = vmax.f32 %v4455_v1, 0.0  ;;  %v2224_v30 = vadd.f32 %v2223_v37, %v2141_v19 }
 0x3af   : > { %v2227_v35 = vpop.f32.mrf.mxu1 }
 0x3b0   : > { %v2269_v39 = vmax.f32 %v2224_v30, 0.0  ;;  %v4461_v56 = vadd.f32 %v2227_v35, %v2145_v21 }
 0x3b1   : > { %v2229_v47 = vpop.f32.mrf.mxu1 }
 0x3b2   : > { %2289 = vst.msk [vmem:[#allocation5 + $0x18] sm:$0xff] %vm375_vm4, %v2269_v39  ;;  %v2270_v58 = vmax.f32 %v4461_v56, 0.0  ;;  %v2230_v4 = vadd.f32 %v2229_v47, %v2147_v59 }
 0x3b3   : > { %v2231_v34 = vpop.f32.mrf.mxu1 }
 0x3b4   : > { %v2271_v53 = vmax.f32 %v2230_v4, 0.0  ;;  %v4467_v50 = vadd.f32 %v2231_v34, %v2149_v48 }
 0x3b5   : > { %v2233_v54 = vpop.f32.mrf.mxu1  ;;  %v2307_v1 = vld [vmem:[#allocation5 + $0x8] sm:$0xff] }
 0x3b6   : > { %2291 = vst.msk [vmem:[#allocation5 + $0x28] sm:$0xff] %vm375_vm4, %v2271_v53  ;;  %v2272_v5 = vmax.f32 %v4467_v50, 0.0  ;;  %v2234_v46 = vadd.f32 %v2233_v54, %v2151_v33  ;;  %v3489_v50 = vld [vmem:[%s4667_s5 + $0x78] sm:$0xff]  }
 0x3b7   : > { %v2237_v51 = vpop.f32.mrf.mxu1  ;;  %3143 = vmatprep.subr.bf16.mxu1 %v3489_v50 }
 0x3b8   : > { %v2273_v63 = vmax.f32 %v2234_v46, 0.0  ;;  %v4473_v23 = vadd.f32 %v2237_v51, %v2155_v57 }
 0x3b9   : > { %v2239_v45 = vpop.f32.mrf.mxu1  ;;  %v2309_v34 = vld [vmem:[#allocation5 + $0x18] sm:$0xff] }
 0x3ba   : > { %2293 = vst.msk [vmem:[#allocation5 + $0x38] sm:$0xff] %vm375_vm4, %v2273_v63  ;;  %v2274_v52 = vmax.f32 %v4473_v23, 0.0  ;;  %v2240_v60 = vadd.f32 %v2239_v45, %v2157_v18  ;;  %v3491_v23 = vld [vmem:[%s4667_s5 + $0x70] sm:$0xff]  }
 0x3bb   : > { %v2241_v8 = vpop.f32.mrf.mxu1 }
 0x3bc   : > { %v2275_v7 = vmax.f32 %v2240_v60, 0.0  ;;  %v4479_v12 = vadd.f32 %v2241_v8, %v2159_v3 }
 0x3bd   : > { %v2243_v62 = vpop.f32.mrf.mxu1  ;;  %v2311_v46 = vld [vmem:[#allocation5 + $0x28] sm:$0xff] }
 0x3be   : > { %2295 = vst.msk [vmem:[#allocation5 + $0x48] sm:$0xff] %vm375_vm4, %v2275_v7  ;;  %v2276_v15 = vmax.f32 %v4479_v12, 0.0  ;;  %v2244_v17 = vadd.f32 %v2243_v62, %v2161_v9  ;;  %v3483_v7 = vld [vmem:[%s4667_s5 + $0xb8] sm:$0xff]  }
 0x3bf   : > { %v2247_v13 = vpop.f32.mrf.mxu1 }
 0x3c0   : > { %v2277_v41 = vmax.f32 %v2244_v17, 0.0  ;;  %v2248_v43 = vadd.f32 %v2247_v13, %v2165_v11  ;;  %v4521_v9 = vmax.f32 %v2266_v20, %v2276_v15  ;;  %v3537_v11 = vmov 0   ;;  %v3490_v15 = vld [vmem:[%s4667_s5 + $0x38] sm:$0xff]   ;;  %v3492_v17 = vld [vmem:[%s4667_s5 + $0x30] sm:$0xff]   ;;  %v3493_v13 = vld [vmem:[%s4667_s5 + $0x68] sm:$0xff]  }
 0x3c1   : > { %v2249_v49 = vpop.f32.mrf.mxu1  ;;  %v2313_v45 = vld [vmem:[#allocation5 + $0x38] sm:$0xff]  ;;  %2695 = vmatprep.subr.bf16.mxu0 %v3537_v11  ;;  %3144 = vmatpush3.bf16.msra.mxu1 %v3490_v15 }
 0x3c2   : > { %2297 = vst.msk [vmem:[#allocation5 + $0x58] sm:$0xff] %vm375_vm4, %v2277_v41  ;;  %v2278_v14 = vmax.f32 %v2248_v43, 0.0  ;;  %v2250_v10 = vadd.f32 %v2249_v49, %v2167_v36  ;;  %2696 = vmatpush1.bf16.msra.mxu0 %v3483_v7  ;;  %3145 = vmatprep.subr.bf16.mxu1 %v3491_v23  ;;  %v3485_v36 = vld [vmem:[%s4667_s5 + $0xa8] sm:$0xff]   ;;  %v3496_v43 = vld [vmem:[%s4667_s5 + $0x60] sm:$0xff]  }
 0x3c3   : > { %v2251_v31 = vpop.f32.mrf.mxu1  ;;  %2697 = vmatprep.subr.bf16.mxu0 %v3537_v11  ;;  %v3495_v41 = vld [vmem:[%s4667_s5 + $0x28] sm:$0xff]   ;;  %v3486_v49 = vld [vmem:[%s4667_s5 + $0xa0] sm:$0xff]  }
 0x3c4   : > { %v2279_v38 = vmax.f32 %v2250_v10, 0.0  ;;  %v2252_v24 = vadd.f32 %v2251_v31, %v2169_v16  ;;  %v4504_v26 = vmax.f32 %v2268_v25, %v2278_v14  ;;  %v3497_v16 = vld [vmem:[%s4667_s5 + $0x20] sm:$0xff]   ;;  %v3487_v14 = vld [vmem:[%s4667_s5 + $0x98] sm:$0xff]   ;;  %v3488_v10 = vld [vmem:[%s4667_s5 + $0x90] sm:$0xff]  }
 0x3c5   : > { %v2253_v32 = vpop.f32.mrf.mxu1  ;;  %v2315_v12 = vld [vmem:[#allocation5 + $0x48] sm:$0xff]  ;;  %3146 = vmatpush3.bf16.msra.mxu1 %v3492_v17  ;;  %v3512_v17 = vld [vmem:[%s4669_s7 + $0x38] sm:$0xff]  }
 0x3c6   : > { %2299 = vst.msk [vmem:[#allocation5 + $0x68] sm:$0xff] %vm375_vm4, %v2279_v38  ;;  %v2280_v6 = vmax.f32 %v2252_v24, 0.0  ;;  %v2254_v19 = vadd.f32 %v2253_v32, %v2171_v61  ;;  %3147 = vmatprep.subr.bf16.mxu1 %v3493_v13  ;;  %v3494_v31 = vld [vmem:[%s4667_s5 + $0x88] sm:$0xff]   ;;  %v3498_v61 = vld [vmem:[%s4667_s5 + $0x58] sm:$0xff]   ;;  %v3500_v24 = vld [vmem:[%s4667_s5 + $0x80] sm:$0xff]  }
 0x3c7   : > { %v2257_v22 = vpop.f32.mrf.mxu1  ;;  %v3499_v38 = vld [vmem:[%s4667_s5 + $0x18] sm:$0xff]   ;;  %v3501_v32 = vld [vmem:[%s4667_s5 + $0x50] sm:$0xff]  }
 0x3c8   : > { %v2281_v37 = vmax.f32 %v2254_v19, 0.0  ;;  %v2258_v21 = vadd.f32 %v2257_v22, %v2175_v42  ;;  %v4511_v55 = vmax.f32 %v2270_v58, %v2280_v6  ;;  %v3502_v6 = vld [vmem:[%s4667_s5 + $0x10] sm:$0xff]  }
 0x3c9   : > { %v2259_v30 = vpop.f32.mrf.mxu1  ;;  %v2317_v29 = vld [vmem:[#allocation5 + $0x58] sm:$0xff]  ;;  %3148 = vmatpush3.bf16.msra.mxu1 %v3495_v41 }
 0x3ca   : > { %2301 = vst.msk [vmem:[#allocation5 + $0x78] sm:$0xff] %vm375_vm4, %v2281_v37  ;;  %v2282_v35 = vmax.f32 %v2258_v21, 0.0  ;;  %v2260_v59 = vadd.f32 %v2259_v30, %v2177_v40  ;;  %v2327_v63 = vmax.f32 %v2307_v1, %v2317_v29  ;;  %3149 = vmatprep.subr.bf16.mxu1 %v3496_v43  ;;  %v3513_v43 = vld [vmem:[%s4669_s7 + $0x30] sm:$0xff]  }
 0x3cb   : > { %v2261_v39 = vpop.f32.mrf.mxu1 }
 0x3cc   : > { %v2283_v47 = vmax.f32 %v2260_v59, 0.0  ;;  %v2262_v48 = vadd.f32 %v2261_v39, %v2179_v27  ;;  %v4517_v60 = vmax.f32 %v2272_v5, %v2282_v35  ;;  %v3305_v58 = vpack.i.bf16 %v2327_v63, %v4521_v9  ;;  %v3484_v5 = vld [vmem:[%s4667_s5 + $0xb0] sm:$0xff]   ;;  %v3503_v59 = vld [vmem:[%s4667_s5 + $0x48] sm:$0xff]  }
 0x3cd   : > { %v2263_v4 = vpop.f32.mrf.mxu1  ;;  %v2319_v33 = vld [vmem:[#allocation5 + $0x68] sm:$0xff]  ;;  %2698 = vmatpush1.bf16.msra.mxu0 %v3484_v5  ;;  %3150 = vmatpush3.bf16.msra.mxu1 %v3497_v16  ;;  %v3515_v16 = vld [vmem:[%s4669_s7 + $0x20] sm:$0xff]  }
 0x3ce   : > { %2303 = vst.msk [vmem:[#allocation5 + $0x88] sm:$0xff] %vm375_vm4, %v2283_v47  ;;  %v2284_v44 = vmax.f32 %v2262_v48, 0.0  ;;  %v2264_v53 = vadd.f32 %v2263_v4, %v2181_v0  ;;  %v2329_v28 = vmax.f32 %v2309_v34, %v2319_v33  ;;  %2699 = vmatprep.subr.bf16.mxu0 %v3537_v11  ;;  %3151 = vmatprep.subr.bf16.mxu1 %v3498_v61  ;;  %v3519_v61 = vld [vmem:[%s4669_s7] sm:$0xff]  }
 0x3d0   : > { %v2285_v54 = vmax.f32 %v2264_v53, 0.0  ;;  %v3285_v57 = vpack.i.bf16 %v2329_v28, %v4504_v26  ;;  %v4532_v2 = vmax.f32 %v2274_v52, %v2284_v44  ;;  %v3504_v53 = vld [vmem:[%s4667_s5 + $0x8] sm:$0xff]   ;;  %v3505_v28 = vld [vmem:[%s4667_s5 + $0x40] sm:$0xff]  }
 0x3d1   : > { %v2321_v51 = vld [vmem:[#allocation5 + $0x78] sm:$0xff]  ;;  %2700 = vmatpush1.bf16.msra.mxu0 %v3485_v36  ;;  %3152 = vmatpush3.bf16.msra.mxu1 %v3499_v38 }
 0x3d2   : > { %2305 = vst.msk [vmem:[#allocation5 + $0x98] sm:$0xff] %vm375_vm4, %v2285_v54  ;;  %3286 = vrot.lane.b32.xlu1 %v3285_v57, %s3536_s20  ;;  %v2331_v18 = vmax.f32 %v2311_v46, %v2321_v51  ;;  %2701 = vmatprep.subr.bf16.mxu0 %v3537_v11  ;;  %vm2366_vm4 = vcmask 392192   ;;  %v3506_v54 = vld [vmem:[%s4667_s5 + $0xc0] sm:$0xff]  }
 0x3d3   : > { %3153 = vmatprep.subr.bf16.mxu1 %v3501_v32  ;;  %v3507_v51 = vld [vmem:[%s4667_s5] sm:$0xff]  }
 0x3d4   : > { %v3295_v25 = vpack.i.bf16 %v2331_v18, %v4511_v55  ;;  %v3076_v32 = vld [vmem:[%s4668_s6] ss:$0 sm:$0xff] }
 0x3d5   : > { %v2323_v3 = vld [vmem:[#allocation5 + $0x88] sm:$0xff]  ;;  %2702 = vmatpush1.bf16.msra.mxu0 %v3486_v49  ;;  %3154 = vmatpush3.bf16.msra.mxu1 %v3502_v6 }
 0x3d6   : > { %3296 = vrot.lane.b32.xlu1 %v3295_v25, %s3536_s20  ;;  %v2333_v8 = vmax.f32 %v2313_v45, %v2323_v3  ;;  %2703 = vmatprep.subr.bf16.mxu0 %v3537_v11  ;;  %v3514_v49 = vld [vmem:[%s4669_s7 + $0x28] sm:$0xff]  }
 0x3d7   : > { %3155 = vmatprep.subr.bf16.mxu1 %v3503_v59 }
 0x3d8   : > { %v3290_v56 = vpack.i.bf16 %v2333_v8, %v4517_v60 }
 0x3d9   : > { %v2325_v62 = vld [vmem:[#allocation5 + $0x98] sm:$0xff]  ;;  %2704 = vmatpush1.bf16.msra.mxu0 %v3487_v14  ;;  %3156 = vmatpush3.bf16.msra.mxu1 %v3504_v53 }
 0x3da   : > { %3291 = vrot.lane.b32.xlu0 %v3290_v56, %s3536_s20  ;;  %3306 = vrot.lane.b32.xlu1 %v3305_v58, %s3536_s20  ;;  %v2335_v20 = vmax.f32 %v2315_v12, %v2325_v62  ;;  %v3539_v56 = vmov 0.0   ;;  %v3516_v14 = vld [vmem:[%s4669_s7 + $0x18] sm:$0xff]  }
 0x3db   : > { %2705 = vmatprep.subr.bf16.mxu0 %v3537_v11  ;;  %3157 = vmatprep.subr.bf16.mxu1 %v3505_v28 }
 0x3dc   : > { %v3300_v52 = vpack.i.bf16 %v2335_v20, %v4532_v2 }
 0x3dd   : > { %2706 = vmatpush1.bf16.msra.mxu0 %v3488_v10  ;;  %3158 = vmatpush3.bf16.msra.mxu1 %v3507_v51  ;;  %v3517_v10 = vld [vmem:[%s4669_s7 + $0x10] sm:$0xff]  }
 0x3de   : > { %3301 = vrot.lane.b32.xlu0 %v3300_v52, %s3536_s20  ;;  %2707 = vmatprep.subr.bf16.mxu0 %v3537_v11 }
 0x3df   : > { %3174 = vmatprep.subr.bf16.mxu1 %v3539_v56 }
 0x3e1   : > { %2708 = vmatpush1.bf16.msra.mxu0 %v3494_v31  ;;  %v3518_v31 = vld [vmem:[%s4669_s7 + $0x8] sm:$0xff]  }
 0x3e2   : > { %2709 = vmatprep.subr.bf16.mxu0 %v3537_v11 }
 0x3e5   : > { %2710 = vmatpush1.bf16.msra.mxu0 %v3500_v24 }
 0x3e6   : > { %2725 = vmatprep.subr.bf16.mxu0 %v3537_v11 }
 0x3e9   : > { %2726 = vmatpush2.bf16.msra.mxu0 %v3506_v54 }
 0x444   : > { %v3287_v42 = vpop.permute.xlu1 %3286 }
 0x445   : > { %v3289_v19 = vunpack.i.h.bf16 %v3287_v42  ;;  %v3288_v22 = vunpack.i.l.bf16 %v3287_v42 }
 0x447   : > { %v2368_v40 = vsel %vm2366_vm4, %v3288_v22, %v3289_v19 }
 0x448   : > { %v3297_v37 = vpop.permute.xlu1 %3296  ;;  %v2378_v21 = vmax.f32 %v4504_v26, %v2368_v40 }
 0x449   : > { %v3299_v30 = vunpack.i.h.bf16 %v3297_v37  ;;  %v3298_v27 = vunpack.i.l.bf16 %v3297_v37 }
 0x44a   : > { %v3139_v35 = vpack.c.bf16 %v2378_v21, %v2378_v21 }
 0x44b   : > { %v2369_v39 = vsel %vm2366_vm4, %v3298_v27, %v3299_v30 }
 0x44c   : > { %v3292_v0 = vpop.permute.xlu0 %3291  ;;  %2390 = vrot.lane.b32.xlu0 %v3139_v35, %s3535_s29  ;;  %v3307_v47 = vpop.permute.xlu1 %3306  ;;  %v2379_v48 = vmax.f32 %v4511_v55, %v2369_v39  ;;  %v3107_v39 = vld [vmem:[%s4670_s8] ss:$0 sm:$0xff] }
 0x44d   : > { %v3294_v4 = vunpack.i.h.bf16 %v3292_v0  ;;  %v3293_v34 = vunpack.i.l.bf16 %v3292_v0  ;;  %v3309_v33 = vunpack.i.h.bf16 %v3307_v47  ;;  %v3308_v44 = vunpack.i.l.bf16 %v3307_v47 }
 0x44e   : > { %v3140_v26 = vpack.c.bf16 %v2379_v48, %v2379_v48 }
 0x44f   : > { %v2367_v57 = vsel %vm2366_vm4, %v3308_v44, %v3309_v33  ;;  %v2370_v46 = vsel %vm2366_vm4, %v3293_v34, %v3294_v4 }
 0x450   : > { %v2377_v29 = vmax.f32 %v4521_v9, %v2367_v57  ;;  %v3302_v55 = vpop.permute.xlu0 %3301  ;;  %2400 = vrot.lane.b32.xlu0 %v3140_v26, %s3530_s26  ;;  %v2380_v18 = vmax.f32 %v4517_v60, %v2370_v46 }
 0x451   : > { %v3304_v1 = vunpack.i.h.bf16 %v3302_v55  ;;  %v3303_v25 = vunpack.i.l.bf16 %v3302_v55 }
 0x452   : > { %v3141_v63 = vpack.c.bf16 %v2380_v18, %v2380_v18  ;;  %v2382_v45 = vpack.c.bf16 %v2378_v21, %v2377_v29 }
 0x453   : > { %v2371_v3 = vsel %vm2366_vm4, %v3303_v25, %v3304_v1 }
 0x454   : > { %2407 = vrot.lane.b32.xlu1 %v3141_v63, %s3538_s23  ;;  %v2381_v8 = vmax.f32 %v4532_v2, %v2371_v3  ;;  %2386 = vst.msk [vmem:[#allocation6] sm:$0xf] %vm2385_vm11, %v2382_v45  ;;  %s2909_s23 = sshll.u32 %s4681_s10, 3 }
 0x455   : > { %s330_s20 = scalar_lea.vmem %s4671_s9, %s2909_s23 }
 0x456   : > { %v3142_v9 = vpack.c.bf16 %v2381_v8, %v2381_v8 }
 0x458   : > { %2420 = vrot.lane.b32.xlu1 %v3142_v9, %s3528_s27 }
 0x4be   : > { %v2391_v60 = vpop.permute.xlu0 %2390 }
 0x4bf   : > { %v2392_v58 = vrot.slane %v2391_v60, 4 }
 0x4c1   : > { %v2393_v7 = vsel %vm1391_vm8, %v2392_v58, %v2391_v60 }
 0x4c2   : > { %v2401_v12 = vpop.permute.xlu0 %2400  ;;  %2396 = vst.msk [vmem:[#allocation6] sm:$0xff] %vm2395_vm12, %v2393_v7 }
 0x4c3   : > { %2404 = vst.msk [vmem:[#allocation6 + $0x4] sm:$0xf] %vm2403_vm13, %v2401_v12 }
 0x4c6   : > { %v2408_v62 = vpop.permute.xlu1 %2407 }
 0x4c7   : > { %v2409_v11 = vrot.slane %v2408_v62, 4 }
 0x4c9   : > { %v2411_v2 = vsel %vm2410_vm0, %v2409_v11, %v2408_v62 }
 0x4ca   : > { %2416 = vst.msk [vmem:[#allocation6 + $0x4] sm:$0xff] %vm2415_vm2, %v2411_v2  ;;  %v2421_v20 = vpop.permute.xlu1 %2420 }
 0x4cb   : > { %v2422_v50 = vrot.slane %v2421_v20, 4 }
 0x4cd   : > { %v2423_v5 = vsel %vm368_vm3, %v2422_v50, %v2421_v20  ;;  %vm3540_vm3 = vmmov 0  }
 0x4ce   : > { %2428 = vst.msk [vmem:[#allocation6 + $0x8] sm:$0xff] %vm2427_vm9, %v2423_v5 }
 0x4d1   : > { %v2429_v15 = vld [vmem:[#allocation6] sm:$0xff] }
 0x4d2   : > { %v3077_v23 = vcombine.low %v2429_v15, %v2429_v15  ;;  %v3078_v52 = vcombine.high %v2429_v15, %v2429_v15 }
 0x4d4   : > { %2687 = vmatprep.mubr.bf16.mxu1 %v3078_v52 }
 0x4d5   : > { %2688 = vmatmul.mubr.bf16.vlgmr.msra.gmra.mxu1 %v3077_v23  ;;  %v2430_v13 = vld [vmem:[#allocation6 + $0x8] sm:$0xff] }
 0x4d6   : > { %v3079_v36 = vcombine.low %v2430_v13, %v2430_v13  ;;  %v3080_v41 = vcombine.high %v2430_v13, %v2430_v13  ;;  %3175 = vmatpush3.bf16.msra.mxu1 %v3512_v17  ;;  %3190 = vmatprep.mubr.msk.bf16.mxu1 %vm3540_vm3, %v3539_v56 }
 0x4d7   : > { %3176 = vmatprep.subr.bf16.mxu1 %v3539_v56 }
 0x4d8   : > { %3106 = vmatprep.mubr.msk.bf16.mxu0 %vm2651_vm1, %v3080_v41 }
 0x4d9   : > { %2728 = vmatmul.mubr.bf16.vlgmr.msra.gmra.mxu0 %v3079_v36 }
 0x4da   : > { %3177 = vmatpush3.bf16.msra.mxu1 %v3513_v43 }
 0x4db   : > { %3178 = vmatprep.subr.bf16.mxu1 %v3539_v56 }
 0x4de   : > { %3179 = vmatpush3.bf16.msra.mxu1 %v3514_v49 }
 0x4df   : > { %3180 = vmatprep.subr.bf16.mxu1 %v3539_v56 }
 0x4e2   : > { %3181 = vmatpush3.bf16.msra.mxu1 %v3515_v16 }
 0x4e3   : > { %3182 = vmatprep.subr.bf16.mxu1 %v3539_v56 }
 0x4e6   : > { %3183 = vmatpush3.bf16.msra.mxu1 %v3516_v14 }
 0x4e7   : > { %3184 = vmatprep.subr.bf16.mxu1 %v3539_v56 }
 0x4ea   : > { %3185 = vmatpush3.bf16.msra.mxu1 %v3517_v10 }
 0x4eb   : > { %3186 = vmatprep.subr.bf16.mxu1 %v3539_v56 }
 0x4ee   : > { %3187 = vmatpush3.bf16.msra.mxu1 %v3518_v31 }
 0x4ef   : > { %3188 = vmatprep.subr.bf16.mxu1 %v3539_v56 }
 0x4f2   : > { %3189 = vmatpush3.bf16.msra.mxu1 %v3519_v61 }
 0x595   : > { %v3159_v38 = vpop.f32.mrf.mxu1 }
 0x597   : > { %v3160_v24 = vpop.f32.mrf.mxu1 }
 0x598   : > { %v3161_v42 = vadd.f32 %v3160_v24, %v3159_v38 }
 0x599   : > { %v3162_v6 = vpop.f32.mrf.mxu1  ;;  %v2729_v19 = vpop.f32.mrf.mxu0 }
 0x59a   : > { %v2690_v22 = vadd.f32 %v3161_v42, %v3076_v32 }
 0x59b   : > { %v3163_v40 = vpop.f32.mrf.mxu1  ;;  %v2731_v37 = vpop.f32.mrf.mxu0 }
 0x59c   : > { %v2730_v21 = vadd.f32 %v2729_v19, %v2690_v22 }
 0x59d   : > { %v2732_v30 = vpop.f32.mrf.mxu0 }
 0x59e   : > { %v2735_v27 = vmax.f32 %v2730_v21, 0.0 }
 0x59f   : > { %v2733_v35 = vpop.f32.mrf.mxu0 }
 0x5a0   : > { %v2736_v59 = vpack.c.bf16 %v2735_v27, %v2735_v27 }
 0x5a2   : > { %3191 = vmatmul.mubr.bf16.vlgmr.msra.gmra.mxu1 %v2736_v59 }
 0x662   : > { %v2842_v0 = vpop.f32.mrf.mxu1 }
 0x663   : > { %v2843_v47 = vadd.f32 %v3107_v39, %v2842_v0 }
 0x664   : > { %v3192_v48 = vpop.f32.mrf.mxu1 }
 0x665   : > { %2848 = vst [vmem:[%s330_s20] sm:$0xff] %v2843_v47 }
 0x666   : > { %v2845_v4 = vpop.f32.mrf.mxu1 }
 0x668   : > { %v3193_v34 = vpop.f32.mrf.mxu1 }
 0x669 PF: > { %s19_s30 = sadd.s32 1, %s3526_s30  }
 0x66a   : > { %p16_p4 = scmp.ge.s32.totalorder %s19_s30, 4  }
 0x66c   :  { %18 = sbr.rel (!%p16_p4) target bundleno = 1 (0x1), region = 86 }

</bundles_post_ra>
